<compile_context>
chip_gen: v7x
topology: tpu7x:2x2x1
jax: 0.10.0
libtpu: 0.0.40
codegen_flags: <defaults>
</compile_context>

<pallas_src>
import functools

import jax
import jax.numpy as jnp
from jax.experimental import pallas as pl
from jax.experimental.pallas import tpu as pltpu


def _round_up(x, m):
    return ((x + m - 1) // m) * m


def _layernorm(x, gamma, beta, eps):
    mean = jnp.mean(x, axis=-1, keepdims=True)
    var = jnp.mean((x - mean) ** 2, axis=-1, keepdims=True)
    return (x - mean) * jax.lax.rsqrt(var + eps) * gamma + beta


def _gelu_exact(x):
    # torch.nn.functional.gelu default = exact erf formulation
    return 0.5 * x * (1.0 + jax.lax.erf(x * jnp.float32(0.7071067811865476)))


def _block_kernel(*refs, eps, has_residual):
    if has_residual:
        (x_ref, res_ref,
         g1_ref, b1_ref, g2_ref, b2_ref,
         w1_ref, bb1_ref, w2_ref, bb2_ref,
         out_ref, res_out_ref,
         acc_ref, h2_ref) = refs
    else:
        (x_ref,
         g1_ref, b1_ref, g2_ref, b2_ref,
         w1_ref, bb1_ref, w2_ref, bb2_ref,
         out_ref, res_out_ref,
         acc_ref, h2_ref) = refs
        res_ref = None

    k = pl.program_id(1)

    # LayerNorms / residual math only once per row block (first H-chunk step).
    @pl.when(k == 0)
    def _():
        x = x_ref[...].astype(jnp.float32)
        if has_residual:
            res1 = x + res_ref[...].astype(jnp.float32)
        else:
            res1 = x
        h = _layernorm(res1, g1_ref[...], b1_ref[...], eps)
        # TODO(synk): GAB architecture is template-defined (to be discovered); identity passthrough.
        res2 = h + res1
        h2 = _layernorm(res2, g2_ref[...], b2_ref[...], eps)
        res_out_ref[...] = res2.astype(res_out_ref.dtype)
        h2_ref[...] = h2.astype(h2_ref.dtype)          # bf16 MXU operand, reused across chunks
        acc_ref[...] = jnp.zeros_like(acc_ref)

    # MLP H-chunk: fc1 tile -> exact GELU -> fc2 tile, f32 accumulation in VMEM scratch.
    z = jnp.dot(h2_ref[...], w1_ref[...],
                preferred_element_type=jnp.float32) + bb1_ref[...]
    z = _gelu_exact(z)
    acc_ref[...] += jnp.dot(z.astype(jnp.bfloat16), w2_ref[...],
                            preferred_element_type=jnp.float32)

    @pl.when(k == pl.num_programs(1) - 1)
    def _():
        out_ref[...] = (acc_ref[...] + bb2_ref[...]).astype(out_ref.dtype)


def block_forward(hidden_states, residual, params, *, eps=1e-5, tm=512, h_chunk=512):
    """hidden_states: (B, S, D); residual: (B, S, D) or None.

    Returns (out, new_residual): out in hidden_states.dtype, new_residual in f32.
    Weights params["w1"]/params["w2"] should be pre-cast to bf16 (cast here only
    as a fallback so the per-call path stays free of extra HBM passes).
    """
    B, S, D = hidden_states.shape
    N = B * S
    H = params["w1"].shape[1]

    # H-chunk size (multiple of 128/256 keeps the fc1-out / fc2-K dim MXU-native).
    if H % h_chunk != 0 or H < h_chunk:
        h_chunk = H
    n_k = H // h_chunk

    # Row tile: large for HBM efficiency, but prefer >=2 row blocks so the
    # "parallel" grid axis can be sharded across TensorCores (megacore / v7x).
    tm = min(tm, _round_up(N, 8))
    if N > 256 and pl.cdiv(N, tm) < 2:
        tm = _round_up(pl.cdiv(N, 2), 128)
    n_blocks = pl.cdiv(N, tm)

    x = hidden_states.reshape(N, D)                    # free view, native dtype
    has_residual = residual is not None
    if has_residual:
        res = residual.reshape(N, D)

    w1 = params["w1"]
    w2 = params["w2"]
    if w1.dtype != jnp.bfloat16:
        w1 = w1.astype(jnp.bfloat16)                   # fallback; pre-cast preferred
    if w2.dtype != jnp.bfloat16:
        w2 = w2.astype(jnp.bfloat16)

    out_dtype = hidden_states.dtype
    res_dtype = jnp.float32                            # keep the residual stream in f32

    row_spec = pl.BlockSpec((tm, D), lambda i, k: (i, 0))

    def const2(shape):
        return pl.BlockSpec(shape, lambda i, k: (0, 0))

    param_specs = [
        const2((1, D)), const2((1, D)),                             # norm  gamma, beta
        const2((1, D)), const2((1, D)),                             # norm2 gamma, beta
        pl.BlockSpec((D, h_chunk), lambda i, k: (0, k)),            # fc1 weight tile (bf16)
        pl.BlockSpec((1, h_chunk), lambda i, k: (0, k)),            # fc1 bias tile
        pl.BlockSpec((h_chunk, D), lambda i, k: (k, 0)),            # fc2 weight tile (bf16)
        const2((1, D)),                                             # fc2 bias
    ]
    in_specs = ([row_spec, row_spec] if has_residual else [row_spec]) + param_specs

    param_args = (params["g1"], params["b1"], params["g2"], params["b2"],
                  w1, params["bb1"], w2, params["bb2"])
    call_args = ((x, res) if has_residual else (x,)) + param_args

    # VMEM budget: double-buffered streams + scratch + fc1/GELU live intermediate.
    x_item = jnp.dtype(hidden_states.dtype).itemsize
    row_in_bytes = (2 if has_residual else 1) * tm * D * x_item
    row_out_bytes = tm * D * (jnp.dtype(out_dtype).itemsize + jnp.dtype(res_dtype).itemsize)
    wtile_bytes = 2 * D * h_chunk * 2                  # w1 + w2 chunk tiles (bf16)
    small_bytes = (5 * D + h_chunk) * 4                # LN params + fc biases (f32)
    scratch_bytes = tm * D * (4 + 2)                   # f32 acc + bf16 h2
    live_bytes = tm * h_chunk * 4                      # fc1/GELU intermediate
    vmem_needed = (2 * (row_in_bytes + row_out_bytes + wtile_bytes + small_bytes)
                   + scratch_bytes + live_bytes + (8 << 20))
    try:
        vmem_cap = int(getattr(pltpu.get_tpu_info(), "vmem_capacity_bytes", 64 << 20))
    except Exception:
        vmem_cap = 64 << 20
    vmem_limit = int(min(max(vmem_needed, 16 << 20), (vmem_cap * 3) // 4))

    kernel = functools.partial(_block_kernel, eps=eps, has_residual=has_residual)

    out, res_out = pl.pallas_call(
        kernel,
        out_shape=(jax.ShapeDtypeStruct((N, D), out_dtype),
                   jax.ShapeDtypeStruct((N, D), res_dtype)),
        grid=(n_blocks, n_k),
        in_specs=in_specs,
        out_specs=(row_spec, row_spec),
        scratch_shapes=[pltpu.VMEM((tm, D), jnp.float32),   # fc2 accumulator
                        pltpu.VMEM((tm, D), jnp.bfloat16)], # stashed h2 (MXU LHS)
        compiler_params=pltpu.CompilerParams(
            dimension_semantics=("parallel", "arbitrary"),
            vmem_limit_bytes=vmem_limit),
    )(*call_args)

    return out.reshape(B, S, D), res_out.reshape(B, S, D)


def reference_forward(hidden_states, residual, params, eps=1e-5):
    res1 = hidden_states + (residual if residual is not None else 0.0)
    h = _layernorm(res1, params["g1"], params["b1"], eps)
    res2 = h + res1
    h2 = _layernorm(res2, params["g2"], params["b2"], eps)
    z = _gelu_exact(h2 @ params["w1"] + params["bb1"])
    out = z @ params["w2"] + params["bb2"]
    return out, res2


if __name__ == "__main__":
    B, S, D = 2, 256, 128       # batch, seq, d_model (lane-dense: D is a multiple of 128)
    H = 4 * D                   # mlp hidden (multiple of 256 -> MXU-native fc1-out / fc2-K)

    key = jax.random.PRNGKey(0)
    k_w1, k_w2, k_x, k_r = jax.random.split(key, 4)

    # Deterministic parameter init (LayerNorm: ones/zeros as in nn.LayerNorm defaults).
    params = dict(
        g1=jnp.ones((1, D), jnp.float32),  b1=jnp.zeros((1, D), jnp.float32),
        g2=jnp.ones((1, D), jnp.float32),  b2=jnp.zeros((1, D), jnp.float32),
        w1=(jax.random.normal(k_w1, (D, H), jnp.float32) * 0.02),
        bb1=jnp.zeros((1, H), jnp.float32),
        w2=(jax.random.normal(k_w2, (H, D), jnp.float32) * 0.02),
        bb2=jnp.zeros((1, D), jnp.float32),
    )

    # Pre-cast MXU weights to bf16 once, outside the per-call path.
    kernel_params = dict(params)
    kernel_params["w1"] = params["w1"].astype(jnp.bfloat16)
    kernel_params["w2"] = params["w2"].astype(jnp.bfloat16)

    hidden_states = jax.random.normal(k_x, (B, S, D), jnp.float32)
    residual = jax.random.normal(k_r, (B, S, D), jnp.float32)

    # With-residual path.
    out, new_res = block_forward(hidden_states, residual, kernel_params)
    out, new_res = jax.block_until_ready((out, new_res))
    ref_out, ref_res = reference_forward(hidden_states, residual, params)
    # MLP output uses bf16 matmul inputs (f32 accumulate) -> looser tolerance there;
    # residual stream is pure f32 -> tight tolerance.
    assert jnp.allclose(out, ref_out, rtol=5e-2, atol=1e-2), "output mismatch"
    assert jnp.allclose(new_res, ref_res, rtol=1e-5, atol=1e-5), "residual mismatch"

    # residual=None path (dedicated kernel variant, no zero-stream DMA).
    out2, new_res2 = block_forward(hidden_states, None, kernel_params)
    out2, new_res2 = jax.block_until_ready((out2, new_res2))
    ref_out2, ref_res2 = reference_forward(hidden_states, None, params)
    assert jnp.allclose(out2, ref_out2, rtol=5e-2, atol=1e-2), "output mismatch (no residual)"
    assert jnp.allclose(new_res2, ref_res2, rtol=1e-5, atol=1e-5), "residual mismatch (no residual)"

    print("KERNEL_OK")
</pallas_src>

<mosaic_0001>
module attributes {stable_mosaic.version = 11 : i64} {
  func.func @_block_kernel(%arg0: i32, %arg1: i32, %arg2: memref<256x128xf32, #tpu.memory_space<vmem>>, %arg3: memref<256x128xf32, #tpu.memory_space<vmem>>, %arg4: memref<1x128xf32, #tpu.memory_space<vmem>>, %arg5: memref<1x128xf32, #tpu.memory_space<vmem>>, %arg6: memref<1x128xf32, #tpu.memory_space<vmem>>, %arg7: memref<1x128xf32, #tpu.memory_space<vmem>>, %arg8: memref<128x512xbf16, #tpu.memory_space<vmem>>, %arg9: memref<1x512xf32, #tpu.memory_space<vmem>>, %arg10: memref<512x128xbf16, #tpu.memory_space<vmem>>, %arg11: memref<1x128xf32, #tpu.memory_space<vmem>>, %arg12: memref<256x128xf32, #tpu.memory_space<vmem>>, %arg13: memref<256x128xf32, #tpu.memory_space<vmem>>, %arg14: memref<256x128xf32, #tpu.memory_space<vmem>>, %arg15: memref<256x128xbf16, #tpu.memory_space<vmem>>) attributes {dimension_semantics = [#tpu.dimension_semantics<parallel>, #tpu.dimension_semantics<arbitrary>], iteration_bounds = array<i64: 2, 1>, scalar_prefetch = 0 : i64, scratch_operands = 2 : i64, tpu.core_type = #tpu.core_type<tc>, window_params = [{transform_indices = @transform_0, window_bounds = array<i64: 256, 128>}, {transform_indices = @transform_1, window_bounds = array<i64: 256, 128>}, {pipeline_mode = #tpu.pipeline_mode<synchronous>, transform_indices = @transform_2, window_bounds = array<i64: 1, 128>}, {pipeline_mode = #tpu.pipeline_mode<synchronous>, transform_indices = @transform_3, window_bounds = array<i64: 1, 128>}, {pipeline_mode = #tpu.pipeline_mode<synchronous>, transform_indices = @transform_4, window_bounds = array<i64: 1, 128>}, {pipeline_mode = #tpu.pipeline_mode<synchronous>, transform_indices = @transform_5, window_bounds = array<i64: 1, 128>}, {transform_indices = @transform_6, window_bounds = array<i64: 128, 512>}, {transform_indices = @transform_7, window_bounds = array<i64: 1, 512>}, {transform_indices = @transform_8, window_bounds = array<i64: 512, 128>}, {pipeline_mode = #tpu.pipeline_mode<synchronous>, transform_indices = @transform_9, window_bounds = array<i64: 1, 128>}, {transform_indices = @transform_10, window_bounds = array<i64: 256, 128>}, {transform_indices = @transform_11, window_bounds = array<i64: 256, 128>}]} {
    %c0_i32 = arith.constant 0 : i32
    %0 = arith.cmpi eq, %arg1, %c0_i32 : i32
    %1 = arith.extui %0 : i1 to i32
    %c0_i32_0 = arith.constant 0 : i32
    %2 = arith.cmpi ne, %1, %c0_i32_0 : i32
    scf.if %2 {
      %c0_18 = arith.constant 0 : index
      %c0_19 = arith.constant 0 : index
      %26 = vector.load %arg2[%c0_18, %c0_19] : memref<256x128xf32, #tpu.memory_space<vmem>>, vector<256x128xf32>
      %c0_20 = arith.constant 0 : index
      %c0_21 = arith.constant 0 : index
      %27 = vector.load %arg3[%c0_20, %c0_21] : memref<256x128xf32, #tpu.memory_space<vmem>>, vector<256x128xf32>
      %28 = arith.addf %26, %27 : vector<256x128xf32>
      %c0_22 = arith.constant 0 : index
      %c0_23 = arith.constant 0 : index
      %29 = vector.load %arg4[%c0_22, %c0_23] : memref<1x128xf32, #tpu.memory_space<vmem>>, vector<1x128xf32>
      %c0_24 = arith.constant 0 : index
      %c0_25 = arith.constant 0 : index
      %30 = vector.load %arg5[%c0_24, %c0_25] : memref<1x128xf32, #tpu.memory_space<vmem>>, vector<1x128xf32>
      %cst_26 = arith.constant dense<0.000000e+00> : vector<256xf32>
      %31 = vector.multi_reduction <add>, %28, %cst_26 [1] : vector<256x128xf32> to vector<256xf32>
      %32 = vector.shape_cast %31 : vector<256xf32> to vector<256x1xf32>
      %cst_27 = arith.constant 1.280000e+02 : f32
      %33 = vector.broadcast %cst_27 : f32 to vector<256x1xf32>
      %34 = arith.divf %32, %33 : vector<256x1xf32>
      %35 = vector.broadcast %34 : vector<256x1xf32> to vector<256x128xf32>
      %36 = arith.subf %28, %35 : vector<256x128xf32>
      %37 = arith.mulf %36, %36 : vector<256x128xf32>
      %cst_28 = arith.constant dense<0.000000e+00> : vector<256xf32>
      %38 = vector.multi_reduction <add>, %37, %cst_28 [1] : vector<256x128xf32> to vector<256xf32>
      %39 = vector.shape_cast %38 : vector<256xf32> to vector<256x1xf32>
      %cst_29 = arith.constant 1.280000e+02 : f32
      %40 = vector.broadcast %cst_29 : f32 to vector<256x1xf32>
      %41 = arith.divf %39, %40 : vector<256x1xf32>
      %42 = vector.broadcast %34 : vector<256x1xf32> to vector<256x128xf32>
      %43 = arith.subf %28, %42 : vector<256x128xf32>
      %cst_30 = arith.constant 9.99999974E-6 : f32
      %44 = vector.broadcast %cst_30 : f32 to vector<256x1xf32>
      %45 = arith.addf %41, %44 : vector<256x1xf32>
      %46 = math.rsqrt %45 : vector<256x1xf32>
      %47 = vector.broadcast %46 : vector<256x1xf32> to vector<256x128xf32>
      %48 = arith.mulf %43, %47 : vector<256x128xf32>
      %49 = vector.broadcast %29 : vector<1x128xf32> to vector<256x128xf32>
      %50 = arith.mulf %48, %49 : vector<256x128xf32>
      %51 = vector.broadcast %30 : vector<1x128xf32> to vector<256x128xf32>
      %52 = arith.addf %50, %51 : vector<256x128xf32>
      %53 = arith.addf %52, %28 : vector<256x128xf32>
      %c0_31 = arith.constant 0 : index
      %c0_32 = arith.constant 0 : index
      %54 = vector.load %arg6[%c0_31, %c0_32] : memref<1x128xf32, #tpu.memory_space<vmem>>, vector<1x128xf32>
      %c0_33 = arith.constant 0 : index
      %c0_34 = arith.constant 0 : index
      %55 = vector.load %arg7[%c0_33, %c0_34] : memref<1x128xf32, #tpu.memory_space<vmem>>, vector<1x128xf32>
      %cst_35 = arith.constant dense<0.000000e+00> : vector<256xf32>
      %56 = vector.multi_reduction <add>, %53, %cst_35 [1] : vector<256x128xf32> to vector<256xf32>
      %57 = vector.shape_cast %56 : vector<256xf32> to vector<256x1xf32>
      %cst_36 = arith.constant 1.280000e+02 : f32
      %58 = vector.broadcast %cst_36 : f32 to vector<256x1xf32>
      %59 = arith.divf %57, %58 : vector<256x1xf32>
      %60 = vector.broadcast %59 : vector<256x1xf32> to vector<256x128xf32>
      %61 = arith.subf %53, %60 : vector<256x128xf32>
      %62 = arith.mulf %61, %61 : vector<256x128xf32>
      %cst_37 = arith.constant dense<0.000000e+00> : vector<256xf32>
      %63 = vector.multi_reduction <add>, %62, %cst_37 [1] : vector<256x128xf32> to vector<256xf32>
      %64 = vector.shape_cast %63 : vector<256xf32> to vector<256x1xf32>
      %cst_38 = arith.constant 1.280000e+02 : f32
      %65 = vector.broadcast %cst_38 : f32 to vector<256x1xf32>
      %66 = arith.divf %64, %65 : vector<256x1xf32>
      %67 = vector.broadcast %59 : vector<256x1xf32> to vector<256x128xf32>
      %68 = arith.subf %53, %67 : vector<256x128xf32>
      %cst_39 = arith.constant 9.99999974E-6 : f32
      %69 = vector.broadcast %cst_39 : f32 to vector<256x1xf32>
      %70 = arith.addf %66, %69 : vector<256x1xf32>
      %71 = math.rsqrt %70 : vector<256x1xf32>
      %72 = vector.broadcast %71 : vector<256x1xf32> to vector<256x128xf32>
      %73 = arith.mulf %68, %72 : vector<256x128xf32>
      %74 = vector.broadcast %54 : vector<1x128xf32> to vector<256x128xf32>
      %75 = arith.mulf %73, %74 : vector<256x128xf32>
      %76 = vector.broadcast %55 : vector<1x128xf32> to vector<256x128xf32>
      %77 = arith.addf %75, %76 : vector<256x128xf32>
      %c0_40 = arith.constant 0 : index
      %c0_41 = arith.constant 0 : index
      %78 = vector.load %arg13[%c0_40, %c0_41] : memref<256x128xf32, #tpu.memory_space<vmem>>, vector<256x128xf32>
      tpu.vector_store %arg13[%c0_40, %c0_41], %53 {strides = array<i32>} : memref<256x128xf32, #tpu.memory_space<vmem>>, vector<256x128xf32>,
      %79 = arith.truncf %77 : vector<256x128xf32> to vector<256x128xbf16>
      %c0_42 = arith.constant 0 : index
      %c0_43 = arith.constant 0 : index
      %80 = vector.load %arg15[%c0_42, %c0_43] : memref<256x128xbf16, #tpu.memory_space<vmem>>, vector<256x128xbf16>
      tpu.vector_store %arg15[%c0_42, %c0_43], %79 {strides = array<i32>} : memref<256x128xbf16, #tpu.memory_space<vmem>>, vector<256x128xbf16>,
      %cst_44 = arith.constant 0.000000e+00 : f32
      %81 = vector.broadcast %cst_44 : f32 to vector<256x128xf32>
      %c0_45 = arith.constant 0 : index
      %c0_46 = arith.constant 0 : index
      %82 = vector.load %arg14[%c0_45, %c0_46] : memref<256x128xf32, #tpu.memory_space<vmem>>, vector<256x128xf32>
      tpu.vector_store %arg14[%c0_45, %c0_46], %81 {strides = array<i32>} : memref<256x128xf32, #tpu.memory_space<vmem>>, vector<256x128xf32>,
    } else {
    }
    %c0 = arith.constant 0 : index
    %c0_1 = arith.constant 0 : index
    %3 = vector.load %arg15[%c0, %c0_1] : memref<256x128xbf16, #tpu.memory_space<vmem>>, vector<256x128xbf16>
    %c0_2 = arith.constant 0 : index
    %c0_3 = arith.constant 0 : index
    %4 = vector.load %arg8[%c0_2, %c0_3] : memref<128x512xbf16, #tpu.memory_space<vmem>>, vector<128x512xbf16>
    %cst = arith.constant dense<0.000000e+00> : vector<256x512xf32>
    %5 = tpu.matmul %3, %4, %cst {dimension_numbers = #tpu.dot_dimension_numbers<[1], [0], [0], [1], [0, 0, 1, 1], [], []>} : vector<256x128xbf16>, vector<128x512xbf16>, vector<256x512xf32> -> vector<256x512xf32>
    %c0_4 = arith.constant 0 : index
    %c0_5 = arith.constant 0 : index
    %6 = vector.load %arg9[%c0_4, %c0_5] : memref<1x512xf32, #tpu.memory_space<vmem>>, vector<1x512xf32>
    %7 = vector.broadcast %6 : vector<1x512xf32> to vector<256x512xf32>
    %8 = arith.addf %5, %7 : vector<256x512xf32>
    %cst_6 = arith.constant 5.000000e-01 : f32
    %9 = vector.broadcast %cst_6 : f32 to vector<256x512xf32>
    %10 = arith.mulf %9, %8 : vector<256x512xf32>
    %cst_7 = arith.constant 0.707106769 : f32
    %11 = vector.broadcast %cst_7 : f32 to vector<256x512xf32>
    %12 = arith.mulf %8, %11 : vector<256x512xf32>
    %13 = math.erf %12 : vector<256x512xf32>
    %cst_8 = arith.constant 1.000000e+00 : f32
    %14 = vector.broadcast %cst_8 : f32 to vector<256x512xf32>
    %15 = arith.addf %14, %13 : vector<256x512xf32>
    %16 = arith.mulf %10, %15 : vector<256x512xf32>
    %c0_9 = arith.constant 0 : index
    %c0_10 = arith.constant 0 : index
    %17 = vector.load %arg14[%c0_9, %c0_10] : memref<256x128xf32, #tpu.memory_space<vmem>>, vector<256x128xf32>
    %18 = arith.truncf %16 : vector<256x512xf32> to vector<256x512xbf16>
    %c0_11 = arith.constant 0 : index
    %c0_12 = arith.constant 0 : index
    %19 = vector.load %arg10[%c0_11, %c0_12] : memref<512x128xbf16, #tpu.memory_space<vmem>>, vector<512x128xbf16>
    %cst_13 = arith.constant dense<0.000000e+00> : vector<256x128xf32>
    %20 = tpu.matmul %18, %19, %cst_13 {dimension_numbers = #tpu.dot_dimension_numbers<[1], [0], [0], [1], [0, 0, 1, 1], [], []>} : vector<256x512xbf16>, vector<512x128xbf16>, vector<256x128xf32> -> vector<256x128xf32>
    %21 = arith.addf %17, %20 : vector<256x128xf32>
    %c0_14 = arith.constant 0 : index
    %c0_15 = arith.constant 0 : index
    %22 = vector.load %arg14[%c0_14, %c0_15] : memref<256x128xf32, #tpu.memory_space<vmem>>, vector<256x128xf32>
    tpu.vector_store %arg14[%c0_14, %c0_15], %21 {strides = array<i32>} : memref<256x128xf32, #tpu.memory_space<vmem>>, vector<256x128xf32>,
    %c0_i32_16 = arith.constant 0 : i32
    %23 = arith.cmpi eq, %arg1, %c0_i32_16 : i32
    %24 = arith.extui %23 : i1 to i32
    %c0_i32_17 = arith.constant 0 : i32
    %25 = arith.cmpi ne, %24, %c0_i32_17 : i32
    scf.if %25 {
      %c0_18 = arith.constant 0 : index
      %c0_19 = arith.constant 0 : index
      %26 = vector.load %arg14[%c0_18, %c0_19] : memref<256x128xf32, #tpu.memory_space<vmem>>, vector<256x128xf32>
      %c0_20 = arith.constant 0 : index
      %c0_21 = arith.constant 0 : index
      %27 = vector.load %arg11[%c0_20, %c0_21] : memref<1x128xf32, #tpu.memory_space<vmem>>, vector<1x128xf32>
      %28 = vector.broadcast %27 : vector<1x128xf32> to vector<256x128xf32>
      %29 = arith.addf %26, %28 : vector<256x128xf32>
      %c0_22 = arith.constant 0 : index
      %c0_23 = arith.constant 0 : index
      %30 = vector.load %arg12[%c0_22, %c0_23] : memref<256x128xf32, #tpu.memory_space<vmem>>, vector<256x128xf32>
      tpu.vector_store %arg12[%c0_22, %c0_23], %29 {strides = array<i32>} : memref<256x128xf32, #tpu.memory_space<vmem>>, vector<256x128xf32>,
    } else {
    }
    return
  }
  func.func @transform_0(%arg0: i32, %arg1: i32) -> (i32, i32) {
    %c0_i32 = arith.constant 0 : i32
    %c0_i32_0 = arith.constant 0 : i32
    return %arg0, %c0_i32 : i32, i32
  }
  func.func @transform_1(%arg0: i32, %arg1: i32) -> (i32, i32) {
    %c0_i32 = arith.constant 0 : i32
    %c0_i32_0 = arith.constant 0 : i32
    return %arg0, %c0_i32 : i32, i32
  }
  func.func @transform_2(%arg0: i32, %arg1: i32) -> (i32, i32) {
    %c0_i32 = arith.constant 0 : i32
    %c0_i32_0 = arith.constant 0 : i32
    %c0_i32_1 = arith.constant 0 : i32
    return %c0_i32, %c0_i32_0 : i32, i32
  }
  func.func @transform_3(%arg0: i32, %arg1: i32) -> (i32, i32) {
    %c0_i32 = arith.constant 0 : i32
    %c0_i32_0 = arith.constant 0 : i32
    %c0_i32_1 = arith.constant 0 : i32
    return %c0_i32, %c0_i32_0 : i32, i32
  }
  func.func @transform_4(%arg0: i32, %arg1: i32) -> (i32, i32) {
    %c0_i32 = arith.constant 0 : i32
    %c0_i32_0 = arith.constant 0 : i32
    %c0_i32_1 = arith.constant 0 : i32
    return %c0_i32, %c0_i32_0 : i32, i32
  }
  func.func @transform_5(%arg0: i32, %arg1: i32) -> (i32, i32) {
    %c0_i32 = arith.constant 0 : i32
    %c0_i32_0 = arith.constant 0 : i32
    %c0_i32_1 = arith.constant 0 : i32
    return %c0_i32, %c0_i32_0 : i32, i32
  }
  func.func @transform_6(%arg0: i32, %arg1: i32) -> (i32, i32) {
    %c0_i32 = arith.constant 0 : i32
    %c0_i32_0 = arith.constant 0 : i32
    return %c0_i32, %arg1 : i32, i32
  }
  func.func @transform_7(%arg0: i32, %arg1: i32) -> (i32, i32) {
    %c0_i32 = arith.constant 0 : i32
    %c0_i32_0 = arith.constant 0 : i32
    return %c0_i32, %arg1 : i32, i32
  }
  func.func @transform_8(%arg0: i32, %arg1: i32) -> (i32, i32) {
    %c0_i32 = arith.constant 0 : i32
    %c0_i32_0 = arith.constant 0 : i32
    return %arg1, %c0_i32 : i32, i32
  }
  func.func @transform_9(%arg0: i32, %arg1: i32) -> (i32, i32) {
    %c0_i32 = arith.constant 0 : i32
    %c0_i32_0 = arith.constant 0 : i32
    %c0_i32_1 = arith.constant 0 : i32
    return %c0_i32, %c0_i32_0 : i32, i32
  }
  func.func @transform_10(%arg0: i32, %arg1: i32) -> (i32, i32) {
    %c0_i32 = arith.constant 0 : i32
    %c0_i32_0 = arith.constant 0 : i32
    return %arg0, %c0_i32 : i32, i32
  }
  func.func @transform_11(%arg0: i32, %arg1: i32) -> (i32, i32) {
    %c0_i32 = arith.constant 0 : i32
    %c0_i32_0 = arith.constant 0 : i32
    return %arg0, %c0_i32 : i32, i32
  }
}

</mosaic_0001>

<bundles_post_ra>
// kernel: tpu_custom_call.1
= control target key start
LH: loop header
LB: loop body
LE: loop exit
PB: predicated region body
PF: predicated region fallthrough
CT: control target
= control target key end

     0   :  { %s7449_s0 = inlined_call_operand.hbm [shape: f32[512,128], index: 0, kind: input, shape index: {}]   ;;  %s7450_s1 = inlined_call_operand.hbm [shape: f32[512,128], index: 1, kind: input, shape index: {}]   ;;  %s7451_s2 = inlined_call_operand.vmem [shape: f32[1,128], index: 2, kind: input, shape index: {}]   ;;  %s7452_s3 = inlined_call_operand.vmem [shape: f32[1,128], index: 3, kind: input, shape index: {}]   ;;  %s7453_s4 = inlined_call_operand.vmem [shape: f32[1,128], index: 4, kind: input, shape index: {}]   ;;  %s7454_s5 = inlined_call_operand.vmem [shape: f32[1,128], index: 5, kind: input, shape index: {}]   ;;  %s7455_s6 = inlined_call_operand.hbm [shape: bf16[128,512], index: 6, kind: input, shape index: {}]   ;;  %s7456_s7 = inlined_call_operand.vmem [shape: f32[1,512], index: 7, kind: input, shape index: {}]   ;;  %s7457_s8 = inlined_call_operand.hbm [shape: bf16[512,128], index: 8, kind: input, shape index: {}]   ;;  %s7458_s9 = inlined_call_operand.vmem [shape: f32[1,128], index: 9, kind: input, shape index: {}]   ;;  %s7459_s10 = inlined_call_operand.hbm [shape: f32[512,128], index: 10, kind: output, shape index: {0}]   ;;  %s7460_s11 = inlined_call_operand.hbm [shape: f32[512,128], index: 11, kind: output, shape index: {1}]  }
   0x1   :  { %7480 = sst [smem:[#allocation39_spill]] %s7449_s0 }
   0x2   :  { %7481 = sst [smem:[#allocation40_spill]] %s7455_s6 }
   0x3   :  { %7482 = sst [smem:[#allocation41_spill]] %s7457_s8 }
   0x4   :  { %7483 = sst [smem:[#allocation42_spill]] %s7459_s10 }
   0x5   :  { %7484 = sst [smem:[#allocation43_spill]] %s7460_s11 }
   0x6   :  { %17 = vsyncpa [#allocation5], 0 }
   0x7   :  { %19 = vsyncpa [#allocation5 + $0x1], 0 }
   0x8   :  { %20 = vsyncpa [#allocation8], 0 }
   0x9   :  { %22 = vsyncpa [#allocation8 + $0x1], 0 }
   0xa   :  { %23 = vsyncpa [#allocation11], 0 }
   0xb   :  { %24 = vsyncpa [#allocation6], 0 }
   0xc   :  { %26 = vsyncpa [#allocation6 + $0x1], 0 }
   0xd   :  { %27 = vsyncpa [#allocation14], 0 }
   0xe   :  { %29 = vsyncpa [#allocation14 + $0x1], 0  ;;  %s5144_s17 = smov 0   ;;  %s5146_s18 = smov 0  }
   0xf   :  { %s5148_s19 = smov 0   ;;  %s5150_s20 = smov 0  }
  0x10   :  { %s5152_s21 = smov 0   ;;  %s5154_s22 = smov 0  }
  0x11 LB: > { %7485 = sst [smem:[#allocation21_spill]] %s5047_s17  ;;  %s5175_s23 = sadd.s32 4294967295, %s5067_s22   ;;  %s5067_s22 = sphi %s5154_s22, %s35_s22   ;;  %s5063_s21 = sphi %s5152_s21, %s7564_s21   ;;  %s5059_s20 = sphi %s5150_s20, %s7563_s20   ;;  %s5055_s19 = sphi %s5148_s19, %s7562_s19   ;;  %s5051_s18 = sphi %s5146_s18, %s7561_s18   ;;  %s5047_s17 = sphi %s5144_s17, %s7560_s17  }
  0x12   : > { %7486 = sst [smem:[#allocation22_spill]] %s5059_s20  ;;  %s3935_s24 = sadd.s32 4294967294, %s5067_s22  }
  0x13   : > { %p67_p0 = scmp.ne.s32.totalorder %s5051_s18, %s5047_s17  ;;  %p7463_p1 = scmp.eq.s32.totalorder %s5175_s23, 0 }
  0x14   : > { %p306_p3 = scmp.eq.s32.totalorder %s3935_s24, 1  ;;  %p3936_p5 = scmp.ge.s32.totalorder %s5067_s22, 1 }
  0x15   : > { %p5184_p4 = por %p7463_p1, %p67_p0  ;;  %p339_p7 = scmp.lt.s32.totalorder %s5067_s22, 3 }
  0x16   : > { %p5189_p6 = por %p306_p3, %p67_p0  ;;  %s5069_s28 = smov [#allocation9]  }
  0x17   : > { %s7487_s25 = scalar_select %p5184_p4, 1, 0 }
  0x18   : > { %s7488_s26 = scalar_select %p5189_p6, 1, 0 }
  0x19   : > { %p5194_p8 = pnand %p3936_p5, %p339_p7  ;;  %s366_s29 = sshll.u32 %s5069_s28, 4  ;;  %s5198_s29 = int_to_ptr.vmem [resolvable:$true] %s366_s29 }
  0x1a   : > { %7489 = sst [smem:[#allocation23_spill]] %s7488_s26  ;;  %s5070_s12 = smov [#allocation10]  }
  0x1b   : > { %p4275_p9 = pneg %p5194_p8  ;;  %s390_s13 = sshll.u32 %s5070_s12, 4  ;;  %s5209_s13 = int_to_ptr.vmem [resolvable:$true] %s390_s13 }
  0x1c   : > { %s7492_s6 = sld [smem:[#allocation40_spill]] }
  0x1d   : > { %p5205_p11 = pnand %p4275_p9, %p7463_p1 }
  0x1f   : > { %p4827_p13 = pneg %p5205_p11 }
  0x22   : > { %s4825_s16 = scalar_lea.hbm %s7492_s6, 4096 }
  0x23   : > { %p4826_p12 = scmp.ne.s32.totalorder %s7492_s6, %s4825_s16  ;;  %p4832_p5 = scmp.lt.u32.totalorder %s4825_s16, %s7492_s6 }
  0x25   : > { %p4828_p0 = pnand %p4827_p13, %p4826_p12 }
  0x27   : > { %p4829_p3 = pneg %p4828_p0 }
  0x29   : > { %p4834_p7 = pnand %p4832_p5, %p4829_p3 }
  0x2b   : > { %4837 = shalt.err (!%p4834_p7)
}
  0x2c   : > { %s4838_s12 = scalar_lea.vmem %s5198_s29, 4096  ;;  %p4846_p2 = scmp.lt.s32.totalorder %s5198_s29, %s5198_s29 }
  0x2d   : > { %p4839_p9 = scmp.ne.s32.totalorder %s5198_s29, %s4838_s12  ;;  %p4847_p12 = scmp.lt.s32.totalorder %s4838_s12, %s4838_s12 }
  0x2f   : > { %p4841_p10 = pnand %p4839_p9, %p4827_p13  ;;  %p4848_p0 = por %p4847_p12, %p4846_p2 }
  0x31   : > { %p4842_p1 = pneg %p4841_p10 }
  0x33   : > { %p4849_p6 = pnand %p4848_p0, %p4842_p1 }
  0x35   : > { %4852 = shalt.err (!%p4849_p6)
}
  0x36   : > { %s5071_s17 = smov 256   ;;  %s5072_s26 = smov 16  }
  0x37   : > { %4278 = dma.hbm_to_vmem [thread:$0]  (!%p5205_p11), %s7492_s6, 4096, %s5198_s29, [#allocation8], %s5071_s17, %s5071_s17, %s5072_s26  }
  0x38   : > { %s7493_s8 = sld [smem:[#allocation41_spill]] }
  0x3e   : > { %s4853_s28 = scalar_lea.hbm %s7493_s8, 4096 }
  0x3f   : > { %p4854_p2 = scmp.ne.s32.totalorder %s7493_s8, %s4853_s28  ;;  %p4860_p10 = scmp.lt.u32.totalorder %s4853_s28, %s7493_s8 }
  0x41   : > { %p4856_p1 = pnand %p4854_p2, %p4827_p13 }
  0x43   : > { %p4857_p6 = pneg %p4856_p1 }
  0x45   : > { %p4862_p3 = pnand %p4860_p10, %p4857_p6 }
  0x47   : > { %4865 = shalt.err (!%p4862_p3)
}
  0x48   : > { %s4866_s29 = scalar_lea.vmem %s5209_s13, 4096  ;;  %p4874_p12 = scmp.lt.s32.totalorder %s5209_s13, %s5209_s13 }
  0x49   : > { %p4867_p5 = scmp.ne.s32.totalorder %s5209_s13, %s4866_s29  ;;  %p4875_p0 = scmp.lt.s32.totalorder %s4866_s29, %s4866_s29 }
  0x4b   : > { %p4869_p7 = pnand %p4867_p5, %p4827_p13  ;;  %p4876_p2 = por %p4875_p0, %p4874_p12 }
  0x4d   : > { %p4870_p9 = pneg %p4869_p7 }
  0x4f   : > { %p4877_p1 = pnand %p4876_p2, %p4870_p9 }
  0x51   : > { %4880 = shalt.err (!%p4877_p1)
}
  0x52   : > { %s5073_s10 = smov 64   ;;  %s5074_s11 = smov 4  }
  0x53   : > { %4281 = dma.hbm_to_vmem [thread:$0]  (!%p5205_p11), %s7493_s8, 4096, %s5209_s13, [#allocation11], %s5073_s10, %s5073_s10, %s5074_s11  }
  0x54   : > { %s47_s26 = sadd.s32 1, %s5063_s21  ;;  %s54_s14 = sadd.s32 1, %s5055_s19 }
  0x55   : > { %p49_p13 = scmp.ge.s32.totalorder %s47_s26, 2  ;;  %p61_p6 = scmp.ne.s32.totalorder %s5055_s19, %s5051_s18 }
  0x56   : > { %p62_p10 = scmp.eq.s32.totalorder %s5067_s22, 0  ;;  %p4298_p3 = scmp.lt.s32.totalorder %s5067_s22, 2 }
  0x57   : > { %s7566_s26 = smov (%p49_p13, %s47_s26), 0  ;;  %p7495_p7 = scmp.eq.s32.totalorder %s5175_s23, 1 }
  0x58   : > { %7494 = sst [smem:[#allocation24_spill]] %s7566_s26  ;;  %p63_p5 = por %p62_p10, %p61_p6 }
  0x59   : > { %p5273_p9 = por %p7495_p7, %p61_p6  ;;  %s51_s15 = ssub.s32 %s5063_s21, %s7566_s26 }
  0x5a   : > { %s407_s16 = sand.u32 1, %s5055_s19   ;;  %p52_p11 = scmp.eq.s32.totalorder %s51_s15, 0 }
  0x5b   : > { %s7496_s30 = scalar_select %p5273_p9, 1, 0 }
  0x5c   : > { %s5280_s13 = sshll.u32 %s407_s16, 8  ;;  %s7467_s24 = sshll.u32 %s5063_s21, 12 }
  0x5d   : > { %s5284_s28 = scalar_select %p52_p11, %s5055_s19, %s54_s14  }
  0x5e   : > { %s7498_s0 = sld [smem:[#allocation39_spill]]  ;;  %s411_s11 = scalar_lea.vmem [#allocation4], %s5280_s13 }
  0x5f   : > { %7497 = sst [smem:[#allocation25_spill]] %s5284_s28  ;;  %s418_s20 = sshll.u32 %s411_s11, 4  ;;  %s5300_s20 = int_to_ptr.vmem [resolvable:$true] %s418_s20 }
  0x60   : > { %p5296_p12 = pnand %p4298_p3, %p63_p5  ;;  %s5302_s14 = scalar_lea.sflag [#allocation5], %s407_s16 }
  0x62   : > { %p4883_p2 = pneg %p5296_p12 }
  0x64   : > { %s5291_s10 = scalar_lea.hbm %s7498_s0, %s7467_s24  ;;  %s4886_s11 = scalar_lea.hbm %s7498_s0, 8192 }
  0x65   : > { %s4881_s15 = scalar_lea.hbm %s5291_s10, 4096  ;;  %p4887_p6 = scmp.lt.u32.totalorder %s5291_s10, %s7498_s0 }
  0x66   : > { %p4882_p0 = scmp.ne.s32.totalorder %s5291_s10, %s4881_s15  ;;  %p4888_p10 = scmp.lt.u32.totalorder %s4886_s11, %s4881_s15 }
  0x67   : > { %p4890_p5 = scmp.lt.u32.totalorder %s4881_s15, %s5291_s10 }
  0x68   : > { %p4884_p1 = pnand %p4883_p2, %p4882_p0  ;;  %p4889_p3 = por %p4888_p10, %p4887_p6 }
  0x6a   : > { %p4885_p13 = pneg %p4884_p1  ;;  %p4891_p7 = por %p4890_p5, %p4889_p3 }
  0x6c   : > { %p4892_p11 = pnand %p4891_p7, %p4885_p13 }
  0x6e   : > { %4895 = shalt.err (!%p4892_p11)
}
  0x6f   : > { %s4896_s16 = scalar_lea.vmem %s5300_s20, 4096  ;;  %s5075_s12 = smov [#allocation4]  }
  0x70   : > { %p4897_p0 = scmp.ne.s32.totalorder %s5300_s20, %s4896_s16  ;;  %s4901_s29 = sshll.u32 %s5075_s12, 4  ;;  %s4902_s29 = int_to_ptr.vmem [resolvable:$false] %s4901_s29 }
  0x71   : > { %s4903_s6 = scalar_lea.vmem %s4902_s29, 8192  ;;  %p4904_p4 = scmp.lt.s32.totalorder %s5300_s20, %s4902_s29 }
  0x72   : > { %p4899_p1 = pnand %p4897_p0, %p4883_p2  ;;  %p4905_p6 = scmp.lt.s32.totalorder %s4903_s6, %s4896_s16 }
  0x74   : > { %p4900_p9 = pneg %p4899_p1  ;;  %p4906_p10 = por %p4905_p6, %p4904_p4 }
  0x76   : > { %p4907_p3 = pnand %p4906_p10, %p4900_p9 }
  0x78   : > { %4910 = shalt.err (!%p4907_p3)
}
  0x79   : > { %s5076_s24 = smov 128   ;;  %s5077_s15 = smov 8  }
  0x7a   : > { %4285 = dma.hbm_to_vmem [thread:$0]  (!%p5296_p12), %s5291_s10, 4096, %s5300_s20, %s5302_s14, %s5076_s24, %s5076_s24, %s5077_s15  }
  0x7b   : > { %s7500_s11 = sshll.u32 %s5063_s21, 12  ;;  %s432_s6 = scalar_lea.vmem [#allocation7], %s5280_s13 }
  0x7c   : > { %s5338_s29 = scalar_lea.hbm %s7450_s1, %s7500_s11  ;;  %s439_s0 = sshll.u32 %s432_s6, 4  ;;  %s5342_s0 = int_to_ptr.vmem [resolvable:$true] %s439_s0 }
  0x7d   : > { %s428_s8 = sand.u32 1, %s5067_s22   ;;  %s4911_s28 = scalar_lea.hbm %s5338_s29, 4096 }
  0x7e   : > { %s5344_s26 = scalar_lea.sflag [#allocation8], %s428_s8  ;;  %p4912_p4 = scmp.ne.s32.totalorder %s5338_s29, %s4911_s28 }
  0x7f   : > { %s4916_s14 = scalar_lea.hbm %s7450_s1, 8192  ;;  %p4917_p5 = scmp.lt.u32.totalorder %s5338_s29, %s7450_s1 }
  0x80   : > { %p4914_p9 = pnand %p4912_p4, %p4883_p2  ;;  %p4918_p7 = scmp.lt.u32.totalorder %s4916_s14, %s4911_s28 }
  0x81   : > { %p4920_p0 = scmp.lt.u32.totalorder %s4911_s28, %s5338_s29 }
  0x82   : > { %p4915_p13 = pneg %p4914_p9  ;;  %p4919_p11 = por %p4918_p7, %p4917_p5 }
  0x84   : > { %p4921_p1 = por %p4920_p0, %p4919_p11 }
  0x86   : > { %p4922_p6 = pnand %p4921_p1, %p4915_p13 }
  0x88   : > { %4925 = shalt.err (!%p4922_p6)
}
  0x89   : > { %s4926_s8 = scalar_lea.vmem %s5342_s0, 4096  ;;  %s5078_s13 = smov [#allocation7]  }
  0x8a   : > { %p4927_p10 = scmp.ne.s32.totalorder %s5342_s0, %s4926_s8  ;;  %s4931_s12 = sshll.u32 %s5078_s13, 4  ;;  %s4932_s12 = int_to_ptr.vmem [resolvable:$false] %s4931_s12 }
  0x8b   : > { %s4933_s6 = scalar_lea.vmem %s4932_s12, 8192  ;;  %p4934_p9 = scmp.lt.s32.totalorder %s5342_s0, %s4932_s12 }
  0x8c   : > { %p4929_p3 = pnand %p4927_p10, %p4883_p2  ;;  %p4935_p5 = scmp.lt.s32.totalorder %s4933_s6, %s4926_s8 }
  0x8e   : > { %p4930_p4 = pneg %p4929_p3  ;;  %p4936_p7 = por %p4935_p5, %p4934_p9 }
  0x90   : > { %p4937_p11 = pnand %p4936_p7, %p4930_p4 }
  0x92   : > { %4940 = shalt.err (!%p4937_p11)
}
  0x93   : > { %4288 = dma.hbm_to_vmem [thread:$0]  (!%p5296_p12), %s5338_s29, 4096, %s5342_s0, %s5344_s26, %s5076_s24, %s5076_s24, %s5077_s15  }
  0x94   : > { %451 = sbr.rel (%p5194_p8) target bundleno = 1494 (0x5d6), region = 60 }
  0x9b   : > { %s5376_s28 = sand.u32 1, %s5051_s18   ;;  %p7501_p2 = scmp.ne.s32.totalorder %s7487_s25, 0 }
  0x9c   : > { %s5379_s10 = sshll.u32 %s5376_s28, 8  ;;  %s454_s17 = scalar_lea.sflag [#allocation5], %s5376_s28 }
  0x9d   : > { %s5383_s20 = scalar_lea.vmem [#allocation4], %s5379_s10 }
  0x9e   : > { %5022 = dma.done.wait (%p7501_p2), %s454_s17, 4096  }
  0x9f   : > { %5024 = vsyncadd (%p7501_p2), %s454_s17, 4294963200  ;;  %s462_s0 = sand.u32 1, %s5175_s23   ;;  %s5391_s26 = scalar_lea.vmem [#allocation7], %s5379_s10 }
  0xa0   : > { %s463_s27 = scalar_lea.sflag [#allocation8], %s462_s0 }
  0xa1   : > { %5026 = dma.done.wait (%p7501_p2), %s463_s27, 4096  }
  0xa2   : > { %5028 = vsyncadd (%p7501_p2), %s463_s27, 4294963200  ;;  %p7502_p8 = scmp.eq.s32.totalorder %s5175_s23, 0 }
  0xa4   : > { %5030 = dma.done.wait (%p7502_p8), [#allocation8], 4096   ;;  %p7503_p12 = pmov %p7502_p8 }
  0xa5   : > { %p7504_p13 = pmov %p7502_p8 }
  0xa6   : > { %5032 = vsyncadd (%p7503_p12), [#allocation8], 4294963200 }
  0xa7   : > { %5034 = dma.done.wait (%p7504_p13), [#allocation11], 4096   ;;  %p7505_p0 = pmov %p7502_p8 }
  0xa8   : > { %v543_v0 = vld [vmem:[%s5383_s20] sm:$0xff]  ;;  %v544_v2 = vld [vmem:[%s5383_s20 + $0x8] sm:$0xff]  ;;  %v545_v5 = vld [vmem:[%s5383_s20 + $0x10] sm:$0xff]  ;;  %s5707_s29 = scalar_lea.vmem [#allocation13], %s5379_s10  ;;  %s7551_s23 = sld [smem:[#allocation43_spill]] }
  0xa9   : > { %5036 = vsyncadd (%p7505_p0), [#allocation11], 4294963200  ;;  %v575_v1 = vld [vmem:[%s5391_s26] sm:$0xff]  ;;  %v576_v4 = vld [vmem:[%s5391_s26 + $0x8] sm:$0xff]  ;;  %s3763_s24 = sshll.u32 %s5707_s29, 4  ;;  %s3734_s15 = scalar_lea.sflag [#allocation14], %s5376_s28  ;;  %s7324_s24 = int_to_ptr.vmem [resolvable:$true] %s3763_s24 }
  0xaa   : > { %v5408_v3 = vadd.f32 %v575_v1, %v543_v0  ;;  %v577_v6 = vld [vmem:[%s5391_s26 + $0x10] sm:$0xff]  ;;  %v546_v8 = vld [vmem:[%s5383_s20 + $0x18] sm:$0xff]  ;;  %v5418_v10 = vadd.f32 %v576_v4, %v544_v2  ;;  %v547_v12 = vld [vmem:[%s5383_s20 + $0x20] sm:$0xff]  ;;  %s4941_s14 = scalar_lea.vmem %s7324_s24, 4096  ;;  %p7552_p6 = scmp.ne.s32.totalorder %s7496_s30, 0 }
  0xab   : > { %v5413_v7 = vadd.f32 %v577_v6, %v545_v5  ;;  %v578_v9 = vld [vmem:[%s5391_s26 + $0x18] sm:$0xff]  ;;  %v579_v13 = vld [vmem:[%s5391_s26 + $0x20] sm:$0xff]  ;;  %v548_v14 = vld [vmem:[%s5383_s20 + $0x28] sm:$0xff]  ;;  %p4942_p1 = scmp.ne.s32.totalorder %s7324_s24, %s4941_s14  ;;  %s5080_s11 = smov [#allocation13]  }
  0xac   : > { %641 = vadd.xlane.f32.xlu0 %v5408_v3  ;;  %v5421_v11 = vadd.f32 %v578_v9, %v546_v8  ;;  %v580_v15 = vld [vmem:[%s5391_s26 + $0x28] sm:$0xff]  ;;  %v5428_v16 = vadd.f32 %v579_v13, %v547_v12  ;;  %v549_v18 = vld [vmem:[%s5383_s20 + $0x30] sm:$0xff]  ;;  %v550_v20 = vld [vmem:[%s5383_s20 + $0x38] sm:$0xff]  ;;  %s4945_s16 = sshll.u32 %s5080_s11, 4  ;;  %s4946_s16 = int_to_ptr.vmem [resolvable:$false] %s4945_s16 }
  0xad   : > { %645 = vadd.xlane.f32.xlu1 %v5413_v7  ;;  %v5431_v17 = vadd.f32 %v580_v15, %v548_v14  ;;  %v581_v19 = vld [vmem:[%s5391_s26 + $0x30] sm:$0xff]  ;;  %v582_v21 = vld [vmem:[%s5391_s26 + $0x38] sm:$0xff]  ;;  %v551_v24 = vld [vmem:[%s5383_s20 + $0x40] sm:$0xff]  ;;  %p4943_p10 = pnand %p4942_p1, %p7552_p6  ;;  %s4947_s8 = scalar_lea.vmem %s4946_s16, 8192 }
  0xae   : > { %v5438_v22 = vadd.f32 %v581_v19, %v549_v18  ;;  %v5441_v23 = vadd.f32 %v582_v21, %v550_v20  ;;  %v583_v25 = vld [vmem:[%s5391_s26 + $0x40] sm:$0xff]  ;;  %v552_v26 = vld [vmem:[%s5383_s20 + $0x48] sm:$0xff]  ;;  %v553_v28 = vld [vmem:[%s5383_s20 + $0x50] sm:$0xff]  ;;  %p4948_p4 = scmp.lt.s32.totalorder %s7324_s24, %s4946_s16  ;;  %p4949_p9 = scmp.lt.s32.totalorder %s4947_s8, %s4941_s14 }
  0xaf   : > { %v584_v27 = vld [vmem:[%s5391_s26 + $0x48] sm:$0xff]  ;;  %v585_v29 = vld [vmem:[%s5391_s26 + $0x50] sm:$0xff]  ;;  %v5450_v30 = vadd.f32 %v583_v25, %v551_v24  ;;  %v554_v31 = vld [vmem:[%s5383_s20 + $0x58] sm:$0xff]  ;;  %p4944_p3 = pneg %p4943_p10 }
  0xb0   : > { %643 = vadd.xlane.f32.xlu0 %v5418_v10  ;;  %v586_v32 = vld [vmem:[%s5391_s26 + $0x58] sm:$0xff]  ;;  %v5455_v33 = vadd.f32 %v584_v27, %v552_v26  ;;  %v555_v34 = vld [vmem:[%s5383_s20 + $0x60] sm:$0xff]  ;;  %v5460_v36 = vadd.f32 %v585_v29, %v553_v28  ;;  %v556_v37 = vld [vmem:[%s5383_s20 + $0x68] sm:$0xff]  ;;  %p4950_p5 = por %p4949_p9, %p4948_p4 }
  0xb1   : > { %647 = vadd.xlane.f32.xlu1 %v5421_v11  ;;  %v587_v35 = vld [vmem:[%s5391_s26 + $0x60] sm:$0xff]  ;;  %v588_v38 = vld [vmem:[%s5391_s26 + $0x68] sm:$0xff]  ;;  %v5465_v39 = vadd.f32 %v586_v32, %v554_v31  ;;  %v557_v40 = vld [vmem:[%s5383_s20 + $0x70] sm:$0xff] }
  0xb2   : > { %v589_v41 = vld [vmem:[%s5391_s26 + $0x70] sm:$0xff]  ;;  %v5470_v42 = vadd.f32 %v587_v35, %v555_v34  ;;  %v558_v43 = vld [vmem:[%s5383_s20 + $0x78] sm:$0xff]  ;;  %v5475_v45 = vadd.f32 %v588_v38, %v556_v37  ;;  %v559_v46 = vld [vmem:[%s5383_s20 + $0x80] sm:$0xff]  ;;  %p4951_p7 = pnand %p4950_p5, %p4944_p3 }
  0xb3   : > { %v590_v44 = vld [vmem:[%s5391_s26 + $0x78] sm:$0xff]  ;;  %v591_v47 = vld [vmem:[%s5391_s26 + $0x80] sm:$0xff]  ;;  %v5480_v48 = vadd.f32 %v589_v41, %v557_v40  ;;  %v560_v50 = vld [vmem:[%s5383_s20 + $0x88] sm:$0xff] }
  0xb4   : > { %649 = vadd.xlane.f32.xlu0 %v5428_v16  ;;  %v5483_v49 = vadd.f32 %v590_v44, %v558_v43  ;;  %v592_v51 = vld [vmem:[%s5391_s26 + $0x88] sm:$0xff]  ;;  %v561_v52 = vld [vmem:[%s5383_s20 + $0x90] sm:$0xff]  ;;  %v5490_v54 = vadd.f32 %v591_v47, %v559_v46  ;;  %v562_v55 = vld [vmem:[%s5383_s20 + $0x98] sm:$0xff] }
  0xb5   : > { %651 = vadd.xlane.f32.xlu1 %v5431_v17  ;;  %v593_v53 = vld [vmem:[%s5391_s26 + $0x90] sm:$0xff]  ;;  %v594_v56 = vld [vmem:[%s5391_s26 + $0x98] sm:$0xff]  ;;  %v5495_v57 = vadd.f32 %v592_v51, %v560_v50  ;;  %v563_v2 = vld [vmem:[%s5383_s20 + $0xa0] sm:$0xff] }
  0xb6   : > { %v5498_v58 = vadd.f32 %v593_v53, %v561_v52  ;;  %v5501_v59 = vadd.f32 %v594_v56, %v562_v55  ;;  %v595_v4 = vld [vmem:[%s5391_s26 + $0xa0] sm:$0xff]  ;;  %v564_v15 = vld [vmem:[%s5383_s20 + $0xa8] sm:$0xff]  ;;  %v565_v27 = vld [vmem:[%s5383_s20 + $0xb0] sm:$0xff] }
  0xb7   : > { %7506 = vst [vmem:[#allocation26_spill] sm:$0xff] %v5495_v57  ;;  %v5512_v9 = vadd.f32 %v595_v4, %v563_v2  ;;  %v596_v18 = vld [vmem:[%s5391_s26 + $0xa8] sm:$0xff]  ;;  %v597_v28 = vld [vmem:[%s5391_s26 + $0xb0] sm:$0xff]  ;;  %v566_v37 = vld [vmem:[%s5383_s20 + $0xb8] sm:$0xff] }
  0xb8   : > { %653 = vadd.xlane.f32.xlu0 %v5438_v22  ;;  %7507 = vst [vmem:[#allocation27_spill] sm:$0xff] %v5498_v58  ;;  %7508 = vst [vmem:[#allocation28_spill] sm:$0xff] %v5501_v59  ;;  %v5527_v24 = vadd.f32 %v596_v18, %v564_v15  ;;  %v5535_v31 = vadd.f32 %v597_v28, %v565_v27  ;;  %v598_v38 = vld [vmem:[%s5391_s26 + $0xb8] sm:$0xff]  ;;  %v567_v47 = vld [vmem:[%s5383_s20 + $0xc0] sm:$0xff] }
  0xb9   : > { %655 = vadd.xlane.f32.xlu1 %v5441_v23  ;;  %7509 = vst [vmem:[#allocation29_spill] sm:$0xff] %v5512_v9  ;;  %v5545_v41 = vadd.f32 %v598_v38, %v566_v37  ;;  %v599_v50 = vld [vmem:[%s5391_s26 + $0xc0] sm:$0xff] }
  0xba   : > { %7510 = vst [vmem:[#allocation30_spill] sm:$0xff] %v5527_v24  ;;  %7511 = vst [vmem:[#allocation31_spill] sm:$0xff] %v5535_v31  ;;  %v5557_v53 = vadd.f32 %v599_v50, %v567_v47  ;;  %v571_v38 = vld [vmem:[%s5383_s20 + $0xe0] sm:$0xff] }
  0xbb   : > { %7512 = vst [vmem:[#allocation32_spill] sm:$0xff] %v5545_v41 }
  0xbc   : > { %657 = vadd.xlane.f32.xlu0 %v5450_v30 }
  0xbd   : > { %659 = vadd.xlane.f32.xlu1 %v5455_v33 }
  0xc0   : > { %661 = vadd.xlane.f32.xlu0 %v5460_v36 }
  0xc1   : > { %663 = vadd.xlane.f32.xlu1 %v5465_v39 }
  0xc4   : > { %665 = vadd.xlane.f32.xlu0 %v5470_v42 }
  0xc5   : > { %667 = vadd.xlane.f32.xlu1 %v5475_v45 }
  0xc8   : > { %669 = vadd.xlane.f32.xlu0 %v5480_v48 }
  0xc9   : > { %671 = vadd.xlane.f32.xlu1 %v5483_v49 }
  0xcc   : > { %673 = vadd.xlane.f32.xlu0 %v5490_v54 }
  0xcd   : > { %675 = vadd.xlane.f32.xlu1 %v5495_v57 }
  0xd0   : > { %677 = vadd.xlane.f32.xlu0 %v5498_v58 }
  0xd1   : > { %679 = vadd.xlane.f32.xlu1 %v5501_v59 }
 0x139   : > { %v642_v60 = vpop.xlane.xlu0 %641 }
 0x13a   : > { %v706_v61 = vmul.f32 0.0078125, %v642_v60  ;;  %v646_v62 = vpop.xlane.xlu1 %645  ;;  %v568_v60 = vld [vmem:[%s5383_s20 + $0xc8] sm:$0xff] }
 0x13b   : > { %v708_v0 = vmul.f32 0.0078125, %v646_v62 }
 0x13c   : > { %v5506_v63 = vsub.f32 %v5408_v3, %v706_v61  ;;  %v600_v61 = vld [vmem:[%s5391_s26 + $0xc8] sm:$0xff] }
 0x13d   : > { %v644_v1 = vpop.xlane.xlu0 %643  ;;  %v5518_v14 = vsub.f32 %v5413_v7, %v708_v0  ;;  %v5565_v0 = vadd.f32 %v600_v61, %v568_v60 }
 0x13e   : > { %v707_v5 = vmul.f32 0.0078125, %v644_v1  ;;  %v770_v6 = vmul.f32 %v5506_v63, %v5506_v63  ;;  %v648_v8 = vpop.xlane.xlu1 %647 }
 0x13f   : > { %v709_v13 = vmul.f32 0.0078125, %v648_v8  ;;  %v772_v21 = vmul.f32 %v5518_v14, %v5518_v14 }
 0x140   : > { %802 = vadd.xlane.f32.xlu0 %v770_v6  ;;  %v5515_v12 = vsub.f32 %v5418_v10, %v707_v5  ;;  %v569_v5 = vld [vmem:[%s5383_s20 + $0xd0] sm:$0xff] }
 0x141   : > { %v650_v19 = vpop.xlane.xlu0 %649  ;;  %v5530_v26 = vsub.f32 %v5421_v11, %v709_v13  ;;  %v601_v6 = vld [vmem:[%s5391_s26 + $0xd0] sm:$0xff] }
 0x142   : > { %v771_v20 = vmul.f32 %v5515_v12, %v5515_v12  ;;  %v710_v25 = vmul.f32 0.0078125, %v650_v19  ;;  %v652_v29 = vpop.xlane.xlu1 %651  ;;  %v5577_v18 = vadd.f32 %v601_v6, %v569_v5  ;;  %v573_v5 = vld [vmem:[%s5383_s20 + $0xf0] sm:$0xff] }
 0x143   : > { %v773_v32 = vmul.f32 %v5530_v26, %v5530_v26  ;;  %v711_v34 = vmul.f32 0.0078125, %v652_v29  ;;  %v605_v6 = vld [vmem:[%s5391_s26 + $0xf0] sm:$0xff] }
 0x144   : > { %681 = vadd.xlane.f32.xlu0 %v5512_v9  ;;  %804 = vadd.xlane.f32.xlu1 %v771_v20  ;;  %v5540_v35 = vsub.f32 %v5428_v16, %v710_v25  ;;  %v602_v25 = vld [vmem:[%s5391_s26 + $0xd8] sm:$0xff] }
 0x145   : > { %v654_v40 = vpop.xlane.xlu0 %653  ;;  %v5550_v46 = vsub.f32 %v5431_v17, %v711_v34 }
 0x146   : > { %v774_v43 = vmul.f32 %v5540_v35, %v5540_v35  ;;  %v712_v44 = vmul.f32 0.0078125, %v654_v40  ;;  %v656_v51 = vpop.xlane.xlu1 %655  ;;  %v603_v40 = vld [vmem:[%s5391_s26 + $0xe0] sm:$0xff] }
 0x147   : > { %v775_v52 = vmul.f32 %v5550_v46, %v5550_v46  ;;  %v713_v55 = vmul.f32 0.0078125, %v656_v51  ;;  %v5597_v47 = vadd.f32 %v603_v40, %v571_v38 }
 0x148   : > { %806 = vadd.xlane.f32.xlu0 %v772_v21  ;;  %683 = vadd.xlane.f32.xlu1 %v5527_v24  ;;  %v5560_v56 = vsub.f32 %v5438_v22, %v712_v44  ;;  %v570_v21 = vld [vmem:[%s5383_s20 + $0xd8] sm:$0xff] }
 0x149   : > { %v658_v62 = vpop.xlane.xlu0 %657  ;;  %v5570_v4 = vsub.f32 %v5441_v23, %v713_v55  ;;  %v5585_v29 = vadd.f32 %v602_v25, %v570_v21  ;;  %v604_v55 = vld [vmem:[%s5391_s26 + $0xe8] sm:$0xff]  ;;  %v5617_v21 = vadd.f32 %v605_v6, %v573_v5 }
 0x14a   : > { %v776_v1 = vmul.f32 %v5560_v56, %v5560_v56  ;;  %v714_v2 = vmul.f32 0.0078125, %v658_v62  ;;  %v660_v8 = vpop.xlane.xlu1 %659 }
 0x14b   : > { %v777_v15 = vmul.f32 %v5570_v4, %v5570_v4  ;;  %v715_v19 = vmul.f32 0.0078125, %v660_v8 }
 0x14c   : > { %685 = vadd.xlane.f32.xlu0 %v5535_v31  ;;  %808 = vadd.xlane.f32.xlu1 %v773_v32  ;;  %v5580_v20 = vsub.f32 %v5450_v30, %v714_v2 }
 0x14d   : > { %v662_v13 = vpop.xlane.xlu0 %661  ;;  %v5590_v37 = vsub.f32 %v5455_v33, %v715_v19 }
 0x14e   : > { %v664_v27 = vpop.xlane.xlu1 %663  ;;  %v778_v32 = vmul.f32 %v5580_v20, %v5580_v20  ;;  %v716_v34 = vmul.f32 0.0078125, %v662_v13 }
 0x14f   : > { %v779_v44 = vmul.f32 %v5590_v37, %v5590_v37  ;;  %v717_v50 = vmul.f32 0.0078125, %v664_v27 }
 0x150   : > { %687 = vadd.xlane.f32.xlu1 %v5545_v41  ;;  %810 = vadd.xlane.f32.xlu0 %v774_v43  ;;  %v5600_v51 = vsub.f32 %v5460_v36, %v716_v34 }
 0x151   : > { %v666_v28 = vpop.xlane.xlu0 %665  ;;  %v5610_v2 = vsub.f32 %v5465_v39, %v717_v50 }
 0x152   : > { %v668_v43 = vpop.xlane.xlu1 %667  ;;  %v780_v62 = vmul.f32 %v5600_v51, %v5600_v51 }
 0x153   : > { %v719_v13 = vmul.f32 0.0078125, %v668_v43  ;;  %v781_v19 = vmul.f32 %v5610_v2, %v5610_v2 }
 0x154   : > { %812 = vadd.xlane.f32.xlu1 %v775_v52  ;;  %689 = vadd.xlane.f32.xlu0 %v5557_v53  ;;  %v572_v52 = vld [vmem:[%s5383_s20 + $0xe8] sm:$0xff] }
 0x155   : > { %v670_v60 = vpop.xlane.xlu0 %669  ;;  %v5605_v61 = vadd.f32 %v604_v55, %v572_v52  ;;  %v5625_v38 = vsub.f32 %v5475_v45, %v719_v13 }
 0x156   : > { %v672_v8 = vpop.xlane.xlu1 %671  ;;  %v720_v25 = vmul.f32 0.0078125, %v670_v60 }
 0x157   : > { %v721_v34 = vmul.f32 0.0078125, %v672_v8  ;;  %v783_v60 = vmul.f32 %v5625_v38, %v5625_v38 }
 0x158   : > { %691 = vadd.xlane.f32.xlu1 %v5565_v0  ;;  %814 = vadd.xlane.f32.xlu0 %v776_v1  ;;  %v718_v1 = vmul.f32 0.0078125, %v666_v28  ;;  %v574_v28 = vld [vmem:[%s5383_s20 + $0xf8] sm:$0xff]  ;;  %v5633_v52 = vsub.f32 %v5480_v48, %v720_v25  ;;  %s7286_s20 = scalar_lea.vmem [#allocation12], %s5379_s10  ;;  %s7550_s10 = sld [smem:[#allocation22_spill]] }
 0x15a   : > { %v5620_v27 = vsub.f32 %v5470_v42, %v718_v1  ;;  %v676_v40 = vpop.xlane.xlu1 %675  ;;  %v784_v1 = vmul.f32 %v5633_v52, %v5633_v52 }
 0x15b   : > { %v723_v5 = vmul.f32 0.0078125, %v676_v40 }
 0x15c   : > { %816 = vadd.xlane.f32.xlu1 %v777_v15  ;;  %693 = vadd.xlane.f32.xlu0 %v5577_v18  ;;  %v674_v15 = vpop.xlane.xlu0 %673 }
 0x15d   : > { %v722_v50 = vmul.f32 0.0078125, %v674_v15 }
 0x15e   : > { %v680_v13 = vpop.xlane.xlu1 %679  ;;  %s4033_s0 = sshll.u32 %s7550_s10, 12 }
 0x15f   : > { %v5644_v8 = vsub.f32 %v5490_v54, %v722_v50  ;;  %v725_v25 = vmul.f32 0.0078125, %v680_v13  ;;  %s7321_s25 = scalar_lea.hbm %s7551_s23, %s4033_s0 }
 0x160   : > { %695 = vadd.xlane.f32.xlu1 %v5585_v29  ;;  %818 = vadd.xlane.f32.xlu0 %v778_v32  ;;  %v606_v32 = vld [vmem:[%s5391_s26 + $0xf8] sm:$0xff]  ;;  %v678_v55 = vpop.xlane.xlu0 %677 }
 0x161   : > { %v5628_v43 = vadd.f32 %v606_v32, %v574_v28  ;;  %v724_v6 = vmul.f32 0.0078125, %v678_v55  ;;  %v5651_v28 = vsub.f32 %v5495_v57, %v723_v5 }
 0x163   : > { %7513 = vst [vmem:[#allocation33_spill] sm:$0xff] %v5628_v43  ;;  %v5654_v32 = vsub.f32 %v5498_v58, %v724_v6 }
 0x164   : > { %820 = vadd.xlane.f32.xlu1 %v779_v44  ;;  %697 = vadd.xlane.f32.xlu0 %v5597_v47  ;;  %v782_v44 = vmul.f32 %v5620_v27, %v5620_v27 }
 0x165   : > { %v788_v40 = vmul.f32 %v5654_v32, %v5654_v32 }
 0x168   : > { %699 = vadd.xlane.f32.xlu1 %v5605_v61  ;;  %822 = vadd.xlane.f32.xlu0 %v780_v62  ;;  %v5638_v62 = vsub.f32 %v5483_v49, %v721_v34  ;;  %v787_v34 = vmul.f32 %v5651_v28, %v5651_v28 }
 0x16a   : > { %v785_v15 = vmul.f32 %v5638_v62, %v5638_v62 }
 0x16c   : > { %824 = vadd.xlane.f32.xlu1 %v781_v19  ;;  %701 = vadd.xlane.f32.xlu0 %v5617_v21  ;;  %v786_v19 = vmul.f32 %v5644_v8, %v5644_v8 }
 0x170   : > { %703 = vadd.xlane.f32.xlu1 %v5628_v43  ;;  %826 = vadd.xlane.f32.xlu0 %v782_v44  ;;  %v5661_v44 = vsub.f32 %v5501_v59, %v725_v25 }
 0x172   : > { %v789_v50 = vmul.f32 %v5661_v44, %v5661_v44 }
 0x174   : > { %828 = vadd.xlane.f32.xlu1 %v783_v60  ;;  %830 = vadd.xlane.f32.xlu0 %v784_v1 }
 0x178   : > { %832 = vadd.xlane.f32.xlu1 %v785_v15  ;;  %834 = vadd.xlane.f32.xlu0 %v786_v19 }
 0x17c   : > { %836 = vadd.xlane.f32.xlu1 %v787_v34  ;;  %838 = vadd.xlane.f32.xlu0 %v788_v40 }
 0x180   : > { %840 = vadd.xlane.f32.xlu1 %v789_v50 }
 0x1cd   : > { %v803_v55 = vpop.xlane.xlu0 %802 }
 0x1ce   : > { %v866_v60 = vmul.f32 0.0078125, %v803_v55 }
 0x1d0   : > { %v898_v1 = vadd.f32 1e-05, %v866_v60 }
 0x1d1   : > { %v805_v5 = vpop.xlane.xlu1 %804  ;;  %v682_v6 = vpop.xlane.xlu0 %681 }
 0x1d2   : > { %4441 = vrsqrt.f32 %v898_v1  ;;  %v867_v13 = vmul.f32 0.0078125, %v805_v5  ;;  %v726_v15 = vmul.f32 0.0078125, %v682_v6 }
 0x1d4   : > { %v899_v19 = vadd.f32 1e-05, %v867_v13  ;;  %v5666_v58 = vsub.f32 %v5512_v9, %v726_v15 }
 0x1d5   : > { %v684_v25 = vpop.xlane.xlu1 %683  ;;  %v807_v59 = vpop.xlane.xlu0 %806 }
 0x1d6   : > { %4443 = vrsqrt.f32 %v899_v19  ;;  %v727_v34 = vmul.f32 0.0078125, %v684_v25  ;;  %v868_v40 = vmul.f32 0.0078125, %v807_v59  ;;  %v790_v50 = vmul.f32 %v5666_v58, %v5666_v58  ;;  %v5681_v25 = vld [vmem:[%s7451_s2] ss:$0 sm:$0xff] }
 0x1d8   : > { %v900_v57 = vadd.f32 1e-05, %v868_v40  ;;  %842 = vadd.xlane.f32.xlu0 %v790_v50  ;;  %v5671_v55 = vsub.f32 %v5527_v24, %v727_v34 }
 0x1d9   : > { %v809_v60 = vpop.xlane.xlu1 %808  ;;  %v686_v1 = vpop.xlane.xlu0 %685 }
 0x1da   : > { %4445 = vrsqrt.f32 %v900_v57  ;;  %v869_v5 = vmul.f32 0.0078125, %v809_v60  ;;  %v728_v6 = vmul.f32 0.0078125, %v686_v1  ;;  %v791_v13 = vmul.f32 %v5671_v55, %v5671_v55 }
 0x1dc   : > { %v4442_v15 = vpop.eup %4441  ;;  %v901_v19 = vadd.f32 1e-05, %v869_v5  ;;  %844 = vadd.xlane.f32.xlu1 %v791_v13  ;;  %v5676_v59 = vsub.f32 %v5535_v31, %v728_v6  ;;  %v5689_v5 = vld [vmem:[%s7452_s3] ss:$0 sm:$0xff] }
 0x1dd   : > { %v688_v34 = vpop.xlane.xlu1 %687  ;;  %v811_v40 = vpop.xlane.xlu0 %810  ;;  %v962_v57 = vmul.f32 %v4442_v15, %v5506_v63 }
 0x1de   : > { %7514 = vst [vmem:[#allocation34_spill] sm:$0xff] %v5676_v59  ;;  %4447 = vrsqrt.f32 %v901_v19  ;;  %v729_v50 = vmul.f32 0.0078125, %v688_v34  ;;  %v870_v60 = vmul.f32 0.0078125, %v811_v40  ;;  %v792_v1 = vmul.f32 %v5676_v59, %v5676_v59 }
 0x1df   : > { %v1000_v6 = vmul.f32 %v5681_v25, %v962_v57 }
 0x1e0   : > { %v4444_v13 = vpop.eup %4443  ;;  %v902_v31 = vadd.f32 1e-05, %v870_v60  ;;  %846 = vadd.xlane.f32.xlu0 %v792_v1  ;;  %v5693_v24 = vsub.f32 %v5545_v41, %v729_v50 }
 0x1e1   : > { %v813_v63 = vpop.xlane.xlu1 %812  ;;  %v690_v15 = vpop.xlane.xlu0 %689  ;;  %v1038_v19 = vadd.f32 %v5689_v5, %v1000_v6  ;;  %v963_v34 = vmul.f32 %v4444_v13, %v5515_v12 }
 0x1e2   : > { %4449 = vrsqrt.f32 %v902_v31  ;;  %v871_v40 = vmul.f32 0.0078125, %v813_v63  ;;  %v730_v59 = vmul.f32 0.0078125, %v690_v15  ;;  %v793_v9 = vmul.f32 %v5693_v24, %v5693_v24 }
 0x1e3   : > { %v5700_v57 = vadd.f32 %v1038_v19, %v5408_v3  ;;  %v1001_v60 = vmul.f32 %v5681_v25, %v963_v34 }
 0x1e4   : > { %v4446_v50 = vpop.eup %4445  ;;  %v903_v1 = vadd.f32 1e-05, %v871_v40  ;;  %v5704_v41 = vsub.f32 %v5557_v53, %v730_v59  ;;  %848 = vadd.xlane.f32.xlu1 %v793_v9 }
 0x1e5   : > { %v692_v6 = vpop.xlane.xlu1 %691  ;;  %1532 = vst [vmem:[%s5707_s29] sm:$0xff] %v5700_v57  ;;  %1104 = vadd.xlane.f32.xlu0 %v5700_v57  ;;  %v815_v12 = vpop.xlane.xlu0 %814  ;;  %v1039_v3 = vadd.f32 %v5689_v5, %v1001_v60  ;;  %v964_v31 = vmul.f32 %v4446_v50, %v5518_v14 }
 0x1e6   : > { %4451 = vrsqrt.f32 %v903_v1  ;;  %v731_v13 = vmul.f32 0.0078125, %v692_v6  ;;  %v872_v63 = vmul.f32 0.0078125, %v815_v12  ;;  %v794_v9 = vmul.f32 %v5704_v41, %v5704_v41 }
 0x1e7   : > { %v5717_v59 = vadd.f32 %v1039_v3, %v5418_v10  ;;  %v1002_v15 = vmul.f32 %v5681_v25, %v964_v31 }
 0x1e8   : > { %v4448_v19 = vpop.eup %4447  ;;  %v5721_v34 = vsub.f32 %v5565_v0, %v731_v13  ;;  %v904_v40 = vadd.f32 1e-05, %v872_v63 }
 0x1e9   : > { %1533 = vst [vmem:[%s5707_s29 + $0x8] sm:$0xff] %v5717_v59  ;;  %1106 = vadd.xlane.f32.xlu1 %v5717_v59  ;;  %v817_v14 = vpop.xlane.xlu1 %816  ;;  %850 = vadd.xlane.f32.xlu0 %v794_v9  ;;  %v694_v60 = vpop.xlane.xlu0 %693  ;;  %v1040_v50 = vadd.f32 %v5689_v5, %v1002_v15  ;;  %v965_v10 = vmul.f32 %v4448_v19, %v5530_v26 }
 0x1ea   : > { %4453 = vrsqrt.f32 %v904_v40  ;;  %v873_v1 = vmul.f32 0.0078125, %v817_v14  ;;  %v732_v6 = vmul.f32 0.0078125, %v694_v60  ;;  %v795_v12 = vmul.f32 %v5721_v34, %v5721_v34 }
 0x1eb   : > { %v5731_v3 = vadd.f32 %v1040_v50, %v5413_v7  ;;  %v1003_v31 = vmul.f32 %v5681_v25, %v965_v10 }
 0x1ec   : > { %v4450_v13 = vpop.eup %4449  ;;  %v905_v63 = vadd.f32 1e-05, %v873_v1  ;;  %v5735_v9 = vsub.f32 %v5577_v18, %v732_v6 }
 0x1ed   : > { %852 = vadd.xlane.f32.xlu1 %v795_v12  ;;  %v696_v15 = vpop.xlane.xlu1 %695  ;;  %1534 = vst [vmem:[%s5707_s29 + $0x10] sm:$0xff] %v5731_v3  ;;  %1108 = vadd.xlane.f32.xlu0 %v5731_v3  ;;  %v819_v26 = vpop.xlane.xlu0 %818  ;;  %v1041_v19 = vadd.f32 %v5689_v5, %v1003_v31  ;;  %v966_v7 = vmul.f32 %v4450_v13, %v5540_v35 }
 0x1ee   : > { %4455 = vrsqrt.f32 %v905_v63  ;;  %v733_v40 = vmul.f32 0.0078125, %v696_v15  ;;  %v874_v14 = vmul.f32 0.0078125, %v819_v26  ;;  %v796_v60 = vmul.f32 %v5735_v9, %v5735_v9 }
 0x1ef   : > { %v5745_v50 = vadd.f32 %v1041_v19, %v5421_v11  ;;  %v1004_v10 = vmul.f32 %v5681_v25, %v966_v7 }
 0x1f0   : > { %v4452_v1 = vpop.eup %4451  ;;  %v5749_v6 = vsub.f32 %v5585_v29, %v733_v40  ;;  %v906_v12 = vadd.f32 1e-05, %v874_v14 }
 0x1f1   : > { %1535 = vst [vmem:[%s5707_s29 + $0x18] sm:$0xff] %v5745_v50  ;;  %1110 = vadd.xlane.f32.xlu1 %v5745_v50  ;;  %v821_v35 = vpop.xlane.xlu1 %820  ;;  %854 = vadd.xlane.f32.xlu0 %v796_v60  ;;  %v698_v31 = vpop.xlane.xlu0 %697  ;;  %v1042_v13 = vadd.f32 %v5689_v5, %v1004_v10  ;;  %v967_v11 = vmul.f32 %v4452_v1, %v5550_v46 }
 0x1f2   : > { %4457 = vrsqrt.f32 %v906_v12  ;;  %v875_v63 = vmul.f32 0.0078125, %v821_v35  ;;  %v734_v15 = vmul.f32 0.0078125, %v698_v31  ;;  %v797_v26 = vmul.f32 %v5749_v6, %v5749_v6 }
 0x1f3   : > { %v5759_v19 = vadd.f32 %v1042_v13, %v5428_v16  ;;  %v1005_v7 = vmul.f32 %v5681_v25, %v967_v11 }
 0x1f4   : > { %v4454_v40 = vpop.eup %4453  ;;  %v907_v14 = vadd.f32 1e-05, %v875_v63  ;;  %v5763_v60 = vsub.f32 %v5597_v47, %v734_v15 }
 0x1f5   : > { %856 = vadd.xlane.f32.xlu1 %v797_v26  ;;  %v700_v10 = vpop.xlane.xlu1 %699  ;;  %1536 = vst [vmem:[%s5707_s29 + $0x20] sm:$0xff] %v5759_v19  ;;  %1112 = vadd.xlane.f32.xlu0 %v5759_v19  ;;  %v823_v46 = vpop.xlane.xlu0 %822  ;;  %v1043_v1 = vadd.f32 %v5689_v5, %v1005_v7  ;;  %v968_v16 = vmul.f32 %v4454_v40, %v5560_v56 }
 0x1f6   : > { %4459 = vrsqrt.f32 %v907_v14  ;;  %v735_v12 = vmul.f32 0.0078125, %v700_v10  ;;  %v876_v35 = vmul.f32 0.0078125, %v823_v46  ;;  %v798_v31 = vmul.f32 %v5763_v60, %v5763_v60 }
 0x1f7   : > { %v5773_v13 = vadd.f32 %v1043_v1, %v5431_v17  ;;  %v1006_v11 = vmul.f32 %v5681_v25, %v968_v16 }
 0x1f8   : > { %v4456_v63 = vpop.eup %4455  ;;  %v5777_v15 = vsub.f32 %v5605_v61, %v735_v12  ;;  %v908_v26 = vadd.f32 1e-05, %v876_v35 }
 0x1f9   : > { %1537 = vst [vmem:[%s5707_s29 + $0x28] sm:$0xff] %v5773_v13  ;;  %1114 = vadd.xlane.f32.xlu1 %v5773_v13  ;;  %v825_v56 = vpop.xlane.xlu1 %824  ;;  %858 = vadd.xlane.f32.xlu0 %v798_v31  ;;  %v702_v7 = vpop.xlane.xlu0 %701  ;;  %v1044_v40 = vadd.f32 %v5689_v5, %v1006_v11  ;;  %v969_v17 = vmul.f32 %v4456_v63, %v5570_v4 }
 0x1fa   : > { %4461 = vrsqrt.f32 %v908_v26  ;;  %v877_v14 = vmul.f32 0.0078125, %v825_v56  ;;  %v736_v10 = vmul.f32 0.0078125, %v702_v7  ;;  %v799_v46 = vmul.f32 %v5777_v15, %v5777_v15 }
 0x1fb   : > { %v5787_v1 = vadd.f32 %v1044_v40, %v5438_v22  ;;  %v1007_v16 = vmul.f32 %v5681_v25, %v969_v17 }
 0x1fc   : > { %v4458_v12 = vpop.eup %4457  ;;  %v909_v35 = vadd.f32 1e-05, %v877_v14  ;;  %v5791_v31 = vsub.f32 %v5617_v21, %v736_v10 }
 0x1fd   : > { %860 = vadd.xlane.f32.xlu1 %v799_v46  ;;  %v704_v11 = vpop.xlane.xlu1 %703  ;;  %1538 = vst [vmem:[%s5707_s29 + $0x30] sm:$0xff] %v5787_v1  ;;  %1116 = vadd.xlane.f32.xlu0 %v5787_v1  ;;  %v827_v4 = vpop.xlane.xlu0 %826  ;;  %v1045_v63 = vadd.f32 %v5689_v5, %v1007_v16  ;;  %v970_v22 = vmul.f32 %v4458_v12, %v5580_v20 }
 0x1fe   : > { %4463 = vrsqrt.f32 %v909_v35  ;;  %v737_v26 = vmul.f32 0.0078125, %v704_v11  ;;  %v878_v56 = vmul.f32 0.0078125, %v827_v4  ;;  %v800_v7 = vmul.f32 %v5791_v31, %v5791_v31 }
 0x1ff   : > { %v5801_v40 = vadd.f32 %v1045_v63, %v5441_v23  ;;  %v1008_v17 = vmul.f32 %v5681_v25, %v970_v22 }
 0x200   : > { %v4460_v14 = vpop.eup %4459  ;;  %v5805_v10 = vsub.f32 %v5628_v43, %v737_v26  ;;  %v910_v46 = vadd.f32 1e-05, %v878_v56 }
 0x201   : > { %1539 = vst [vmem:[%s5707_s29 + $0x38] sm:$0xff] %v5801_v40  ;;  %1118 = vadd.xlane.f32.xlu1 %v5801_v40  ;;  %v829_v20 = vpop.xlane.xlu1 %828  ;;  %862 = vadd.xlane.f32.xlu0 %v800_v7  ;;  %v831_v16 = vpop.xlane.xlu0 %830  ;;  %v1046_v12 = vadd.f32 %v5689_v5, %v1008_v17  ;;  %v971_v23 = vmul.f32 %v4460_v14, %v5590_v37 }
 0x202   : > { %4465 = vrsqrt.f32 %v910_v46  ;;  %v879_v35 = vmul.f32 0.0078125, %v829_v20  ;;  %v880_v11 = vmul.f32 0.0078125, %v831_v16  ;;  %v801_v4 = vmul.f32 %v5805_v10, %v5805_v10 }
 0x203   : > { %v5815_v63 = vadd.f32 %v1046_v12, %v5450_v30  ;;  %v1009_v22 = vmul.f32 %v5681_v25, %v971_v23 }
 0x204   : > { %v4462_v26 = vpop.eup %4461  ;;  %v911_v56 = vadd.f32 1e-05, %v879_v35  ;;  %v912_v43 = vadd.f32 1e-05, %v880_v11 }
 0x205   : > { %864 = vadd.xlane.f32.xlu1 %v801_v4  ;;  %v833_v7 = vpop.xlane.xlu1 %832  ;;  %1540 = vst [vmem:[%s5707_s29 + $0x40] sm:$0xff] %v5815_v63  ;;  %1120 = vadd.xlane.f32.xlu0 %v5815_v63  ;;  %v835_v37 = vpop.xlane.xlu0 %834  ;;  %v1047_v17 = vadd.f32 %v5689_v5, %v1009_v22  ;;  %v972_v14 = vmul.f32 %v4462_v26, %v5600_v51 }
 0x206   : > { %4467 = vrsqrt.f32 %v911_v56  ;;  %v881_v30 = vmul.f32 0.0078125, %v833_v7  ;;  %v882_v46 = vmul.f32 0.0078125, %v835_v37 }
 0x207   : > { %4469 = vrsqrt.f32 %v912_v43  ;;  %v5824_v20 = vadd.f32 %v1047_v17, %v5455_v33  ;;  %v1010_v16 = vmul.f32 %v5681_v25, %v972_v14 }
 0x208   : > { %v4464_v12 = vpop.eup %4463  ;;  %v913_v23 = vadd.f32 1e-05, %v881_v30  ;;  %v914_v35 = vadd.f32 1e-05, %v882_v46 }
 0x209   : > { %1541 = vst [vmem:[%s5707_s29 + $0x48] sm:$0xff] %v5824_v20  ;;  %1122 = vadd.xlane.f32.xlu1 %v5824_v20  ;;  %v837_v11 = vpop.xlane.xlu1 %836  ;;  %v839_v4 = vpop.xlane.xlu0 %838  ;;  %v1048_v51 = vadd.f32 %v5689_v5, %v1010_v16  ;;  %v973_v22 = vmul.f32 %v4464_v12, %v5610_v2 }
 0x20a   : > { %4471 = vrsqrt.f32 %v913_v23  ;;  %v883_v43 = vmul.f32 0.0078125, %v837_v11  ;;  %v884_v33 = vmul.f32 0.0078125, %v839_v4 }
 0x20b   : > { %4473 = vrsqrt.f32 %v914_v35  ;;  %v5833_v26 = vadd.f32 %v1048_v51, %v5460_v36  ;;  %v1011_v56 = vmul.f32 %v5681_v25, %v973_v22 }
 0x20c   : > { %v4466_v7 = vpop.eup %4465  ;;  %v915_v37 = vadd.f32 1e-05, %v883_v43  ;;  %v916_v17 = vadd.f32 1e-05, %v884_v33 }
 0x20d   : > { %v841_v14 = vpop.xlane.xlu1 %840  ;;  %1542 = vst [vmem:[%s5707_s29 + $0x50] sm:$0xff] %v5833_v26  ;;  %1124 = vadd.xlane.f32.xlu0 %v5833_v26  ;;  %v1049_v2 = vadd.f32 %v5689_v5, %v1011_v56  ;;  %v974_v30 = vmul.f32 %v4466_v7, %v5620_v27 }
 0x20e   : > { %4475 = vrsqrt.f32 %v915_v37  ;;  %v885_v46 = vmul.f32 0.0078125, %v841_v14 }
 0x20f   : > { %4477 = vrsqrt.f32 %v916_v17  ;;  %v5842_v36 = vadd.f32 %v1049_v2, %v5465_v39  ;;  %v1012_v16 = vmul.f32 %v5681_v25, %v974_v30 }
 0x210   : > { %v4468_v12 = vpop.eup %4467  ;;  %v917_v23 = vadd.f32 1e-05, %v885_v46 }
 0x211   : > { %v4470_v35 = vpop.eup %4469  ;;  %1543 = vst [vmem:[%s5707_s29 + $0x58] sm:$0xff] %v5842_v36  ;;  %1126 = vadd.xlane.f32.xlu1 %v5842_v36  ;;  %v1050_v11 = vadd.f32 %v5689_v5, %v1012_v16  ;;  %v975_v27 = vmul.f32 %v4468_v12, %v5625_v38 }
 0x212   : > { %4479 = vrsqrt.f32 %v917_v23  ;;  %v976_v4 = vmul.f32 %v4470_v35, %v5633_v52 }
 0x213   : > { %v5852_v39 = vadd.f32 %v1050_v11, %v5470_v42  ;;  %v1013_v51 = vmul.f32 %v5681_v25, %v975_v27 }
 0x214   : > { %v4472_v22 = vpop.eup %4471  ;;  %v1014_v43 = vmul.f32 %v5681_v25, %v976_v4  ;;  %v7516_v4 = vld [vmem:[#allocation27_spill] sm:$0xff] }
 0x215   : > { %v4474_v33 = vpop.eup %4473  ;;  %1128 = vadd.xlane.f32.xlu0 %v5852_v39  ;;  %1544 = vst [vmem:[%s5707_s29 + $0x60] sm:$0xff] %v5852_v39  ;;  %v1051_v38 = vadd.f32 %v5689_v5, %v1013_v51  ;;  %v977_v56 = vmul.f32 %v4472_v22, %v5638_v62  ;;  %v7517_v22 = vld [vmem:[#allocation28_spill] sm:$0xff] }
 0x216   : > { %v1052_v52 = vadd.f32 %v5689_v5, %v1014_v43  ;;  %v978_v42 = vmul.f32 %v4474_v33, %v5644_v8  ;;  %v4361_v33 = vld [vmem:[#allocation9 + $0x4] ss:$16 sps:$4 sm:$0xff]  }
 0x217   : > { %v5864_v7 = vadd.f32 %v1051_v38, %v5475_v45  ;;  %v1015_v37 = vmul.f32 %v5681_v25, %v977_v56  ;;  %v4363_v38 = vld [vmem:[#allocation9 + $0xc] ss:$16 sps:$4 sm:$0xff]   ;;  %v4365_v56 = vld [vmem:[#allocation9] ss:$16 sps:$4 sm:$0xff]   ;;  %1858 = vmatprep.subr.bf16.mxu0 %v4361_v33 }
 0x218   : > { %v4476_v17 = vpop.eup %4475  ;;  %v5868_v14 = vadd.f32 %v1052_v52, %v5480_v48  ;;  %v1016_v2 = vmul.f32 %v5681_v25, %v978_v42  ;;  %v4366_v52 = vld [vmem:[#allocation9 + $0x8] ss:$16 sps:$4 sm:$0xff]   ;;  %v4367_v42 = vld [vmem:[#allocation9 + $0x24] ss:$16 sps:$4 sm:$0xff]   ;;  %2051 = vmatprep.subr.bf16.mxu1 %v4363_v38  ;;  %1859 = vmatpush1.bf16.msra.mxu0 %v4365_v56 }
 0x219   : > { %v4478_v30 = vpop.eup %4477  ;;  %1130 = vadd.xlane.f32.xlu1 %v5864_v7  ;;  %1545 = vst [vmem:[%s5707_s29 + $0x68] sm:$0xff] %v5864_v7  ;;  %v1053_v62 = vadd.f32 %v5689_v5, %v1015_v37  ;;  %v979_v45 = vmul.f32 %v4476_v17, %v5651_v28  ;;  %v4369_v37 = vld [vmem:[#allocation9 + $0x2c] ss:$16 sps:$4 sm:$0xff]   ;;  %2052 = vmatpush1.bf16.msra.mxu1 %v4366_v52 }
 0x21a   : > { %1132 = vadd.xlane.f32.xlu0 %v5868_v14  ;;  %1546 = vst [vmem:[%s5707_s29 + $0x70] sm:$0xff] %v5868_v14  ;;  %v1054_v48 = vadd.f32 %v5689_v5, %v1016_v2  ;;  %v980_v8 = vmul.f32 %v4478_v30, %v5654_v32  ;;  %1860 = vmatprep.subr.bf16.mxu0 %v4367_v42 }
 0x21b   : > { %v5882_v46 = vadd.f32 %v1053_v62, %v5483_v49  ;;  %v1017_v16 = vmul.f32 %v5681_v25, %v979_v45  ;;  %2053 = vmatprep.subr.bf16.mxu1 %v4369_v37 }
 0x21c   : > { %v4480_v12 = vpop.eup %4479  ;;  %v5886_v23 = vadd.f32 %v1054_v48, %v5490_v54  ;;  %v1018_v28 = vmul.f32 %v5681_v25, %v980_v8  ;;  %v7515_v54 = vld [vmem:[#allocation26_spill] sm:$0xff] }
 0x21d   : > { %1134 = vadd.xlane.f32.xlu1 %v5882_v46  ;;  %1547 = vst [vmem:[%s5707_s29 + $0x78] sm:$0xff] %v5882_v46  ;;  %v1055_v32 = vadd.f32 %v5689_v5, %v1017_v16  ;;  %v981_v49 = vmul.f32 %v4480_v12, %v5661_v44 }
 0x21e   : > { %1136 = vadd.xlane.f32.xlu0 %v5886_v23  ;;  %1548 = vst [vmem:[%s5707_s29 + $0x80] sm:$0xff] %v5886_v23  ;;  %v1056_v35 = vadd.f32 %v5689_v5, %v1018_v28 }
 0x21f   : > { %v5899_v11 = vadd.f32 %v1055_v32, %v7515_v54  ;;  %v1019_v27 = vmul.f32 %v5681_v25, %v981_v49 }
 0x220   : > { %v5903_v51 = vadd.f32 %v1056_v35, %v7516_v4 }
 0x221   : > { %1138 = vadd.xlane.f32.xlu1 %v5899_v11  ;;  %1549 = vst [vmem:[%s5707_s29 + $0x88] sm:$0xff] %v5899_v11  ;;  %v1057_v44 = vadd.f32 %v5689_v5, %v1019_v27 }
 0x222   : > { %1140 = vadd.xlane.f32.xlu0 %v5903_v51  ;;  %1550 = vst [vmem:[%s5707_s29 + $0x90] sm:$0xff] %v5903_v51 }
 0x223   : > { %v5913_v43 = vadd.f32 %v1057_v44, %v7517_v22 }
 0x225   : > { %1142 = vadd.xlane.f32.xlu1 %v5913_v43  ;;  %1551 = vst [vmem:[%s5707_s29 + $0x98] sm:$0xff] %v5913_v43 }
 0x265   : > { %v843_v17 = vpop.xlane.xlu0 %842 }
 0x266   : > { %v886_v2 = vmul.f32 0.0078125, %v843_v17 }
 0x268   : > { %v918_v30 = vadd.f32 1e-05, %v886_v2 }
 0x269   : > { %v845_v62 = vpop.xlane.xlu1 %844 }
 0x26a   : > { %4481 = vrsqrt.f32 %v918_v30  ;;  %v887_v45 = vmul.f32 0.0078125, %v845_v62 }
 0x26c   : > { %v919_v48 = vadd.f32 1e-05, %v887_v45 }
 0x26d   : > { %v847_v8 = vpop.xlane.xlu0 %846 }
 0x26e   : > { %4483 = vrsqrt.f32 %v919_v48  ;;  %v888_v16 = vmul.f32 0.0078125, %v847_v8 }
 0x270   : > { %v920_v12 = vadd.f32 1e-05, %v888_v16 }
 0x271   : > { %v849_v28 = vpop.xlane.xlu1 %848 }
 0x272   : > { %4485 = vrsqrt.f32 %v920_v12  ;;  %v889_v32 = vmul.f32 0.0078125, %v849_v28  ;;  %v1105_v49 = vpop.xlane.xlu0 %1104  ;;  %v7518_v12 = vld [vmem:[#allocation29_spill] sm:$0xff] }
 0x273   : > { %v1168_v35 = vmul.f32 0.0078125, %v1105_v49 }
 0x274   : > { %v4482_v54 = vpop.eup %4481  ;;  %v921_v27 = vadd.f32 1e-05, %v889_v32 }
 0x275   : > { %v5919_v4 = vsub.f32 %v5700_v57, %v1168_v35  ;;  %v982_v44 = vmul.f32 %v4482_v54, %v5666_v58 }
 0x276   : > { %4487 = vrsqrt.f32 %v921_v27  ;;  %v1107_v22 = vpop.xlane.xlu1 %1106  ;;  %v851_v33 = vpop.xlane.xlu0 %850 }
 0x277   : > { %v1169_v38 = vmul.f32 0.0078125, %v1107_v22  ;;  %v890_v56 = vmul.f32 0.0078125, %v851_v33  ;;  %v1232_v52 = vmul.f32 %v5919_v4, %v5919_v4  ;;  %v1020_v42 = vmul.f32 %v5681_v25, %v982_v44 }
 0x278   : > { %v4484_v37 = vpop.eup %4483 }
 0x279   : > { %v5926_v17 = vsub.f32 %v5717_v59, %v1169_v38  ;;  %v922_v2 = vadd.f32 1e-05, %v890_v56  ;;  %1264 = vadd.xlane.f32.xlu0 %v1232_v52  ;;  %v1058_v57 = vadd.f32 %v5689_v5, %v1020_v42  ;;  %v983_v58 = vmul.f32 %v4484_v37, %v5671_v55  ;;  %v7519_v55 = vld [vmem:[#allocation34_spill] sm:$0xff] }
 0x27a   : > { %v853_v30 = vpop.xlane.xlu1 %852  ;;  %v1109_v62 = vpop.xlane.xlu0 %1108  ;;  %v7520_v56 = vld [vmem:[#allocation30_spill] sm:$0xff] }
 0x27b   : > { %4489 = vrsqrt.f32 %v922_v2  ;;  %v891_v45 = vmul.f32 0.0078125, %v853_v30  ;;  %v1170_v48 = vmul.f32 0.0078125, %v1109_v62  ;;  %v1233_v8 = vmul.f32 %v5926_v17, %v5926_v17 }
 0x27c   : > { %v4486_v16 = vpop.eup %4485  ;;  %v5933_v28 = vadd.f32 %v1058_v57, %v7518_v12  ;;  %v1021_v59 = vmul.f32 %v5681_v25, %v983_v58 }
 0x27d   : > { %v923_v32 = vadd.f32 1e-05, %v891_v45  ;;  %v5937_v49 = vsub.f32 %v5731_v3, %v1170_v48  ;;  %1266 = vadd.xlane.f32.xlu1 %v1233_v8  ;;  %v984_v35 = vmul.f32 %v4486_v16, %v7519_v55  ;;  %v7521_v8 = vld [vmem:[#allocation31_spill] sm:$0xff] }
 0x27e   : > { %1552 = vst [vmem:[%s5707_s29 + $0xa0] sm:$0xff] %v5933_v28  ;;  %1144 = vadd.xlane.f32.xlu0 %v5933_v28  ;;  %v1111_v54 = vpop.xlane.xlu1 %1110  ;;  %v855_v27 = vpop.xlane.xlu0 %854  ;;  %v1059_v44 = vadd.f32 %v5689_v5, %v1021_v59 }
 0x27f   : > { %4491 = vrsqrt.f32 %v923_v32  ;;  %v1171_v22 = vmul.f32 0.0078125, %v1111_v54  ;;  %v892_v33 = vmul.f32 0.0078125, %v855_v27  ;;  %v1234_v38 = vmul.f32 %v5937_v49, %v5937_v49 }
 0x280   : > { %v4488_v3 = vpop.eup %4487  ;;  %v5947_v52 = vadd.f32 %v1059_v44, %v7520_v56  ;;  %v1022_v42 = vmul.f32 %v5681_v25, %v984_v35  ;;  %v4371_v44 = vld [vmem:[#allocation9 + $0x20] ss:$16 sps:$4 sm:$0xff]  }
 0x281   : > { %v5951_v37 = vsub.f32 %v5745_v50, %v1171_v22  ;;  %v924_v2 = vadd.f32 1e-05, %v892_v33  ;;  %v985_v57 = vmul.f32 %v4488_v3, %v5693_v24  ;;  %v4372_v22 = vld [vmem:[#allocation9 + $0x28] ss:$16 sps:$4 sm:$0xff]   ;;  %v7522_v3 = vld [vmem:[#allocation32_spill] sm:$0xff]  ;;  %1861 = vmatpush1.bf16.msra.mxu0 %v4371_v44 }
 0x282   : > { %1553 = vst [vmem:[%s5707_s29 + $0xa8] sm:$0xff] %v5947_v52  ;;  %1146 = vadd.xlane.f32.xlu1 %v5947_v52  ;;  %1268 = vadd.xlane.f32.xlu0 %v1234_v38  ;;  %v857_v58 = vpop.xlane.xlu1 %856  ;;  %v1113_v30 = vpop.xlane.xlu0 %1112  ;;  %v1060_v62 = vadd.f32 %v5689_v5, %v1022_v42  ;;  %v4379_v44 = vld [vmem:[#allocation9 + $0x64] ss:$16 sps:$4 sm:$0xff]  }
 0x283   : > { %4493 = vrsqrt.f32 %v924_v2  ;;  %v893_v45 = vmul.f32 0.0078125, %v857_v58  ;;  %v1172_v48 = vmul.f32 0.0078125, %v1113_v30  ;;  %v1235_v50 = vmul.f32 %v5951_v37, %v5951_v37  ;;  %2054 = vmatpush1.bf16.msra.mxu1 %v4372_v22  ;;  %v4373_v58 = vld [vmem:[#allocation9 + $0x44] ss:$16 sps:$4 sm:$0xff]   ;;  %v4375_v30 = vld [vmem:[#allocation9 + $0x4c] ss:$16 sps:$4 sm:$0xff]  }
 0x284   : > { %v5961_v16 = vadd.f32 %v1060_v62, %v7521_v8  ;;  %v1023_v24 = vmul.f32 %v5681_v25, %v985_v57  ;;  %v4377_v8 = vld [vmem:[#allocation9 + $0x40] ss:$16 sps:$4 sm:$0xff]   ;;  %1862 = vmatprep.subr.bf16.mxu0 %v4373_v58  ;;  %2055 = vmatprep.subr.bf16.mxu1 %v4375_v30  ;;  %v4381_v22 = vld [vmem:[#allocation9 + $0x6c] ss:$16 sps:$4 sm:$0xff]  }
 0x285   : > { %v4490_v12 = vpop.eup %4489  ;;  %v925_v59 = vadd.f32 1e-05, %v893_v45  ;;  %v5965_v32 = vsub.f32 %v5759_v19, %v1172_v48  ;;  %1863 = vmatpush1.bf16.msra.mxu0 %v4377_v8 }
 0x286   : > { %1270 = vadd.xlane.f32.xlu1 %v1235_v50  ;;  %1554 = vst [vmem:[%s5707_s29 + $0xb0] sm:$0xff] %v5961_v16  ;;  %1148 = vadd.xlane.f32.xlu0 %v5961_v16  ;;  %v1115_v55 = vpop.xlane.xlu1 %1114  ;;  %v859_v35 = vpop.xlane.xlu0 %858  ;;  %v1061_v54 = vadd.f32 %v5689_v5, %v1023_v24  ;;  %v986_v27 = vmul.f32 %v4490_v12, %v5704_v41  ;;  %v4378_v24 = vld [vmem:[#allocation9 + $0x48] ss:$16 sps:$4 sm:$0xff]  }
 0x287   : > { %4495 = vrsqrt.f32 %v925_v59  ;;  %v1173_v33 = vmul.f32 0.0078125, %v1115_v55  ;;  %v894_v38 = vmul.f32 0.0078125, %v859_v35  ;;  %v1236_v19 = vmul.f32 %v5965_v32, %v5965_v32  ;;  %2056 = vmatpush1.bf16.msra.mxu1 %v4378_v24  ;;  %1864 = vmatprep.subr.bf16.mxu0 %v4379_v44 }
 0x288   : > { %v5975_v56 = vadd.f32 %v1061_v54, %v7522_v3  ;;  %v1024_v42 = vmul.f32 %v5681_v25, %v986_v27  ;;  %v4383_v3 = vld [vmem:[#allocation9 + $0x60] ss:$16 sps:$4 sm:$0xff]   ;;  %2057 = vmatprep.subr.bf16.mxu1 %v4381_v22 }
 0x289   : > { %v4492_v2 = vpop.eup %4491  ;;  %v5979_v57 = vsub.f32 %v5773_v13, %v1173_v33  ;;  %v926_v41 = vadd.f32 1e-05, %v894_v38  ;;  %1865 = vmatpush1.bf16.msra.mxu0 %v4383_v3 }
 0x28a   : > { %1555 = vst [vmem:[%s5707_s29 + $0xb8] sm:$0xff] %v5975_v56  ;;  %1150 = vadd.xlane.f32.xlu1 %v5975_v56  ;;  %1272 = vadd.xlane.f32.xlu0 %v1236_v19  ;;  %v861_v62 = vpop.xlane.xlu1 %860  ;;  %v1117_v45 = vpop.xlane.xlu0 %1116  ;;  %v1062_v48 = vadd.f32 %v5689_v5, %v1024_v42  ;;  %v987_v50 = vmul.f32 %v4492_v2, %v5721_v34  ;;  %v4384_v42 = vld [vmem:[#allocation9 + $0x68] ss:$16 sps:$4 sm:$0xff]  }
 0x28b   : > { %4497 = vrsqrt.f32 %v926_v41  ;;  %v895_v12 = vmul.f32 0.0078125, %v861_v62  ;;  %v1174_v13 = vmul.f32 0.0078125, %v1117_v45  ;;  %v1237_v59 = vmul.f32 %v5979_v57, %v5979_v57  ;;  %2058 = vmatpush1.bf16.msra.mxu1 %v4384_v42  ;;  %v4395_v42 = vld [vmem:[#allocation9 + $0xa0] ss:$16 sps:$4 sm:$0xff]  }
 0x28c   : > { %v5989_v55 = vadd.f32 %v1062_v48, %v5557_v53  ;;  %v1025_v35 = vmul.f32 %v5681_v25, %v987_v50  ;;  %v4385_v48 = vld [vmem:[#allocation9 + $0x84] ss:$16 sps:$4 sm:$0xff]   ;;  %v4387_v50 = vld [vmem:[#allocation9 + $0x8c] ss:$16 sps:$4 sm:$0xff]  }
 0x28d   : > { %v4494_v54 = vpop.eup %4493  ;;  %v927_v34 = vadd.f32 1e-05, %v895_v12  ;;  %v5993_v27 = vsub.f32 %v5787_v1, %v1174_v13  ;;  %v4389_v13 = vld [vmem:[#allocation9 + $0x80] ss:$16 sps:$4 sm:$0xff]   ;;  %1866 = vmatprep.subr.bf16.mxu0 %v4385_v48  ;;  %2059 = vmatprep.subr.bf16.mxu1 %v4387_v50  ;;  %v4399_v48 = vld [vmem:[#allocation9 + $0xcc] ss:$16 sps:$4 sm:$0xff]  }
 0x28e   : > { %1274 = vadd.xlane.f32.xlu1 %v1237_v59  ;;  %v1119_v33 = vpop.xlane.xlu1 %1118  ;;  %1556 = vst [vmem:[%s5707_s29 + $0xc0] sm:$0xff] %v5989_v55  ;;  %1152 = vadd.xlane.f32.xlu0 %v5989_v55  ;;  %v863_v38 = vpop.xlane.xlu0 %862  ;;  %v1063_v53 = vadd.f32 %v5689_v5, %v1025_v35  ;;  %v988_v19 = vmul.f32 %v4494_v54, %v5735_v9  ;;  %v4390_v59 = vld [vmem:[#allocation9 + $0x88] ss:$16 sps:$4 sm:$0xff]  }
 0x28f   : > { %4499 = vrsqrt.f32 %v927_v34  ;;  %v1175_v2 = vmul.f32 0.0078125, %v1119_v33  ;;  %v896_v1 = vmul.f32 0.0078125, %v863_v38  ;;  %v1238_v41 = vmul.f32 %v5993_v27, %v5993_v27  ;;  %1867 = vmatpush1.bf16.msra.mxu0 %v4389_v13  ;;  %2060 = vmatpush1.bf16.msra.mxu1 %v4390_v59  ;;  %v4391_v38 = vld [vmem:[#allocation9 + $0xa4] ss:$16 sps:$4 sm:$0xff]  }
 0x290   : > { %v6003_v58 = vadd.f32 %v1063_v53, %v5565_v0  ;;  %v1026_v30 = vmul.f32 %v5681_v25, %v988_v19  ;;  %v4393_v53 = vld [vmem:[#allocation9 + $0xac] ss:$16 sps:$4 sm:$0xff]   ;;  %1868 = vmatprep.subr.bf16.mxu0 %v4391_v38  ;;  %v4408_v38 = vld [vmem:[#allocation9 + $0xe8] ss:$16 sps:$4 sm:$0xff]  }
 0x291   : > { %v4496_v62 = vpop.eup %4495  ;;  %v6007_v9 = vsub.f32 %v5801_v40, %v1175_v2  ;;  %v928_v45 = vadd.f32 1e-05, %v896_v1  ;;  %v4396_v2 = vld [vmem:[#allocation9 + $0xa8] ss:$16 sps:$4 sm:$0xff]   ;;  %2061 = vmatprep.subr.bf16.mxu1 %v4393_v53 }
 0x292   : > { %1557 = vst [vmem:[%s5707_s29 + $0xc8] sm:$0xff] %v6003_v58  ;;  %1154 = vadd.xlane.f32.xlu1 %v6003_v58  ;;  %v865_v8 = vpop.xlane.xlu1 %864  ;;  %1276 = vadd.xlane.f32.xlu0 %v1238_v41  ;;  %v1121_v24 = vpop.xlane.xlu0 %1120  ;;  %v1064_v0 = vadd.f32 %v5689_v5, %v1026_v30  ;;  %v989_v12 = vmul.f32 %v4496_v62, %v5749_v6 }
 0x293   : > { %4501 = vrsqrt.f32 %v928_v45  ;;  %v897_v35 = vmul.f32 0.0078125, %v865_v8  ;;  %v1176_v40 = vmul.f32 0.0078125, %v1121_v24  ;;  %v1239_v54 = vmul.f32 %v6007_v9, %v6007_v9  ;;  %1869 = vmatpush1.bf16.msra.mxu0 %v4395_v42  ;;  %2062 = vmatpush1.bf16.msra.mxu1 %v4396_v2  ;;  %v4397_v45 = vld [vmem:[#allocation9 + $0xc4] ss:$16 sps:$4 sm:$0xff]   ;;  %v4401_v24 = vld [vmem:[#allocation9 + $0xc0] ss:$16 sps:$4 sm:$0xff]  }
 0x294   : > { %v6017_v34 = vadd.f32 %v1064_v0, %v5577_v18  ;;  %v1027_v44 = vmul.f32 %v5681_v25, %v989_v12  ;;  %v4402_v0 = vld [vmem:[#allocation9 + $0xc8] ss:$16 sps:$4 sm:$0xff]   ;;  %1870 = vmatprep.subr.bf16.mxu0 %v4397_v45  ;;  %2063 = vmatprep.subr.bf16.mxu1 %v4399_v48 }
 0x295   : > { %v4498_v22 = vpop.eup %4497  ;;  %v929_v6 = vadd.f32 1e-05, %v897_v35  ;;  %v6021_v33 = vsub.f32 %v5815_v63, %v1176_v40 }
 0x296   : > { %1278 = vadd.xlane.f32.xlu1 %v1239_v54  ;;  %v1123_v19 = vpop.xlane.xlu1 %1122  ;;  %1558 = vst [vmem:[%s5707_s29 + $0xd0] sm:$0xff] %v6017_v34  ;;  %1156 = vadd.xlane.f32.xlu0 %v6017_v34  ;;  %v1065_v18 = vadd.f32 %v5689_v5, %v1027_v44  ;;  %v990_v3 = vmul.f32 %v4498_v22, %v5763_v60  ;;  %v4405_v54 = vld [vmem:[#allocation9 + $0xec] ss:$16 sps:$4 sm:$0xff]  }
 0x297   : > { %4503 = vrsqrt.f32 %v929_v6  ;;  %v1177_v1 = vmul.f32 0.0078125, %v1123_v19  ;;  %v1240_v63 = vmul.f32 %v6021_v33, %v6021_v33  ;;  %1871 = vmatpush1.bf16.msra.mxu0 %v4401_v24  ;;  %2064 = vmatpush1.bf16.msra.mxu1 %v4402_v0  ;;  %v4407_v6 = vld [vmem:[#allocation9 + $0xe0] ss:$16 sps:$4 sm:$0xff]   ;;  %v7523_v24 = vld [vmem:[#allocation33_spill] sm:$0xff] }
 0x298   : > { %v6031_v41 = vadd.f32 %v1065_v18, %v5585_v29  ;;  %v1028_v30 = vmul.f32 %v5681_v25, %v990_v3  ;;  %2065 = vmatprep.subr.bf16.mxu1 %v4405_v54 }
 0x299   : > { %v4500_v62 = vpop.eup %4499  ;;  %v6035_v60 = vsub.f32 %v5824_v20, %v1177_v1 }
 0x29a   : > { %1559 = vst [vmem:[%s5707_s29 + $0xd8] sm:$0xff] %v6031_v41  ;;  %1158 = vadd.xlane.f32.xlu1 %v6031_v41  ;;  %1280 = vadd.xlane.f32.xlu0 %v1240_v63  ;;  %v1125_v50 = vpop.xlane.xlu0 %1124  ;;  %v1066_v8 = vadd.f32 %v5689_v5, %v1028_v30  ;;  %v991_v29 = vmul.f32 %v4500_v62, %v5777_v15  ;;  %v4403_v15 = vld [vmem:[#allocation9 + $0xe4] ss:$16 sps:$4 sm:$0xff]   ;;  %v5079_v30 = vmov 0  }
 0x29b   : > { %v1178_v12 = vmul.f32 0.0078125, %v1125_v50  ;;  %v1241_v20 = vmul.f32 %v6035_v60, %v6035_v60  ;;  %1872 = vmatprep.subr.bf16.mxu0 %v4403_v15  ;;  %2066 = vmatpush1.bf16.msra.mxu1 %v4408_v38 }
 0x29c   : > { %v6045_v13 = vadd.f32 %v1066_v8, %v5597_v47  ;;  %v1029_v59 = vmul.f32 %v5681_v25, %v991_v29  ;;  %1873 = vmatpush1.bf16.msra.mxu0 %v4407_v6  ;;  %1890 = vmatprep.mubr.bf16.mxu0 %v5079_v30 }
 0x29d   : > { %v4502_v35 = vpop.eup %4501  ;;  %v6049_v40 = vsub.f32 %v5833_v26, %v1178_v12  ;;  %2083 = vmatprep.mubr.bf16.mxu1 %v5079_v30 }
 0x29e   : > { %1282 = vadd.xlane.f32.xlu1 %v1241_v20  ;;  %v1127_v44 = vpop.xlane.xlu1 %1126  ;;  %1560 = vst [vmem:[%s5707_s29 + $0xe0] sm:$0xff] %v6045_v13  ;;  %1160 = vadd.xlane.f32.xlu0 %v6045_v13  ;;  %v1067_v47 = vadd.f32 %v5689_v5, %v1029_v59  ;;  %v992_v22 = vmul.f32 %v4502_v35, %v5791_v31 }
 0x29f   : > { %v1179_v53 = vmul.f32 0.0078125, %v1127_v44  ;;  %v1242_v26 = vmul.f32 %v6049_v40, %v6049_v40 }
 0x2a0   : > { %v6059_v19 = vadd.f32 %v1067_v47, %v5605_v61  ;;  %v1030_v18 = vmul.f32 %v5681_v25, %v992_v22 }
 0x2a1   : > { %v4504_v3 = vpop.eup %4503  ;;  %v6063_v42 = vsub.f32 %v5842_v36, %v1179_v53 }
 0x2a2   : > { %1561 = vst [vmem:[%s5707_s29 + $0xe8] sm:$0xff] %v6059_v19  ;;  %1162 = vadd.xlane.f32.xlu1 %v6059_v19  ;;  %1284 = vadd.xlane.f32.xlu0 %v1242_v26  ;;  %v1129_v31 = vpop.xlane.xlu0 %1128  ;;  %v1068_v2 = vadd.f32 %v5689_v5, %v1030_v18  ;;  %v993_v61 = vmul.f32 %v4504_v3, %v5805_v10 }
 0x2a3   : > { %v1180_v1 = vmul.f32 0.0078125, %v1129_v31  ;;  %v1243_v63 = vmul.f32 %v6063_v42, %v6063_v42 }
 0x2a4   : > { %v6075_v36 = vadd.f32 %v1068_v2, %v5617_v21  ;;  %v1031_v62 = vmul.f32 %v5681_v25, %v993_v61 }
 0x2a5   : > { %v6079_v45 = vsub.f32 %v5852_v39, %v1180_v1 }
 0x2a6   : > { %1286 = vadd.xlane.f32.xlu1 %v1243_v63  ;;  %v1131_v10 = vpop.xlane.xlu1 %1130  ;;  %1562 = vst [vmem:[%s5707_s29 + $0xf0] sm:$0xff] %v6075_v36  ;;  %1164 = vadd.xlane.f32.xlu0 %v6075_v36  ;;  %v1069_v48 = vadd.f32 %v5689_v5, %v1031_v62 }
 0x2a7   : > { %v1181_v50 = vmul.f32 0.0078125, %v1131_v10  ;;  %v1133_v8 = vpop.xlane.xlu0 %1132  ;;  %v1244_v29 = vmul.f32 %v6079_v45, %v6079_v45 }
 0x2a8   : > { %v1182_v21 = vmul.f32 0.0078125, %v1133_v8  ;;  %v6088_v0 = vadd.f32 %v1069_v48, %v7523_v24 }
 0x2a9   : > { %v6091_v25 = vsub.f32 %v5864_v7, %v1181_v50 }
 0x2aa   : > { %v6094_v39 = vsub.f32 %v5868_v14, %v1182_v21  ;;  %1563 = vst [vmem:[%s5707_s29 + $0xf8] sm:$0xff] %v6088_v0  ;;  %1166 = vadd.xlane.f32.xlu1 %v6088_v0  ;;  %v1135_v5 = vpop.xlane.xlu1 %1134  ;;  %1288 = vadd.xlane.f32.xlu0 %v1244_v29 }
 0x2ab   : > { %v1183_v12 = vmul.f32 0.0078125, %v1135_v5  ;;  %v1137_v20 = vpop.xlane.xlu0 %1136  ;;  %v1245_v59 = vmul.f32 %v6091_v25, %v6091_v25 }
 0x2ac   : > { %v1184_v35 = vmul.f32 0.0078125, %v1137_v20  ;;  %v1246_v15 = vmul.f32 %v6094_v39, %v6094_v39 }
 0x2ad   : > { %v6104_v7 = vsub.f32 %v5882_v46, %v1183_v12 }
 0x2ae   : > { %v6107_v14 = vsub.f32 %v5886_v23, %v1184_v35  ;;  %1290 = vadd.xlane.f32.xlu1 %v1245_v59  ;;  %v1139_v54 = vpop.xlane.xlu1 %1138  ;;  %1292 = vadd.xlane.f32.xlu0 %v1246_v15 }
 0x2af   : > { %v1185_v44 = vmul.f32 0.0078125, %v1139_v54  ;;  %v1141_v47 = vpop.xlane.xlu0 %1140  ;;  %v1247_v22 = vmul.f32 %v6104_v7, %v6104_v7 }
 0x2b0   : > { %v1186_v6 = vmul.f32 0.0078125, %v1141_v47  ;;  %v1248_v38 = vmul.f32 %v6107_v14, %v6107_v14 }
 0x2b1   : > { %v6114_v53 = vsub.f32 %v5899_v11, %v1185_v44 }
 0x2b2   : > { %v6117_v46 = vsub.f32 %v5903_v51, %v1186_v6  ;;  %1294 = vadd.xlane.f32.xlu1 %v1247_v22  ;;  %v1143_v23 = vpop.xlane.xlu1 %1142  ;;  %1296 = vadd.xlane.f32.xlu0 %v1248_v38 }
 0x2b3   : > { %v1187_v26 = vmul.f32 0.0078125, %v1143_v23  ;;  %v1249_v18 = vmul.f32 %v6114_v53, %v6114_v53 }
 0x2b4   : > { %v1250_v3 = vmul.f32 %v6117_v46, %v6117_v46 }
 0x2b5   : > { %v6124_v31 = vsub.f32 %v5913_v43, %v1187_v26 }
 0x2b6   : > { %1298 = vadd.xlane.f32.xlu1 %v1249_v18  ;;  %1300 = vadd.xlane.f32.xlu0 %v1250_v3  ;;  %v6147_v18 = vld [vmem:[%s7453_s4] ss:$0 sm:$0xff] }
 0x2b7   : > { %v1251_v11 = vmul.f32 %v6124_v31, %v6124_v31 }
 0x2ba   : > { %1302 = vadd.xlane.f32.xlu1 %v1251_v11 }
 0x306   : > { %v1265_v51 = vpop.xlane.xlu0 %1264 }
 0x307   : > { %v1328_v2 = vmul.f32 0.0078125, %v1265_v51 }
 0x309   : > { %v1360_v61 = vadd.f32 1e-05, %v1328_v2 }
 0x30a   : > { %v1267_v1 = vpop.xlane.xlu1 %1266 }
 0x30b   : > { %4505 = vrsqrt.f32 %v1360_v61  ;;  %v1329_v63 = vmul.f32 0.0078125, %v1267_v1  ;;  %v1145_v62 = vpop.xlane.xlu0 %1144 }
 0x30c   : > { %v1188_v10 = vmul.f32 0.0078125, %v1145_v62 }
 0x30d   : > { %v1361_v48 = vadd.f32 1e-05, %v1329_v63 }
 0x30e   : > { %v6129_v50 = vsub.f32 %v5933_v28, %v1188_v10  ;;  %v6159_v10 = vld [vmem:[%s7454_s5] ss:$0 sm:$0xff] }
 0x30f   : > { %4507 = vrsqrt.f32 %v1361_v48  ;;  %v1147_v43 = vpop.xlane.xlu1 %1146  ;;  %v1269_v8 = vpop.xlane.xlu0 %1268 }
 0x310   : > { %v1189_v29 = vmul.f32 0.0078125, %v1147_v43  ;;  %v1330_v21 = vmul.f32 0.0078125, %v1269_v8  ;;  %v1252_v24 = vmul.f32 %v6129_v50, %v6129_v50 }
 0x312   : > { %v6134_v5 = vsub.f32 %v5947_v52, %v1189_v29  ;;  %v1362_v12 = vadd.f32 1e-05, %v1330_v21  ;;  %1304 = vadd.xlane.f32.xlu0 %v1252_v24 }
 0x313   : > { %v1271_v20 = vpop.xlane.xlu1 %1270  ;;  %v1149_v59 = vpop.xlane.xlu0 %1148 }
 0x314   : > { %4509 = vrsqrt.f32 %v1362_v12  ;;  %v1331_v35 = vmul.f32 0.0078125, %v1271_v20  ;;  %v1190_v15 = vmul.f32 0.0078125, %v1149_v59  ;;  %v1253_v28 = vmul.f32 %v6134_v5, %v6134_v5 }
 0x315   : > { %v4506_v54 = vpop.eup %4505 }
 0x316   : > { %v1363_v44 = vadd.f32 1e-05, %v1331_v35  ;;  %v6139_v47 = vsub.f32 %v5961_v16, %v1190_v15  ;;  %1306 = vadd.xlane.f32.xlu1 %v1253_v28  ;;  %v1424_v52 = vmul.f32 %v4506_v54, %v5919_v4 }
 0x317   : > { %v1151_v22 = vpop.xlane.xlu1 %1150  ;;  %v1273_v6 = vpop.xlane.xlu0 %1272 }
 0x318   : > { %4511 = vrsqrt.f32 %v1363_v44  ;;  %v1191_v38 = vmul.f32 0.0078125, %v1151_v22  ;;  %v1332_v23 = vmul.f32 0.0078125, %v1273_v6  ;;  %v1254_v26 = vmul.f32 %v6139_v47, %v6139_v47 }
 0x319   : > { %v4508_v3 = vpop.eup %4507  ;;  %v1462_v61 = vmul.f32 %v6147_v18, %v1424_v52 }
 0x31a   : > { %v6150_v16 = vsub.f32 %v5975_v56, %v1191_v38  ;;  %v1364_v11 = vadd.f32 1e-05, %v1332_v23  ;;  %1308 = vadd.xlane.f32.xlu0 %v1254_v26  ;;  %v1425_v51 = vmul.f32 %v4508_v3, %v5926_v17 }
 0x31b   : > { %v1275_v4 = vpop.xlane.xlu1 %1274  ;;  %v1153_v2 = vpop.xlane.xlu0 %1152  ;;  %v1500_v21 = vadd.f32 %v6159_v10, %v1462_v61 }
 0x31c   : > { %4513 = vrsqrt.f32 %v1364_v11  ;;  %v1333_v1 = vmul.f32 0.0078125, %v1275_v4  ;;  %v1192_v63 = vmul.f32 0.0078125, %v1153_v2  ;;  %v1255_v62 = vmul.f32 %v6150_v16, %v6150_v16 }
 0x31d   : > { %v1463_v56 = vmul.f32 %v6147_v18, %v1425_v51 }
 0x31e   : > { %v4510_v48 = vpop.eup %4509  ;;  %v1365_v43 = vadd.f32 1e-05, %v1333_v1  ;;  %v6163_v17 = vsub.f32 %v5989_v55, %v1192_v63  ;;  %1310 = vadd.xlane.f32.xlu1 %v1255_v62 }
 0x31f   : > { %v1155_v8 = vpop.xlane.xlu1 %1154  ;;  %v1277_v29 = vpop.xlane.xlu0 %1276  ;;  %v1501_v24 = vadd.f32 %v6159_v10, %v1463_v56  ;;  %v1426_v12 = vmul.f32 %v4510_v48, %v5937_v49 }
 0x320   : > { %4515 = vrsqrt.f32 %v1365_v43  ;;  %v1193_v20 = vmul.f32 0.0078125, %v1155_v8  ;;  %v1334_v59 = vmul.f32 0.0078125, %v1277_v29  ;;  %v1256_v35 = vmul.f32 %v6163_v17, %v6163_v17 }
 0x321   : > { %v1564_v15 = vpack.c.bf16 %v1501_v24, %v1500_v21  ;;  %v1464_v49 = vmul.f32 %v6147_v18, %v1426_v12 }
 0x322   : > { %v4512_v28 = vpop.eup %4511  ;;  %v6171_v55 = vsub.f32 %v6003_v58, %v1193_v20  ;;  %v1366_v54 = vadd.f32 1e-05, %v1334_v59  ;;  %1312 = vadd.xlane.f32.xlu0 %v1256_v35 }
 0x323   : > { %1891 = vmatmul.mubr.bf16.vlgmr.msra.gmra.mrb[0].mxu0 %v1564_v15  ;;  %2084 = vmatmul.mubr.bf16.vlgmr.msra.gmra.mrb[0].mxu1 %v1564_v15  ;;  %v1279_v44 = vpop.xlane.xlu1 %1278  ;;  %v1157_v22 = vpop.xlane.xlu0 %1156  ;;  %v1427_v6 = vmul.f32 %v4512_v28, %v5951_v37  ;;  %v1502_v4 = vadd.f32 %v6159_v10, %v1464_v49 }
 0x324   : > { %4517 = vrsqrt.f32 %v1366_v54  ;;  %v1335_v52 = vmul.f32 0.0078125, %v1279_v44  ;;  %v1194_v38 = vmul.f32 0.0078125, %v1157_v22  ;;  %v1257_v23 = vmul.f32 %v6171_v55, %v6171_v55  ;;  %1900 = vmatprep.mubr.bf16.mxu0 %v5079_v30  ;;  %2093 = vmatprep.mubr.bf16.mxu1 %v5079_v30 }
 0x325   : > { %v1465_v58 = vmul.f32 %v6147_v18, %v1427_v6 }
 0x326   : > { %v4514_v26 = vpop.eup %4513  ;;  %v1367_v3 = vadd.f32 1e-05, %v1335_v52  ;;  %v6181_v11 = vsub.f32 %v6017_v34, %v1194_v38  ;;  %1314 = vadd.xlane.f32.xlu1 %v1257_v23 }
 0x327   : > { %v1159_v37 = vpop.xlane.xlu1 %1158  ;;  %v1281_v51 = vpop.xlane.xlu0 %1280  ;;  %v1503_v2 = vadd.f32 %v6159_v10, %v1465_v58  ;;  %v1428_v61 = vmul.f32 %v4514_v26, %v5965_v32 }
 0x328   : > { %4519 = vrsqrt.f32 %v1367_v3  ;;  %v1195_v1 = vmul.f32 0.0078125, %v1159_v37  ;;  %v1336_v63 = vmul.f32 0.0078125, %v1281_v51  ;;  %v1258_v62 = vmul.f32 %v6181_v11, %v6181_v11 }
 0x329   : > { %v1565_v56 = vpack.c.bf16 %v1503_v2, %v1502_v4  ;;  %v1466_v32 = vmul.f32 %v6147_v18, %v1428_v61 }
 0x32a   : > { %v4516_v48 = vpop.eup %4515  ;;  %v6189_v34 = vsub.f32 %v6031_v41, %v1195_v1  ;;  %v1368_v43 = vadd.f32 1e-05, %v1336_v63  ;;  %1316 = vadd.xlane.f32.xlu0 %v1258_v62 }
 0x32b   : > { %1901 = vmatmul.mubr.bf16.gmra.mrb[4].mxu0 %v1565_v56  ;;  %2094 = vmatmul.mubr.bf16.gmra.mrb[4].mxu1 %v1565_v56  ;;  %v1283_v8 = vpop.xlane.xlu1 %1282  ;;  %v1161_v29 = vpop.xlane.xlu0 %1160  ;;  %v1429_v21 = vmul.f32 %v4516_v48, %v5979_v57  ;;  %v1504_v54 = vadd.f32 %v6159_v10, %v1466_v32 }
 0x32c   : > { %4521 = vrsqrt.f32 %v1368_v43  ;;  %v1337_v24 = vmul.f32 0.0078125, %v1283_v8  ;;  %v1196_v12 = vmul.f32 0.0078125, %v1161_v29  ;;  %v1259_v20 = vmul.f32 %v6189_v34, %v6189_v34  ;;  %1910 = vmatprep.mubr.bf16.mxu0 %v5079_v30  ;;  %2103 = vmatprep.mubr.bf16.mxu1 %v5079_v30 }
 0x32d   : > { %v1467_v41 = vmul.f32 %v6147_v18, %v1429_v21 }
 0x32e   : > { %v4518_v59 = vpop.eup %4517  ;;  %v1369_v35 = vadd.f32 1e-05, %v1337_v24  ;;  %v6199_v15 = vsub.f32 %v6045_v13, %v1196_v12  ;;  %1318 = vadd.xlane.f32.xlu1 %v1259_v20 }
 0x32f   : > { %v1163_v57 = vpop.xlane.xlu1 %1162  ;;  %v1285_v28 = vpop.xlane.xlu0 %1284  ;;  %v1505_v44 = vadd.f32 %v6159_v10, %v1467_v41  ;;  %v1430_v22 = vmul.f32 %v4518_v59, %v5993_v27 }
 0x330   : > { %4523 = vrsqrt.f32 %v1369_v35  ;;  %v1197_v6 = vmul.f32 0.0078125, %v1163_v57  ;;  %v1338_v49 = vmul.f32 0.0078125, %v1285_v28  ;;  %v1260_v52 = vmul.f32 %v6199_v15, %v6199_v15 }
 0x331   : > { %v1566_v38 = vpack.c.bf16 %v1505_v44, %v1504_v54  ;;  %v1468_v27 = vmul.f32 %v6147_v18, %v1430_v22 }
 0x332   : > { %v4520_v23 = vpop.eup %4519  ;;  %v6207_v13 = vsub.f32 %v6059_v19, %v1197_v6  ;;  %v1370_v58 = vadd.f32 1e-05, %v1338_v49  ;;  %1320 = vadd.xlane.f32.xlu0 %v1260_v52 }
 0x333   : > { %1911 = vmatmul.mubr.bf16.gmra.mrb[8].mxu0 %v1566_v38  ;;  %2104 = vmatmul.mubr.bf16.gmra.mrb[8].mxu1 %v1566_v38  ;;  %v1287_v26 = vpop.xlane.xlu1 %1286  ;;  %v1165_v3 = vpop.xlane.xlu0 %1164  ;;  %v1431_v37 = vmul.f32 %v4520_v23, %v6007_v9  ;;  %v1506_v56 = vadd.f32 %v6159_v10, %v1468_v27 }
 0x334   : > { %4525 = vrsqrt.f32 %v1370_v58  ;;  %v1339_v51 = vmul.f32 0.0078125, %v1287_v26  ;;  %v1198_v4 = vmul.f32 0.0078125, %v1165_v3  ;;  %v1261_v2 = vmul.f32 %v6207_v13, %v6207_v13  ;;  %1920 = vmatprep.mubr.bf16.mxu0 %v5079_v30  ;;  %2113 = vmatprep.mubr.bf16.mxu1 %v5079_v30 }
 0x335   : > { %v1469_v19 = vmul.f32 %v6147_v18, %v1431_v37 }
 0x336   : > { %v4522_v61 = vpop.eup %4521  ;;  %v1371_v1 = vadd.f32 1e-05, %v1339_v51  ;;  %v6217_v63 = vsub.f32 %v6075_v36, %v1198_v4  ;;  %1322 = vadd.xlane.f32.xlu1 %v1261_v2 }
 0x337   : > { %v1167_v9 = vpop.xlane.xlu1 %1166  ;;  %v1289_v62 = vpop.xlane.xlu0 %1288  ;;  %v1507_v48 = vadd.f32 %v6159_v10, %v1469_v19  ;;  %v1432_v43 = vmul.f32 %v4522_v61, %v6021_v33 }
 0x338   : > { %4527 = vrsqrt.f32 %v1371_v1  ;;  %v1199_v8 = vmul.f32 0.0078125, %v1167_v9  ;;  %v1340_v29 = vmul.f32 0.0078125, %v1289_v62  ;;  %v1262_v21 = vmul.f32 %v6217_v63, %v6217_v63 }
 0x339   : > { %v1567_v32 = vpack.c.bf16 %v1507_v48, %v1506_v56  ;;  %v1470_v33 = vmul.f32 %v6147_v18, %v1432_v43 }
 0x33a   : > { %v4524_v24 = vpop.eup %4523  ;;  %v6225_v36 = vsub.f32 %v6088_v0, %v1199_v8  ;;  %v1372_v12 = vadd.f32 1e-05, %v1340_v29  ;;  %1324 = vadd.xlane.f32.xlu0 %v1262_v21 }
 0x33b   : > { %v1291_v20 = vpop.xlane.xlu1 %1290  ;;  %1921 = vmatmul.mubr.bf16.gmra.mrb[12].mxu0 %v1567_v32  ;;  %2114 = vmatmul.mubr.bf16.gmra.mrb[12].mxu1 %v1567_v32  ;;  %v1293_v41 = vpop.xlane.xlu0 %1292  ;;  %v1433_v59 = vmul.f32 %v4524_v24, %v6035_v60  ;;  %v1508_v49 = vadd.f32 %v6159_v10, %v1470_v33 }
 0x33c   : > { %4529 = vrsqrt.f32 %v1372_v12  ;;  %v1341_v35 = vmul.f32 0.0078125, %v1291_v20  ;;  %v1342_v57 = vmul.f32 0.0078125, %v1293_v41  ;;  %v1263_v28 = vmul.f32 %v6225_v36, %v6225_v36  ;;  %1930 = vmatprep.mubr.bf16.mxu0 %v5079_v30  ;;  %2123 = vmatprep.mubr.bf16.mxu1 %v5079_v30 }
 0x33d   : > { %v1471_v0 = vmul.f32 %v6147_v18, %v1433_v59 }
 0x33e   : > { %v4526_v54 = vpop.eup %4525  ;;  %v1373_v44 = vadd.f32 1e-05, %v1341_v35  ;;  %v1374_v22 = vadd.f32 1e-05, %v1342_v57  ;;  %1326 = vadd.xlane.f32.xlu1 %v1263_v28 }
 0x33f   : > { %v1295_v6 = vpop.xlane.xlu1 %1294  ;;  %v1297_v60 = vpop.xlane.xlu0 %1296  ;;  %v1509_v52 = vadd.f32 %v6159_v10, %v1471_v0  ;;  %v1434_v38 = vmul.f32 %v4526_v54, %v6049_v40 }
 0x340   : > { %4531 = vrsqrt.f32 %v1373_v44  ;;  %v1343_v23 = vmul.f32 0.0078125, %v1295_v6  ;;  %v1344_v37 = vmul.f32 0.0078125, %v1297_v60  ;;  %v4410_v6 = vld [vmem:[#allocation10 + $0xc0] sm:$0xff]  }
 0x341   : > { %v1568_v58 = vpack.c.bf16 %v1509_v52, %v1508_v49  ;;  %4533 = vrsqrt.f32 %v1374_v22  ;;  %v1472_v4 = vmul.f32 %v6147_v18, %v1434_v38  ;;  %v4409_v22 = vld [vmem:[#allocation10 + $0x40] sm:$0xff]   ;;  %4147 = vmatprep.subr.bf16.mxu1 %v4410_v6  ;;  %v4439_v6 = vld [vmem:[#allocation10 + $0x38] sm:$0xff]  }
 0x342   : > { %v4528_v26 = vpop.eup %4527  ;;  %v1375_v3 = vadd.f32 1e-05, %v1343_v23  ;;  %v1376_v61 = vadd.f32 1e-05, %v1344_v37  ;;  %v4411_v60 = vld [vmem:[#allocation10] sm:$0xff]   ;;  %4035 = vmatprep.subr.bf16.mxu0 %v4409_v22  ;;  %v4438_v22 = vld [vmem:[#allocation10 + $0xf8] sm:$0xff]  }
 0x343   : > { %v1299_v27 = vpop.xlane.xlu1 %1298  ;;  %1931 = vmatmul.mubr.bf16.gmra.mrb[16].mxu0 %v1568_v58  ;;  %2124 = vmatmul.mubr.bf16.gmra.mrb[16].mxu1 %v1568_v58  ;;  %v1435_v51 = vmul.f32 %v4528_v26, %v6063_v42  ;;  %v1301_v9 = vpop.xlane.xlu0 %1300  ;;  %v1510_v56 = vadd.f32 %v6159_v10, %v1472_v4 }
 0x344   : > { %4535 = vrsqrt.f32 %v1375_v3  ;;  %v1345_v2 = vmul.f32 0.0078125, %v1299_v27  ;;  %1940 = vmatprep.mubr.bf16.mxu0 %v5079_v30  ;;  %2133 = vmatprep.mubr.bf16.mxu1 %v5079_v30  ;;  %v1346_v21 = vmul.f32 0.0078125, %v1301_v9  ;;  %v4415_v9 = vld [vmem:[#allocation10 + $0x8] sm:$0xff]  }
 0x345   : > { %v1473_v40 = vmul.f32 %v6147_v18, %v1435_v51  ;;  %4036 = vmatpush3.bf16.msra.mxu0 %v4411_v60  ;;  %v4440_v60 = vld [vmem:[#allocation10 + $0xb8] sm:$0xff]  }
 0x346   : > { %v4530_v19 = vpop.eup %4529  ;;  %v1377_v1 = vadd.f32 1e-05, %v1345_v2  ;;  %v1378_v59 = vadd.f32 1e-05, %v1346_v21  ;;  %v4422_v21 = vld [vmem:[#allocation10 + $0xd8] sm:$0xff]  }
 0x347   : > { %v1303_v62 = vpop.xlane.xlu1 %1302  ;;  %v1511_v48 = vadd.f32 %v6159_v10, %v1473_v40  ;;  %v1436_v42 = vmul.f32 %v4530_v19, %v6079_v45 }
 0x348   : > { %4537 = vrsqrt.f32 %v1377_v1  ;;  %v1347_v43 = vmul.f32 0.0078125, %v1303_v62  ;;  %v4414_v1 = vld [vmem:[#allocation10 + $0xc8] sm:$0xff]  }
 0x349   : > { %v1569_v8 = vpack.c.bf16 %v1511_v48, %v1510_v56  ;;  %4539 = vrsqrt.f32 %v1376_v61  ;;  %v1474_v24 = vmul.f32 %v6147_v18, %v1436_v42  ;;  %v4413_v61 = vld [vmem:[#allocation10 + $0x48] sm:$0xff]   ;;  %v4417_v48 = vld [vmem:[#allocation10 + $0x50] sm:$0xff]  }
 0x34a   : > { %v4532_v29 = vpop.eup %4531  ;;  %v1379_v20 = vadd.f32 1e-05, %v1347_v43  ;;  %v4416_v62 = vld [vmem:[#allocation10 + $0x88] sm:$0xff]   ;;  %4037 = vmatprep.subr.bf16.mxu0 %v4413_v61  ;;  %v4418_v42 = vld [vmem:[#allocation10 + $0xd0] sm:$0xff]  }
 0x34b   : > { %1941 = vmatmul.mubr.bf16.gmra.mrb[20].mxu0 %v1569_v8  ;;  %2134 = vmatmul.mubr.bf16.gmra.mrb[20].mxu1 %v1569_v8  ;;  %v1437_v32 = vmul.f32 %v4532_v29, %v6091_v25  ;;  %v4534_v12 = vpop.eup %4533  ;;  %v1512_v33 = vadd.f32 %v6159_v10, %v1474_v24  ;;  %v4419_v43 = vld [vmem:[#allocation10 + $0x10] sm:$0xff]   ;;  %v4421_v29 = vld [vmem:[#allocation10 + $0x58] sm:$0xff]  }
 0x34c   : > { %1950 = vmatprep.mubr.bf16.mxu0 %v5079_v30  ;;  %2143 = vmatprep.mubr.bf16.mxu1 %v5079_v30  ;;  %v1438_v57 = vmul.f32 %v4534_v12, %v6094_v39  ;;  %4541 = vrsqrt.f32 %v1379_v20  ;;  %v4412_v39 = vld [vmem:[#allocation10 + $0x80] sm:$0xff]   ;;  %v4420_v8 = vld [vmem:[#allocation10 + $0x90] sm:$0xff]   ;;  %v4424_v24 = vld [vmem:[#allocation10 + $0x98] sm:$0xff]  }
 0x34d   : > { %v1475_v45 = vmul.f32 %v6147_v18, %v1437_v32  ;;  %4543 = vrsqrt.f32 %v1378_v59  ;;  %4148 = vmatpush3.bf16.msra.mxu1 %v4412_v39  ;;  %4038 = vmatpush3.bf16.msra.mxu0 %v4415_v9  ;;  %v4423_v32 = vld [vmem:[#allocation10 + $0x18] sm:$0xff]   ;;  %v4425_v12 = vld [vmem:[#allocation10 + $0x60] sm:$0xff]   ;;  %v4429_v59 = vld [vmem:[#allocation10 + $0x68] sm:$0xff]  }
 0x34e   : > { %v4536_v41 = vpop.eup %4535  ;;  %v1476_v44 = vmul.f32 %v6147_v18, %v1438_v57  ;;  %4149 = vmatprep.subr.bf16.mxu1 %v4414_v1  ;;  %4039 = vmatprep.subr.bf16.mxu0 %v4417_v48  ;;  %v4426_v20 = vld [vmem:[#allocation10 + $0xe0] sm:$0xff]   ;;  %v4432_v57 = vld [vmem:[#allocation10 + $0xa8] sm:$0xff]  }
 0x34f   : > { %v1513_v35 = vadd.f32 %v6159_v10, %v1475_v45  ;;  %v1439_v25 = vmul.f32 %v4536_v41, %v6104_v7  ;;  %v4427_v45 = vld [vmem:[#allocation10 + $0x20] sm:$0xff]  }
 0x350   : > { %v1514_v38 = vadd.f32 %v6159_v10, %v1476_v44  ;;  %v4428_v41 = vld [vmem:[#allocation10 + $0xa0] sm:$0xff]   ;;  %v4437_v44 = vld [vmem:[#allocation10 + $0x78] sm:$0xff]  }
 0x351   : > { %v1570_v28 = vpack.c.bf16 %v1513_v35, %v1512_v33  ;;  %v1477_v0 = vmul.f32 %v6147_v18, %v1439_v25  ;;  %4150 = vmatpush3.bf16.msra.mxu1 %v4416_v62  ;;  %4040 = vmatpush3.bf16.msra.mxu0 %v4419_v43  ;;  %v4430_v33 = vld [vmem:[#allocation10 + $0xe8] sm:$0xff]   ;;  %v4433_v25 = vld [vmem:[#allocation10 + $0x70] sm:$0xff]  }
 0x352   : > { %v4538_v54 = vpop.eup %4537  ;;  %4151 = vmatprep.subr.bf16.mxu1 %v4418_v42  ;;  %4041 = vmatprep.subr.bf16.mxu0 %v4421_v29  ;;  %v4431_v35 = vld [vmem:[#allocation10 + $0x28] sm:$0xff]  }
 0x353   : > { %1951 = vmatmul.mubr.bf16.gmra.mrb[24].mxu0 %v1570_v28  ;;  %2144 = vmatmul.mubr.bf16.gmra.mrb[24].mxu1 %v1570_v28  ;;  %v4540_v49 = vpop.eup %4539  ;;  %v1515_v7 = vadd.f32 %v6159_v10, %v1477_v0  ;;  %v1441_v52 = vmul.f32 %v4538_v54, %v6114_v53  ;;  %v4434_v28 = vld [vmem:[#allocation10 + $0xf0] sm:$0xff]  }
 0x354   : > { %1960 = vmatprep.mubr.bf16.mxu0 %v5079_v30  ;;  %2153 = vmatprep.mubr.bf16.mxu1 %v5079_v30  ;;  %v1440_v23 = vmul.f32 %v4540_v49, %v6107_v14  ;;  %v4435_v0 = vld [vmem:[#allocation10 + $0x30] sm:$0xff]  }
 0x355   : > { %v1571_v58 = vpack.c.bf16 %v1515_v7, %v1514_v38  ;;  %v1479_v26 = vmul.f32 %v6147_v18, %v1441_v52  ;;  %4152 = vmatpush3.bf16.msra.mxu1 %v4420_v8  ;;  %4042 = vmatpush3.bf16.msra.mxu0 %v4423_v32  ;;  %v4436_v54 = vld [vmem:[#allocation10 + $0xb0] sm:$0xff]  }
 0x356   : > { %v4542_v3 = vpop.eup %4541  ;;  %v1478_v37 = vmul.f32 %v6147_v18, %v1440_v23  ;;  %4153 = vmatprep.subr.bf16.mxu1 %v4422_v21  ;;  %4043 = vmatprep.subr.bf16.mxu0 %v4425_v12 }
 0x357   : > { %v4544_v27 = vpop.eup %4543  ;;  %v1517_v53 = vadd.f32 %v6159_v10, %v1479_v26  ;;  %v1443_v51 = vmul.f32 %v4542_v3, %v6124_v31 }
 0x358   : > { %v1516_v4 = vadd.f32 %v6159_v10, %v1478_v37  ;;  %v1442_v14 = vmul.f32 %v4544_v27, %v6117_v46 }
 0x359   : > { %v1481_v40 = vmul.f32 %v6147_v18, %v1443_v51  ;;  %4154 = vmatpush3.bf16.msra.mxu1 %v4424_v24  ;;  %4044 = vmatpush3.bf16.msra.mxu0 %v4427_v45 }
 0x35a   : > { %v1572_v2 = vpack.c.bf16 %v1517_v53, %v1516_v4  ;;  %v1480_v19 = vmul.f32 %v6147_v18, %v1442_v14  ;;  %4155 = vmatprep.subr.bf16.mxu1 %v4426_v20  ;;  %4045 = vmatprep.subr.bf16.mxu0 %v4429_v59 }
 0x35b   : > { %1961 = vmatmul.mubr.bf16.gmra.mrb[28].mxu0 %v1571_v58  ;;  %2154 = vmatmul.mubr.bf16.gmra.mrb[28].mxu1 %v1571_v58  ;;  %v1519_v31 = vadd.f32 %v6159_v10, %v1481_v40 }
 0x35c   : > { %1970 = vmatprep.mubr.bf16.mxu0 %v5079_v30  ;;  %2163 = vmatprep.mubr.bf16.mxu1 %v5079_v30  ;;  %v1518_v46 = vadd.f32 %v6159_v10, %v1480_v19 }
 0x35d   : > { %4156 = vmatpush3.bf16.msra.mxu1 %v4428_v41  ;;  %4046 = vmatpush3.bf16.msra.mxu0 %v4431_v35 }
 0x35e   : > { %v1573_v56 = vpack.c.bf16 %v1519_v31, %v1518_v46  ;;  %4157 = vmatprep.subr.bf16.mxu1 %v4430_v33  ;;  %4047 = vmatprep.subr.bf16.mxu0 %v4433_v25 }
 0x361   : > { %4158 = vmatpush3.bf16.msra.mxu1 %v4432_v57  ;;  %4048 = vmatpush3.bf16.msra.mxu0 %v4435_v0 }
 0x362   : > { %4159 = vmatprep.subr.bf16.mxu1 %v4434_v28  ;;  %4049 = vmatprep.subr.bf16.mxu0 %v4437_v44 }
 0x363   : > { %1971 = vmatmul.mubr.bf16.gmra.mrb[32].mxu0 %v1572_v2  ;;  %2164 = vmatmul.mubr.bf16.gmra.mrb[32].mxu1 %v1572_v2 }
 0x364   : > { %1980 = vmatprep.mubr.bf16.mxu0 %v5079_v30  ;;  %2173 = vmatprep.mubr.bf16.mxu1 %v5079_v30 }
 0x365   : > { %4160 = vmatpush3.bf16.msra.mxu1 %v4436_v54  ;;  %4050 = vmatpush3.bf16.msra.mxu0 %v4439_v6 }
 0x366   : > { %4161 = vmatprep.subr.bf16.mxu1 %v4438_v22 }
 0x369   : > { %4162 = vmatpush3.bf16.msra.mxu1 %v4440_v60 }
 0x36b   : > { %1981 = vmatmul.mubr.bf16.gmra.mrb[36].mxu0 %v1573_v56  ;;  %2174 = vmatmul.mubr.bf16.gmra.mrb[36].mxu1 %v1573_v56 }
 0x36c   : > { %1990 = vmatprep.mubr.bf16.mxu0 %v5079_v30  ;;  %2183 = vmatprep.mubr.bf16.mxu1 %v5079_v30 }
 0x39f   : > { %v1305_v49 = vpop.xlane.xlu0 %1304 }
 0x3a0   : > { %v1348_v39 = vmul.f32 0.0078125, %v1305_v49 }
 0x3a2   : > { %v1380_v7 = vadd.f32 1e-05, %v1348_v39 }
 0x3a3   : > { %v1307_v52 = vpop.xlane.xlu1 %1306 }
 0x3a4   : > { %4545 = vrsqrt.f32 %v1380_v7  ;;  %v1349_v38 = vmul.f32 0.0078125, %v1307_v52 }
 0x3a6   : > { %v1381_v23 = vadd.f32 1e-05, %v1349_v38 }
 0x3a7   : > { %v1309_v58 = vpop.xlane.xlu0 %1308 }
 0x3a8   : > { %4547 = vrsqrt.f32 %v1381_v23  ;;  %v1350_v26 = vmul.f32 0.0078125, %v1309_v58 }
 0x3aa   : > { %v1382_v3 = vadd.f32 1e-05, %v1350_v26 }
 0x3ab   : > { %v1311_v37 = vpop.xlane.xlu1 %1310 }
 0x3ac   : > { %4549 = vrsqrt.f32 %v1382_v3  ;;  %v1351_v27 = vmul.f32 0.0078125, %v1311_v37 }
 0x3ae   : > { %v4546_v53 = vpop.eup %4545  ;;  %v1383_v51 = vadd.f32 1e-05, %v1351_v27 }
 0x3af   : > { %v1313_v4 = vpop.xlane.xlu0 %1312  ;;  %v1444_v14 = vmul.f32 %v4546_v53, %v6129_v50 }
 0x3b0   : > { %4551 = vrsqrt.f32 %v1383_v51  ;;  %v1352_v2 = vmul.f32 0.0078125, %v1313_v4 }
 0x3b1   : > { %v1482_v9 = vmul.f32 %v6147_v18, %v1444_v14 }
 0x3b2   : > { %v4548_v40 = vpop.eup %4547  ;;  %v1384_v19 = vadd.f32 1e-05, %v1352_v2 }
 0x3b3   : > { %v1315_v61 = vpop.xlane.xlu1 %1314  ;;  %v1445_v1 = vmul.f32 %v4548_v40, %v6134_v5  ;;  %v1520_v42 = vadd.f32 %v6159_v10, %v1482_v9 }
 0x3b4   : > { %4553 = vrsqrt.f32 %v1384_v19  ;;  %v1353_v62 = vmul.f32 0.0078125, %v1315_v61 }
 0x3b5   : > { %v1483_v31 = vmul.f32 %v6147_v18, %v1445_v1 }
 0x3b6   : > { %v4550_v46 = vpop.eup %4549  ;;  %v1385_v56 = vadd.f32 1e-05, %v1353_v62 }
 0x3b7   : > { %v1317_v48 = vpop.xlane.xlu0 %1316  ;;  %v1521_v50 = vadd.f32 %v6159_v10, %v1483_v31  ;;  %v1446_v43 = vmul.f32 %v4550_v46, %v6139_v47 }
 0x3b8   : > { %4555 = vrsqrt.f32 %v1385_v56  ;;  %v1354_v8 = vmul.f32 0.0078125, %v1317_v48 }
 0x3b9   : > { %v1574_v29 = vpack.c.bf16 %v1521_v50, %v1520_v42  ;;  %v1484_v12 = vmul.f32 %v6147_v18, %v1446_v43 }
 0x3ba   : > { %v4552_v21 = vpop.eup %4551  ;;  %v1386_v5 = vadd.f32 1e-05, %v1354_v8 }
 0x3bb   : > { %1991 = vmatmul.mubr.bf16.gmra.mrb[40].mxu0 %v1574_v29  ;;  %2184 = vmatmul.mubr.bf16.gmra.mrb[40].mxu1 %v1574_v29  ;;  %v1319_v32 = vpop.xlane.xlu1 %1318  ;;  %v1447_v24 = vmul.f32 %v4552_v21, %v6150_v16  ;;  %v1522_v33 = vadd.f32 %v6159_v10, %v1484_v12 }
 0x3bc   : > { %4557 = vrsqrt.f32 %v1386_v5  ;;  %v1355_v20 = vmul.f32 0.0078125, %v1319_v32  ;;  %2000 = vmatprep.mubr.bf16.mxu0 %v5079_v30  ;;  %2193 = vmatprep.mubr.bf16.mxu1 %v5079_v30 }
 0x3bd   : > { %v1485_v47 = vmul.f32 %v6147_v18, %v1447_v24 }
 0x3be   : > { %v4554_v45 = vpop.eup %4553  ;;  %v1387_v41 = vadd.f32 1e-05, %v1355_v20 }
 0x3bf   : > { %v1321_v59 = vpop.xlane.xlu0 %1320  ;;  %v1523_v35 = vadd.f32 %v6159_v10, %v1485_v47  ;;  %v1448_v57 = vmul.f32 %v4554_v45, %v6163_v17 }
 0x3c0   : > { %4559 = vrsqrt.f32 %v1387_v41  ;;  %v1356_v16 = vmul.f32 0.0078125, %v1321_v59 }
 0x3c1   : > { %v1575_v25 = vpack.c.bf16 %v1523_v35, %v1522_v33  ;;  %v1486_v22 = vmul.f32 %v6147_v18, %v1448_v57 }
 0x3c2   : > { %v4556_v28 = vpop.eup %4555  ;;  %v1388_v0 = vadd.f32 1e-05, %v1356_v16 }
 0x3c3   : > { %2001 = vmatmul.mubr.bf16.gmra.mrb[44].mxu0 %v1575_v25  ;;  %2194 = vmatmul.mubr.bf16.gmra.mrb[44].mxu1 %v1575_v25  ;;  %v1323_v54 = vpop.xlane.xlu1 %1322  ;;  %v1449_v44 = vmul.f32 %v4556_v28, %v6171_v55  ;;  %v1524_v7 = vadd.f32 %v6159_v10, %v1486_v22 }
 0x3c4   : > { %4561 = vrsqrt.f32 %v1388_v0  ;;  %v1357_v6 = vmul.f32 0.0078125, %v1323_v54  ;;  %2010 = vmatprep.mubr.bf16.mxu0 %v5079_v30  ;;  %2203 = vmatprep.mubr.bf16.mxu1 %v5079_v30 }
 0x3c5   : > { %v1487_v17 = vmul.f32 %v6147_v18, %v1449_v44 }
 0x3c6   : > { %v4558_v60 = vpop.eup %4557  ;;  %v1389_v49 = vadd.f32 1e-05, %v1357_v6 }
 0x3c7   : > { %v1325_v39 = vpop.xlane.xlu0 %1324  ;;  %v1525_v52 = vadd.f32 %v6159_v10, %v1487_v17  ;;  %v1450_v38 = vmul.f32 %v4558_v60, %v6181_v11 }
 0x3c8   : > { %4563 = vrsqrt.f32 %v1389_v49  ;;  %v1358_v55 = vmul.f32 0.0078125, %v1325_v39 }
 0x3c9   : > { %v1576_v23 = vpack.c.bf16 %v1525_v52, %v1524_v7  ;;  %v1488_v27 = vmul.f32 %v6147_v18, %v1450_v38 }
 0x3ca   : > { %v4560_v58 = vpop.eup %4559  ;;  %v1390_v26 = vadd.f32 1e-05, %v1358_v55 }
 0x3cb   : > { %v1327_v3 = vpop.xlane.xlu1 %1326  ;;  %2011 = vmatmul.mubr.bf16.gmra.mrb[48].mxu0 %v1576_v23  ;;  %2204 = vmatmul.mubr.bf16.gmra.mrb[48].mxu1 %v1576_v23  ;;  %v1451_v37 = vmul.f32 %v4560_v58, %v6189_v34  ;;  %v1526_v14 = vadd.f32 %v6159_v10, %v1488_v27 }
 0x3cc   : > { %4565 = vrsqrt.f32 %v1390_v26  ;;  %v1359_v53 = vmul.f32 0.0078125, %v1327_v3  ;;  %2020 = vmatprep.mubr.bf16.mxu0 %v5079_v30  ;;  %2213 = vmatprep.mubr.bf16.mxu1 %v5079_v30 }
 0x3cd   : > { %v1489_v11 = vmul.f32 %v6147_v18, %v1451_v37 }
 0x3ce   : > { %v4562_v51 = vpop.eup %4561  ;;  %v1391_v4 = vadd.f32 1e-05, %v1359_v53 }
 0x3cf   : > { %v1527_v2 = vadd.f32 %v6159_v10, %v1489_v11  ;;  %v1452_v40 = vmul.f32 %v4562_v51, %v6199_v15 }
 0x3d0   : > { %4567 = vrsqrt.f32 %v1391_v4 }
 0x3d1   : > { %v1577_v34 = vpack.c.bf16 %v1527_v2, %v1526_v14  ;;  %v1490_v1 = vmul.f32 %v6147_v18, %v1452_v40 }
 0x3d2   : > { %v4564_v19 = vpop.eup %4563 }
 0x3d3   : > { %2021 = vmatmul.mubr.bf16.gmra.mrb[52].mxu0 %v1577_v34  ;;  %2214 = vmatmul.mubr.bf16.gmra.mrb[52].mxu1 %v1577_v34  ;;  %v1453_v61 = vmul.f32 %v4564_v19, %v6207_v13  ;;  %v1528_v31 = vadd.f32 %v6159_v10, %v1490_v1 }
 0x3d4   : > { %2030 = vmatprep.mubr.bf16.mxu0 %v5079_v30  ;;  %2223 = vmatprep.mubr.bf16.mxu1 %v5079_v30 }
 0x3d5   : > { %v1491_v9 = vmul.f32 %v6147_v18, %v1453_v61 }
 0x3d6   : > { %v4566_v62 = vpop.eup %4565 }
 0x3d7   : > { %v1529_v15 = vadd.f32 %v6159_v10, %v1491_v9  ;;  %v1454_v46 = vmul.f32 %v4566_v62, %v6217_v63  ;;  %v1678_v63 = vlaneseq }
 0x3d9   : > { %v1578_v56 = vpack.c.bf16 %v1529_v15, %v1528_v31  ;;  %v1492_v42 = vmul.f32 %v6147_v18, %v1454_v46  ;;  %v1679_v21 = vshrl.u32 %v1678_v63, 7 }
 0x3da   : > { %v4568_v48 = vpop.eup %4567 }
 0x3db   : > { %2031 = vmatmul.mubr.bf16.gmra.mrb[56].mxu0 %v1578_v56  ;;  %2224 = vmatmul.mubr.bf16.gmra.mrb[56].mxu1 %v1578_v56  ;;  %v1455_v13 = vmul.f32 %v4568_v48, %v6225_v36  ;;  %v1530_v43 = vadd.f32 %v6159_v10, %v1492_v42  ;;  %v1680_v5 = vsub.s32 0, %v1679_v21  ;;  %v1688_v32 = vsub.s32 2, %v1679_v21  ;;  %v1676_v36 = vld [vmem:[%s7456_s7] sm:$0xf] }
 0x3dc   : > { %2040 = vmatprep.mubr.bf16.mxu0 %v5079_v30  ;;  %2233 = vmatprep.mubr.bf16.mxu1 %v5079_v30  ;;  %v1684_v24 = vsub.s32 1, %v1679_v21  ;;  %v1692_v12 = vsub.s32 3, %v1679_v21 }
 0x3dd   : > { %v1493_v50 = vmul.f32 %v6147_v18, %v1455_v13  ;;  %v6327_v30 = vrot.slane %v1676_v36, %v1680_v5  ;;  %v6329_v18 = vrot.slane %v1676_v36, %v1688_v32 }
 0x3de   : > { %v6331_v20 = vrot.slane %v1676_v36, %v1684_v24 }
 0x3df   : > { %v1531_v8 = vadd.f32 %v6159_v10, %v1493_v50  ;;  %v6333_v10 = vrot.slane %v1676_v36, %v1692_v12 }
 0x3e1   : > { %v1579_v29 = vpack.c.bf16 %v1531_v8, %v1530_v43 }
 0x3e3   : > { %2041 = vmatmul.mubr.bf16.gmra.mrb[60].mxu0 %v1579_v29  ;;  %2234 = vmatmul.mubr.bf16.gmra.mrb[60].mxu1 %v1579_v29 }
 0x3f6   : > { %v1892_v47 = vpop.f32.mrb[0].mxu0  ;;  %v2085_v45 = vpop.f32.mrb[0].mxu1 }
 0x3f7   : > { %v1893_v41 = vadd.f32 %v1892_v47, %v6327_v30  ;;  %v2086_v59 = vadd.f32 %v2085_v45, %v6329_v18  ;;  %v1894_v33 = vpop.f32.mrb[1].mxu0  ;;  %v2087_v35 = vpop.f32.mrb[1].mxu1 }
 0x3f8   : > { %v1895_v57 = vadd.f32 %v1894_v33, %v6331_v20  ;;  %v2088_v16 = vadd.f32 %v2087_v35, %v6333_v10  ;;  %v1896_v25 = vpop.f32.mrb[2].mxu0  ;;  %v2089_v28 = vpop.f32.mrb[2].mxu1 }
 0x3f9   : > { %v2372_v0 = vmul.f32 0.70710677, %v1893_v41  ;;  %v2374_v54 = vmul.f32 0.70710677, %v2086_v59  ;;  %v1897_v6 = vadd.f32 %v1896_v25, %v6327_v30  ;;  %v2090_v17 = vadd.f32 %v2089_v28, %v6329_v18  ;;  %v1898_v60 = vpop.f32.mrb[3].mxu0  ;;  %v2091_v49 = vpop.f32.mrb[3].mxu1 }
 0x3fa   : > { %v2373_v44 = vmul.f32 0.70710677, %v1895_v57  ;;  %v2375_v22 = vmul.f32 0.70710677, %v2088_v16  ;;  %v1899_v39 = vadd.f32 %v1898_v60, %v6331_v20  ;;  %v2092_v7 = vadd.f32 %v2091_v49, %v6333_v10 }
 0x3fb   : > { %4569 = verf.f32 %v2372_v0  ;;  %v2376_v52 = vmul.f32 0.70710677, %v1897_v6  ;;  %v2378_v38 = vmul.f32 0.70710677, %v2090_v17  ;;  %v2244_v34 = vmul.f32 0.5, %v1893_v41 }
 0x3fc   : > { %4571 = verf.f32 %v2374_v54  ;;  %v2377_v55 = vmul.f32 0.70710677, %v1899_v39  ;;  %v2379_v58 = vmul.f32 0.70710677, %v2092_v7  ;;  %v2246_v1 = vmul.f32 0.5, %v2086_v59 }
 0x3fd   : > { %4573 = verf.f32 %v2373_v44  ;;  %v2245_v48 = vmul.f32 0.5, %v1895_v57  ;;  %v6350_v13 = vmul.f32 0.5, %v2088_v16  ;;  %v2248_v42 = vmul.f32 0.5, %v1897_v6 }
 0x3fe   : > { %4575 = verf.f32 %v2375_v22  ;;  %v1902_v23 = vpop.f32.mrb[4].mxu0  ;;  %v2095_v3 = vpop.f32.mrb[4].mxu1  ;;  %v2250_v8 = vmul.f32 0.5, %v2090_v17  ;;  %v6352_v32 = vmul.f32 0.5, %v1899_v39  ;;  %v6354_v36 = vmul.f32 0.5, %v2092_v7 }
 0x3ff   : > { %4577 = verf.f32 %v2376_v52  ;;  %v1903_v26 = vadd.f32 %v1902_v23, %v6327_v30  ;;  %v1904_v37 = vpop.f32.mrb[5].mxu0  ;;  %v2096_v27 = vadd.f32 %v2095_v3, %v6329_v18  ;;  %v2097_v11 = vpop.f32.mrb[5].mxu1 }
 0x400   : > { %4579 = verf.f32 %v2378_v38  ;;  %v1905_v53 = vadd.f32 %v1904_v37, %v6331_v20  ;;  %v1906_v51 = vpop.f32.mrb[6].mxu0  ;;  %v2098_v14 = vadd.f32 %v2097_v11, %v6333_v10  ;;  %v2099_v2 = vpop.f32.mrb[6].mxu1 }
 0x401   : > { %4581 = verf.f32 %v2377_v55  ;;  %v2380_v4 = vmul.f32 0.70710677, %v1903_v26  ;;  %v1908_v40 = vpop.f32.mrb[7].mxu0  ;;  %v2382_v19 = vmul.f32 0.70710677, %v2096_v27  ;;  %v2101_v61 = vpop.f32.mrb[7].mxu1  ;;  %v1907_v31 = vadd.f32 %v1906_v51, %v6327_v30 }
 0x402   : > { %4583 = verf.f32 %v2379_v58  ;;  %v2381_v9 = vmul.f32 0.70710677, %v1905_v53  ;;  %v2383_v62 = vmul.f32 0.70710677, %v2098_v14  ;;  %v2100_v15 = vadd.f32 %v2099_v2, %v6329_v18 }
 0x403   : > { %4585 = verf.f32 %v2380_v4  ;;  %v1909_v46 = vadd.f32 %v1908_v40, %v6331_v20  ;;  %v2384_v29 = vmul.f32 0.70710677, %v1907_v31  ;;  %v2102_v12 = vadd.f32 %v2101_v61, %v6333_v10 }
 0x404   : > { %4587 = verf.f32 %v2382_v19  ;;  %v2386_v24 = vmul.f32 0.70710677, %v2100_v15  ;;  %v6357_v41 = vmul.f32 0.5, %v1903_v26  ;;  %v6359_v59 = vmul.f32 0.5, %v2096_v27 }
 0x405   : > { %v4570_v56 = vpop.eup %4569  ;;  %4589 = verf.f32 %v2381_v9  ;;  %v2385_v33 = vmul.f32 0.70710677, %v1909_v46  ;;  %v6361_v28 = vmul.f32 0.5, %v1905_v53  ;;  %v6363_v0 = vmul.f32 0.5, %v2098_v14 }
 0x406   : > { %v4572_v50 = vpop.eup %4571  ;;  %v2628_v43 = vadd.f32 1.0, %v4570_v56  ;;  %4591 = verf.f32 %v2383_v62  ;;  %v1912_v63 = vpop.f32.mrb[8].mxu0  ;;  %v6369_v49 = vmul.f32 0.5, %v1907_v31  ;;  %v2387_v38 = vmul.f32 0.70710677, %v2102_v12 }
 0x407   : > { %v2105_v21 = vpop.f32.mrb[8].mxu1  ;;  %v4574_v5 = vpop.eup %4573  ;;  %v2630_v25 = vadd.f32 1.0, %v4572_v50  ;;  %4593 = verf.f32 %v2384_v29  ;;  %v1913_v55 = vadd.f32 %v1912_v63, %v6327_v30  ;;  %v6384_v2 = vmul.f32 0.5, %v2100_v15 }
 0x408   : > { %v1914_v47 = vpop.f32.mrb[9].mxu0  ;;  %v4576_v45 = vpop.eup %4575  ;;  %v6367_v6 = vmul.f32 %v2628_v43, %v2244_v34  ;;  %v2629_v17 = vadd.f32 1.0, %v4574_v5  ;;  %4595 = verf.f32 %v2386_v24  ;;  %v2106_v3 = vadd.f32 %v2105_v21, %v6329_v18 }
 0x409   : > { %v2107_v35 = vpop.f32.mrb[9].mxu1  ;;  %v1916_v57 = vpop.f32.mrb[10].mxu0  ;;  %v2631_v58 = vadd.f32 1.0, %v4576_v45  ;;  %4597 = verf.f32 %v2385_v33  ;;  %v6377_v27 = vmul.f32 %v2630_v25, %v2246_v1  ;;  %v2388_v11 = vmul.f32 0.70710677, %v1913_v55 }
 0x40a   : > { %v4578_v16 = vpop.eup %4577  ;;  %v2109_v54 = vpop.f32.mrb[10].mxu1  ;;  %v1915_v51 = vadd.f32 %v1914_v47, %v6331_v20  ;;  %v6386_v40 = vmul.f32 0.5, %v1909_v46  ;;  %v6388_v34 = vmul.f32 0.5, %v2102_v12  ;;  %v6392_v9 = vmul.f32 %v2629_v17, %v2245_v48 }
 0x40b   : > { %v6365_v44 = vpop.f32.mrb[11].mxu0  ;;  %v4580_v22 = vpop.eup %4579  ;;  %v2632_v60 = vadd.f32 1.0, %v4578_v16  ;;  %4599 = verf.f32 %v2387_v38  ;;  %v6401_v46 = vmul.f32 %v2631_v58, %v6350_v13  ;;  %v2390_v43 = vmul.f32 0.70710677, %v2106_v3 }
 0x40c   : > { %v6371_v39 = vpop.f32.mrb[11].mxu1  ;;  %v4582_v7 = vpop.eup %4581  ;;  %v2634_v52 = vadd.f32 1.0, %v4580_v22  ;;  %4601 = verf.f32 %v2388_v11  ;;  %v2389_v21 = vmul.f32 0.70710677, %v1915_v51  ;;  %v2108_v5 = vadd.f32 %v2107_v35, %v6333_v10 }
 0x40d   : > { %v4584_v23 = vpop.eup %4583  ;;  %v6374_v26 = vmul.f32 %v2632_v60, %v2248_v42  ;;  %v2633_v31 = vadd.f32 1.0, %v4582_v7  ;;  %4603 = verf.f32 %v2390_v43  ;;  %v1917_v13 = vadd.f32 %v1916_v57, %v6327_v30 }
 0x40e   : > { %v4586_v37 = vpop.eup %4585  ;;  %v6379_v53 = vmul.f32 %v2634_v52, %v2250_v8  ;;  %v1922_v19 = vpop.f32.mrb[12].mxu0  ;;  %v2635_v50 = vadd.f32 1.0, %v4584_v23  ;;  %v2110_v45 = vadd.f32 %v2109_v54, %v6329_v18  ;;  %v6415_v22 = vmul.f32 0.5, %v1913_v55 }
 0x40f   : > { %v4588_v4 = vpop.eup %4587  ;;  %v2916_v14 = vpack.c.bf16 %v6374_v26, %v6367_v6  ;;  %v6390_v61 = vpop.f32.mrb[12].mxu1  ;;  %v2636_v29 = vadd.f32 1.0, %v4586_v37  ;;  %v2761_v16 = vmul.f32 %v2633_v31, %v6352_v32  ;;  %4605 = verf.f32 %v2389_v21 }
 0x410   : > { %v4590_v1 = vpop.eup %4589  ;;  %v2918_v62 = vpack.c.bf16 %v6379_v53, %v6377_v27  ;;  %v6396_v56 = vpop.f32.mrb[13].mxu0  ;;  %v2638_v63 = vadd.f32 1.0, %v4588_v4  ;;  %v2763_v17 = vmul.f32 %v2635_v50, %v6354_v36  ;;  %v6418_v35 = vmul.f32 0.5, %v2106_v3 }
 0x411   : > { %v6398_v42 = vpop.f32.mrb[13].mxu1  ;;  %v4592_v15 = vpop.eup %4591  ;;  %v2637_v47 = vadd.f32 1.0, %v4590_v1  ;;  %v2391_v60 = vmul.f32 0.70710677, %v2108_v5  ;;  %v2392_v7 = vmul.f32 0.70710677, %v1917_v13  ;;  %v6421_v38 = vmul.f32 %v2636_v29, %v6357_v41 }
 0x412   : > { %v6403_v8 = vpop.f32.mrb[14].mxu0  ;;  %v6405_v48 = vpop.f32.mrb[14].mxu1  ;;  %v2639_v25 = vadd.f32 1.0, %v4592_v15  ;;  %v6424_v57 = vmul.f32 %v2638_v63, %v6359_v59  ;;  %v6426_v54 = vmul.f32 0.5, %v1915_v51  ;;  %v2394_v32 = vmul.f32 0.70710677, %v2110_v45 }
 0x413   : > { %v6408_v24 = vpop.f32.mrb[15].mxu0  ;;  %v6410_v12 = vpop.f32.mrb[15].mxu1  ;;  %v6429_v55 = vmul.f32 %v2637_v47, %v6361_v28  ;;  %v1919_v36 = vadd.f32 %v6365_v44, %v6331_v20  ;;  %v2112_v3 = vadd.f32 %v6371_v39, %v6333_v10  ;;  %v6442_v11 = vmul.f32 0.5, %v2108_v5 }
 0x414   : > { %v4594_v33 = vpop.eup %4593  ;;  %v6440_v59 = vmul.f32 %v2639_v25, %v6363_v0  ;;  %4607 = verf.f32 %v2391_v60  ;;  %v1923_v28 = vadd.f32 %v1922_v19, %v6327_v30  ;;  %v6449_v1 = vmul.f32 0.5, %v1917_v13 }
 0x415   : > { %v4596_v52 = vpop.eup %4595  ;;  %v2640_v58 = vadd.f32 1.0, %v4594_v33  ;;  %4609 = verf.f32 %v2392_v7  ;;  %v2393_v39 = vmul.f32 0.70710677, %v1919_v36  ;;  %v2395_v43 = vmul.f32 0.70710677, %v2112_v3 }
 0x416   : > { %v4598_v23 = vpop.eup %4597  ;;  %v6435_v37 = vpop.f32.mrb[16].mxu0  ;;  %v2642_v44 = vadd.f32 1.0, %v4596_v52  ;;  %4611 = verf.f32 %v2394_v32  ;;  %v2396_v29 = vmul.f32 0.70710677, %v1923_v28  ;;  %v2116_v5 = vadd.f32 %v6390_v61, %v6329_v18 }
 0x417   : > { %v6437_v41 = vpop.f32.mrb[16].mxu1  ;;  %v6445_v51 = vpop.f32.mrb[17].mxu0  ;;  %v2641_v50 = vadd.f32 1.0, %v4598_v23  ;;  %v6458_v21 = vmul.f32 %v2640_v58, %v6369_v49  ;;  %4613 = verf.f32 %v2393_v39  ;;  %v2917_v47 = vpack.c.bf16 %v2761_v16, %v6392_v9 }
 0x418   : > { %v6447_v4 = vpop.f32.mrb[17].mxu1  ;;  %v6451_v31 = vpop.f32.mrb[18].mxu0  ;;  %4615 = verf.f32 %v2395_v43  ;;  %v2919_v33 = vpack.c.bf16 %v2763_v17, %v6401_v46  ;;  %v1925_v25 = vadd.f32 %v6396_v56, %v6331_v20  ;;  %v2118_v60 = vadd.f32 %v6398_v42, %v6333_v10 }
 0x419   : > { %v6453_v15 = vpop.f32.mrb[18].mxu1  ;;  %v4600_v0 = vpop.eup %4599  ;;  %v6470_v52 = vmul.f32 0.5, %v2110_v45  ;;  %4617 = verf.f32 %v2396_v29  ;;  %v2398_v32 = vmul.f32 0.70710677, %v2116_v5  ;;  %3268 = vmatprep.mubr.bf16.mxu0 %v2917_v47  ;;  %v6473_v9 = vmul.f32 %v2642_v44, %v6384_v2 }
 0x41a   : > { %v6455_v63 = vpop.f32.mrb[19].mxu0  ;;  %v4602_v19 = vpop.eup %4601  ;;  %v2643_v49 = vadd.f32 1.0, %v4600_v0  ;;  %v6476_v16 = vmul.f32 %v2641_v50, %v6386_v40  ;;  %3429 = vmatprep.mubr.bf16.mxu1 %v2919_v33  ;;  %v2397_v56 = vmul.f32 0.70710677, %v1925_v25  ;;  %3269 = vmatmul.mubr.bf16.vlgmr.msra.gmra.mrb[64].mxu0 %v2916_v14  ;;  %v6481_v42 = vmul.f32 0.5, %v1919_v36 }
 0x41b   : > { %v6463_v13 = vpop.f32.mrb[19].mxu1  ;;  %v4604_v7 = vpop.eup %4603  ;;  %v2644_v46 = vadd.f32 1.0, %v4602_v19  ;;  %4619 = verf.f32 %v2398_v32  ;;  %v2399_v45 = vmul.f32 0.70710677, %v2118_v60  ;;  %3430 = vmatmul.mubr.bf16.vlgmr.msra.gmra.mrb[64].mxu1 %v2918_v62  ;;  %v1927_v2 = vadd.f32 %v6403_v8, %v6327_v30 }
 0x41c   : > { %v4606_v61 = vpop.eup %4605  ;;  %v2646_v23 = vadd.f32 1.0, %v4604_v7  ;;  %v6492_v58 = vmul.f32 0.5, %v2112_v3  ;;  %v2120_v6 = vadd.f32 %v6405_v48, %v6329_v18  ;;  %v1929_v26 = vadd.f32 %v6408_v24, %v6331_v20 }
 0x41d   : > { %v2771_v53 = vmul.f32 %v2643_v49, %v6388_v34  ;;  %v2645_v62 = vadd.f32 1.0, %v4606_v61  ;;  %4621 = verf.f32 %v2397_v56  ;;  %v2400_v8 = vmul.f32 0.70710677, %v1927_v2 }
 0x41e   : > { %v6488_v40 = vpop.f32.mrb[20].mxu0  ;;  %v6490_v17 = vpop.f32.mrb[20].mxu1  ;;  %v6508_v39 = vmul.f32 %v2644_v46, %v6415_v22  ;;  %v6510_v48 = vmul.f32 0.5, %v1923_v28  ;;  %4623 = verf.f32 %v2399_v45  ;;  %v2402_v24 = vmul.f32 0.70710677, %v2120_v6 }
 0x41f   : > { %v6498_v14 = vpop.f32.mrb[21].mxu0  ;;  %v6500_v27 = vpop.f32.mrb[21].mxu1  ;;  %v6514_v43 = vmul.f32 0.5, %v2116_v5  ;;  %v6516_v34 = vmul.f32 0.5, %v1925_v25  ;;  %v2401_v29 = vmul.f32 0.70710677, %v1929_v26  ;;  %v2122_v19 = vadd.f32 %v6410_v12, %v6333_v10 }
 0x420   : > { %v6503_v36 = vpop.f32.mrb[22].mxu0  ;;  %v6505_v44 = vpop.f32.mrb[22].mxu1  ;;  %v6523_v22 = vmul.f32 %v2646_v23, %v6418_v35  ;;  %v6525_v28 = vmul.f32 0.5, %v2118_v60  ;;  %4625 = verf.f32 %v2400_v8  ;;  %v1933_v7 = vadd.f32 %v6435_v37, %v6327_v30 }
 0x421   : > { %v4608_v3 = vpop.eup %4607  ;;  %v6512_v0 = vpop.f32.mrb[23].mxu0  ;;  %v6530_v25 = vmul.f32 %v2645_v62, %v6426_v54  ;;  %v6532_v49 = vmul.f32 0.5, %v1927_v2  ;;  %4627 = verf.f32 %v2402_v24  ;;  %v2403_v12 = vmul.f32 0.70710677, %v2122_v19 }
 0x422   : > { %v4610_v50 = vpop.eup %4609  ;;  %v6520_v47 = vpop.f32.mrb[23].mxu1  ;;  %v2647_v61 = vadd.f32 1.0, %v4608_v3  ;;  %v6534_v56 = vmul.f32 0.5, %v2120_v6  ;;  %v2404_v35 = vmul.f32 0.70710677, %v1933_v7  ;;  %4629 = verf.f32 %v2401_v29 }
 0x423   : > { %v4612_v33 = vpop.eup %4611  ;;  %v2648_v46 = vadd.f32 1.0, %v4610_v50  ;;  %v2126_v37 = vadd.f32 %v6437_v41, %v6329_v18  ;;  %v2921_v54 = vpack.c.bf16 %v6476_v16, %v6429_v55  ;;  %v6544_v8 = vmul.f32 0.5, %v1929_v26 }
 0x424   : > { %v4614_v5 = vpop.eup %4613  ;;  %v2650_v45 = vadd.f32 1.0, %v4612_v33  ;;  %4631 = verf.f32 %v2403_v12  ;;  %v2923_v6 = vpack.c.bf16 %v2771_v53, %v6440_v59  ;;  %v1935_v55 = vadd.f32 %v6445_v51, %v6331_v20 }
 0x425   : > { %v4616_v32 = vpop.eup %4615  ;;  %v2649_v62 = vadd.f32 1.0, %v4614_v5  ;;  %4633 = verf.f32 %v2404_v35  ;;  %v2406_v41 = vmul.f32 0.70710677, %v2126_v37  ;;  %3276 = vmatprep.mubr.bf16.mxu0 %v2921_v54  ;;  %v6558_v26 = vmul.f32 %v2647_v61, %v6442_v11 }
 0x426   : > { %v4618_v60 = vpop.eup %4617  ;;  %v6540_v23 = vpop.f32.mrb[24].mxu0  ;;  %v2651_v29 = vadd.f32 1.0, %v4616_v32  ;;  %3437 = vmatprep.mubr.bf16.mxu1 %v2923_v6  ;;  %v2128_v53 = vadd.f32 %v6447_v4, %v6333_v10  ;;  %v2920_v5 = vpack.c.bf16 %v6458_v21, %v6421_v38  ;;  %v6569_v35 = vmul.f32 %v2648_v46, %v6449_v1 }
 0x427   : > { %v6542_v2 = vpop.f32.mrb[24].mxu1  ;;  %v6547_v3 = vpop.f32.mrb[25].mxu0  ;;  %v2652_v59 = vadd.f32 1.0, %v4618_v60  ;;  %v6572_v54 = vmul.f32 %v2650_v45, %v6470_v52  ;;  %v6574_v11 = vmul.f32 0.5, %v2122_v19  ;;  %v2405_v61 = vmul.f32 0.70710677, %v1935_v55 }
 0x428   : > { %v6549_v24 = vpop.f32.mrb[25].mxu1  ;;  %v4620_v50 = vpop.eup %4619  ;;  %v6576_v4 = vmul.f32 0.5, %v1933_v7  ;;  %4635 = verf.f32 %v2406_v41  ;;  %v2407_v38 = vmul.f32 0.70710677, %v2128_v53  ;;  %3277 = vmatmul.mubr.bf16.gmra.mrb[68].mxu0 %v2920_v5  ;;  %v2777_v21 = vmul.f32 %v2649_v62, %v6481_v42 }
 0x429   : > { %v6553_v16 = vpop.f32.mrb[26].mxu0  ;;  %v6555_v33 = vpop.f32.mrb[26].mxu1  ;;  %v2654_v6 = vadd.f32 1.0, %v4620_v50  ;;  %v2922_v1 = vpack.c.bf16 %v6473_v9, %v6424_v57  ;;  %v1937_v52 = vadd.f32 %v6451_v31, %v6327_v30  ;;  %v6587_v46 = vmul.f32 %v2652_v59, %v6510_v48 }
 0x42a   : > { %v6564_v12 = vpop.f32.mrb[27].mxu0  ;;  %v6566_v32 = vpop.f32.mrb[27].mxu1  ;;  %v6589_v45 = vmul.f32 0.5, %v2126_v37  ;;  %v2130_v50 = vadd.f32 %v6453_v15, %v6329_v18  ;;  %4637 = verf.f32 %v2405_v61  ;;  %v1939_v57 = vadd.f32 %v6455_v63, %v6331_v20 }
 0x42b   : > { %7524 = vst [vmem:[#allocation26_spill] sm:$0xff] %v6566_v32  ;;  %v4622_v51 = vpop.eup %4621  ;;  %v6580_v32 = vmul.f32 %v2651_v29, %v6492_v58  ;;  %3438 = vmatmul.mubr.bf16.gmra.mrb[68].mxu1 %v2922_v1  ;;  %v2408_v58 = vmul.f32 0.70710677, %v1937_v52  ;;  %v6600_v48 = vmul.f32 %v2654_v6, %v6514_v43  ;;  %v6602_v37 = vmul.f32 0.5, %v1935_v55 }
 0x42c   : > { %v4624_v60 = vpop.eup %4623  ;;  %v2653_v7 = vadd.f32 1.0, %v4622_v51  ;;  %4639 = verf.f32 %v2407_v38  ;;  %v2410_v29 = vmul.f32 0.70710677, %v2130_v50  ;;  %v6608_v51 = vmul.f32 0.5, %v2128_v53 }
 0x42d   : > { %v4626_v19 = vpop.eup %4625  ;;  %v2655_v62 = vadd.f32 1.0, %v4624_v60  ;;  %4641 = verf.f32 %v2408_v58  ;;  %v2409_v63 = vmul.f32 0.70710677, %v1939_v57  ;;  %v2132_v38 = vadd.f32 %v6463_v13, %v6333_v10 }
 0x42e   : > { %v4628_v42 = vpop.eup %4627  ;;  %v6595_v9 = vpop.f32.mrb[28].mxu0  ;;  %v2656_v5 = vadd.f32 1.0, %v4626_v19  ;;  %v6615_v55 = vmul.f32 %v2653_v7, %v6516_v34  ;;  %4643 = verf.f32 %v2410_v29  ;;  %v2136_v34 = vadd.f32 %v6490_v17, %v6329_v18 }
 0x42f   : > { %v6597_v31 = vpop.f32.mrb[28].mxu1  ;;  %v6604_v15 = vpop.f32.mrb[29].mxu0  ;;  %v2658_v6 = vadd.f32 1.0, %v4628_v42  ;;  %v6624_v58 = vmul.f32 %v2655_v62, %v6525_v28  ;;  %4645 = verf.f32 %v2409_v63  ;;  %v2411_v42 = vmul.f32 0.70710677, %v2132_v38 }
 0x430   : > { %v6606_v41 = vpop.f32.mrb[29].mxu1  ;;  %v4630_v59 = vpop.eup %4629  ;;  %v2925_v13 = vpack.c.bf16 %v2777_v21, %v6530_v25  ;;  %v6634_v29 = vmul.f32 %v2656_v5, %v6532_v49  ;;  %v2927_v17 = vpack.c.bf16 %v6580_v32, %v6558_v26  ;;  %v1945_v25 = vadd.f32 %v6498_v14, %v6331_v20 }
 0x431   : > { %7525 = vst [vmem:[#allocation27_spill] sm:$0xff] %v6606_v41  ;;  %v6610_v61 = vpop.f32.mrb[30].mxu0  ;;  %v6612_v60 = vpop.f32.mrb[30].mxu1  ;;  %v2657_v7 = vadd.f32 1.0, %v4630_v59  ;;  %v6639_v62 = vmul.f32 %v2658_v6, %v6534_v56  ;;  %v2414_v41 = vmul.f32 0.70710677, %v2136_v34  ;;  %4647 = verf.f32 %v2411_v42 }
 0x432   : > { %7526 = vst [vmem:[#allocation28_spill] sm:$0xff] %v6610_v61  ;;  %7527 = vst [vmem:[#allocation29_spill] sm:$0xff] %v6612_v60  ;;  %v4632_v43 = vpop.eup %4631  ;;  %v6619_v1 = vpop.f32.mrb[31].mxu0  ;;  %v6626_v61 = vmul.f32 0.5, %v1937_v52  ;;  %v1943_v60 = vadd.f32 %v6488_v40, %v6327_v30  ;;  %3284 = vmatprep.mubr.bf16.mxu0 %v2925_v13  ;;  %v2138_v49 = vadd.f32 %v6500_v27, %v6333_v10  ;;  %v6656_v5 = vmul.f32 0.5, %v1939_v57 }
 0x433   : > { %7528 = vst [vmem:[#allocation34_spill] sm:$0xff] %v6619_v1  ;;  %v6621_v19 = vpop.f32.mrb[31].mxu1  ;;  %v4634_v53 = vpop.eup %4633  ;;  %v6636_v1 = vmul.f32 0.5, %v2130_v50  ;;  %v2924_v21 = vpack.c.bf16 %v6569_v35, %v6508_v39  ;;  %v6654_v59 = vmul.f32 %v2657_v7, %v6544_v8  ;;  %3445 = vmatprep.mubr.bf16.mxu1 %v2927_v17  ;;  %v2926_v14 = vpack.c.bf16 %v6572_v54, %v6523_v22 }
 0x434   : > { %7529 = vst [vmem:[#allocation30_spill] sm:$0xff] %v6621_v19  ;;  %v2659_v19 = vadd.f32 1.0, %v4632_v43  ;;  %v2412_v28 = vmul.f32 0.70710677, %v1943_v60  ;;  %v4636_v52 = vpop.eup %4635  ;;  %v2660_v40 = vadd.f32 1.0, %v4634_v53  ;;  %v6667_v63 = vmul.f32 0.5, %v2132_v38 }
 0x435   : > { %v4638_v32 = vpop.eup %4637  ;;  %v2662_v35 = vadd.f32 1.0, %v4636_v52  ;;  %v2413_v8 = vmul.f32 0.70710677, %v1945_v25  ;;  %3285 = vmatmul.mubr.bf16.gmra.mrb[72].mxu0 %v2924_v21  ;;  %v2415_v6 = vmul.f32 0.70710677, %v2138_v49  ;;  %3446 = vmatmul.mubr.bf16.gmra.mrb[72].mxu1 %v2926_v14  ;;  %v1947_v22 = vadd.f32 %v6503_v36, %v6327_v30 }
 0x436   : > { %v6649_v50 = vpop.f32.mrb[32].mxu0  ;;  %v6651_v56 = vpop.f32.mrb[32].mxu1  ;;  %4649 = verf.f32 %v2412_v28  ;;  %v6665_v39 = vmul.f32 %v2659_v19, %v6574_v11  ;;  %v2140_v54 = vadd.f32 %v6505_v44, %v6329_v18  ;;  %v6680_v19 = vmul.f32 %v2660_v40, %v6576_v4 }
 0x437   : > { %v6660_v26 = vpop.f32.mrb[33].mxu0  ;;  %v6662_v27 = vpop.f32.mrb[33].mxu1  ;;  %4651 = verf.f32 %v2414_v41  ;;  %v6682_v7 = vmul.f32 0.5, %v1943_v60  ;;  %v1949_v41 = vadd.f32 %v6512_v0, %v6331_v20  ;;  %v2142_v42 = vadd.f32 %v6520_v47, %v6333_v10 }
 0x438   : > { %v6669_v57 = vpop.f32.mrb[34].mxu0  ;;  %v4640_v43 = vpop.eup %4639  ;;  %v2661_v44 = vadd.f32 1.0, %v4638_v32  ;;  %v6690_v28 = vmul.f32 0.5, %v2136_v34  ;;  %4653 = verf.f32 %v2413_v8  ;;  %v2416_v52 = vmul.f32 0.70710677, %v1947_v22 }
 0x439   : > { %v6675_v53 = vpop.f32.mrb[34].mxu1  ;;  %v6677_v11 = vpop.f32.mrb[35].mxu0  ;;  %v6693_v17 = vmul.f32 %v2662_v35, %v6589_v45  ;;  %v2663_v4 = vadd.f32 1.0, %v4640_v43  ;;  %4655 = verf.f32 %v2415_v6  ;;  %v2418_v60 = vmul.f32 0.70710677, %v2140_v54 }
 0x43a   : > { %v4642_v38 = vpop.eup %4641  ;;  %v6688_v36 = vpop.f32.mrb[35].mxu1  ;;  %v6695_v21 = vmul.f32 0.5, %v1945_v25  ;;  %v6697_v0 = vmul.f32 0.5, %v2138_v49  ;;  %4657 = verf.f32 %v2416_v52  ;;  %v2417_v47 = vmul.f32 0.70710677, %v1949_v41 }
 0x43b   : > { %7530 = vst [vmem:[#allocation31_spill] sm:$0xff] %v6688_v36  ;;  %v4644_v13 = vpop.eup %4643  ;;  %v2664_v14 = vadd.f32 1.0, %v4642_v38  ;;  %4659 = verf.f32 %v2418_v60  ;;  %v2419_v34 = vmul.f32 0.70710677, %v2142_v42  ;;  %v6704_v45 = vmul.f32 %v2661_v44, %v6602_v37 }
 0x43c   : > { %v4646_v40 = vpop.eup %4645  ;;  %v2666_v36 = vadd.f32 1.0, %v4644_v13  ;;  %4661 = verf.f32 %v2417_v47  ;;  %v1953_v25 = vadd.f32 %v6540_v23, %v6327_v30  ;;  %v2146_v49 = vadd.f32 %v6542_v2, %v6329_v18 }
 0x43d   : > { %v4648_v6 = vpop.eup %4647  ;;  %v2665_v38 = vadd.f32 1.0, %v4646_v40  ;;  %4663 = verf.f32 %v2419_v34  ;;  %v1955_v13 = vadd.f32 %v6547_v3, %v6331_v20  ;;  %v2148_v37 = vadd.f32 %v6549_v24, %v6333_v10 }
 0x43e   : > { %v6699_v32 = vpop.f32.mrb[36].mxu0  ;;  %v6701_v8 = vpop.f32.mrb[36].mxu1  ;;  %v6723_v2 = vmul.f32 %v2663_v4, %v6608_v51  ;;  %v6725_v60 = vmul.f32 0.5, %v1947_v22  ;;  %v6727_v47 = vmul.f32 0.5, %v2140_v54  ;;  %v2420_v40 = vmul.f32 0.70710677, %v1953_v25 }
 0x43f   : > { %v6710_v35 = vpop.f32.mrb[37].mxu0  ;;  %v6712_v43 = vpop.f32.mrb[37].mxu1  ;;  %v6732_v3 = vmul.f32 %v2664_v14, %v6626_v61  ;;  %v6735_v24 = vmul.f32 %v2666_v36, %v6636_v1  ;;  %v2667_v4 = vadd.f32 1.0, %v4648_v6  ;;  %v6741_v22 = vmul.f32 0.5, %v2142_v42 }
 0x440   : > { %7531 = vst [vmem:[#allocation32_spill] sm:$0xff] %v6710_v35  ;;  %7532 = vst [vmem:[#allocation33_spill] sm:$0xff] %v6712_v43  ;;  %v6718_v44 = vpop.f32.mrb[38].mxu0  ;;  %v6720_v52 = vpop.f32.mrb[38].mxu1  ;;  %4665 = verf.f32 %v2420_v40  ;;  %v2421_v54 = vmul.f32 0.70710677, %v1955_v13  ;;  %v6744_v35 = vmul.f32 %v2665_v38, %v6656_v5  ;;  %v2929_v1 = vpack.c.bf16 %v6654_v59, %v6615_v55 }
 0x441   : > { %7533 = vst [vmem:[#allocation35_spill] sm:$0xff] %v6718_v44  ;;  %7534 = vst [vmem:[#allocation36_spill] sm:$0xff] %v6720_v52  ;;  %v4650_v23 = vpop.eup %4649  ;;  %v6729_v34 = vpop.f32.mrb[39].mxu0  ;;  %v6737_v44 = vmul.f32 0.5, %v1949_v41  ;;  %v2422_v52 = vmul.f32 0.70710677, %v2146_v49  ;;  %v2931_v14 = vpack.c.bf16 %v6665_v39, %v6624_v58  ;;  %v1957_v42 = vadd.f32 %v6553_v16, %v6327_v30 }
 0x442   : > { %7535 = vst [vmem:[#allocation37_spill] sm:$0xff] %v6729_v34  ;;  %v6739_v43 = vpop.f32.mrb[39].mxu1  ;;  %v4652_v51 = vpop.eup %4651  ;;  %v2668_v34 = vadd.f32 1.0, %v4650_v23  ;;  %v2423_v61 = vmul.f32 0.70710677, %v2148_v37  ;;  %v6748_v41 = vmul.f32 0.5, %v1953_v25  ;;  %3292 = vmatprep.mubr.bf16.mxu0 %v2929_v1  ;;  %v2150_v5 = vadd.f32 %v6555_v33, %v6329_v18 }
 0x443   : > { %7536 = vst [vmem:[#allocation38_spill] sm:$0xff] %v6739_v43  ;;  %v4654_v36 = vpop.eup %4653  ;;  %4667 = verf.f32 %v2422_v52  ;;  %v2670_v40 = vadd.f32 1.0, %v4652_v51  ;;  %v6754_v43 = vmul.f32 0.5, %v2146_v49  ;;  %v2928_v55 = vpack.c.bf16 %v6634_v29, %v6587_v46  ;;  %3453 = vmatprep.mubr.bf16.mxu1 %v2931_v14  ;;  %v7537_v23 = vld [vmem:[#allocation26_spill] sm:$0xff] }
 0x444   : > { %v4656_v6 = vpop.eup %4655  ;;  %v6761_v25 = vmul.f32 %v2667_v4, %v6667_v63  ;;  %4669 = verf.f32 %v2421_v54  ;;  %v2424_v58 = vmul.f32 0.70710677, %v1957_v42  ;;  %v2930_v16 = vpack.c.bf16 %v6639_v62, %v6600_v48 }
 0x445   : > { %v4658_v59 = vpop.eup %4657  ;;  %v2669_v49 = vadd.f32 1.0, %v4654_v36  ;;  %v6765_v38 = vmul.f32 0.5, %v1955_v13  ;;  %4671 = verf.f32 %v2423_v61  ;;  %v2426_v52 = vmul.f32 0.70710677, %v2150_v5  ;;  %3293 = vmatmul.mubr.bf16.gmra.mrb[76].mxu0 %v2928_v55  ;;  %v7538_v55 = vld [vmem:[#allocation27_spill] sm:$0xff] }
 0x446   : > { %v4660_v39 = vpop.eup %4659  ;;  %v6768_v46 = vmul.f32 %v2668_v34, %v6682_v7  ;;  %v2671_v29 = vadd.f32 1.0, %v4656_v6  ;;  %3454 = vmatmul.mubr.bf16.gmra.mrb[76].mxu1 %v2930_v16  ;;  %v1959_v63 = vadd.f32 %v6564_v12, %v6331_v20  ;;  %v2152_v51 = vadd.f32 %v7537_v23, %v6333_v10 }
 0x447   : > { %v4662_v33 = vpop.eup %4661  ;;  %v6775_v62 = vmul.f32 %v2670_v40, %v6690_v28  ;;  %v6777_v13 = vmul.f32 0.5, %v2148_v37  ;;  %4673 = verf.f32 %v2424_v58  ;;  %v1963_v4 = vadd.f32 %v6595_v9, %v6327_v30 }
 0x448   : > { %v4664_v48 = vpop.eup %4663  ;;  %v2672_v7 = vadd.f32 1.0, %v4658_v59  ;;  %v2674_v34 = vadd.f32 1.0, %v4660_v39  ;;  %4675 = verf.f32 %v2426_v52  ;;  %v2425_v54 = vmul.f32 0.70710677, %v1959_v63 }
 0x449   : > { %v6782_v61 = vmul.f32 %v2669_v49, %v6695_v21  ;;  %v2673_v12 = vadd.f32 1.0, %v4662_v33  ;;  %v6784_v1 = vmul.f32 0.5, %v1957_v42  ;;  %v2427_v36 = vmul.f32 0.70710677, %v2152_v51 }
 0x44a   : > { %v4666_v14 = vpop.eup %4665  ;;  %v6787_v28 = vmul.f32 %v2671_v29, %v6697_v0  ;;  %v2675_v37 = vadd.f32 1.0, %v4664_v48  ;;  %v2428_v6 = vmul.f32 0.70710677, %v1963_v4  ;;  %v2156_v9 = vadd.f32 %v6597_v31, %v6329_v18 }
 0x44b   : > { %v6791_v40 = vmul.f32 0.5, %v2150_v5  ;;  %4677 = verf.f32 %v2425_v54  ;;  %v1965_v21 = vadd.f32 %v6604_v15, %v6331_v20  ;;  %v2158_v42 = vadd.f32 %v7538_v55, %v6333_v10 }
 0x44c   : > { %v6798_v58 = vmul.f32 %v2672_v7, %v6725_v60  ;;  %v6801_v0 = vmul.f32 %v2674_v34, %v6727_v47  ;;  %v6803_v16 = vmul.f32 0.5, %v1959_v63  ;;  %v2430_v39 = vmul.f32 0.70710677, %v2156_v9 }
 0x44d   : > { %v4668_v59 = vpop.eup %4667  ;;  %v6806_v31 = vmul.f32 %v2673_v12, %v6737_v44  ;;  %v2676_v5 = vadd.f32 1.0, %v4666_v14  ;;  %4679 = verf.f32 %v2427_v36  ;;  %v2429_v49 = vmul.f32 0.70710677, %v1965_v21 }
 0x44e   : > { %v4670_v15 = vpop.eup %4669  ;;  %v6809_v52 = vmul.f32 %v2675_v37, %v6741_v22  ;;  %v6811_v33 = vmul.f32 0.5, %v2152_v51  ;;  %v6813_v60 = vmul.f32 0.5, %v1963_v4  ;;  %4681 = verf.f32 %v2428_v6  ;;  %v7539_v22 = vld [vmem:[#allocation28_spill] sm:$0xff]  ;;  %v7540_v51 = vld [vmem:[#allocation29_spill] sm:$0xff] }
 0x44f   : > { %v4672_v47 = vpop.eup %4671  ;;  %v2678_v29 = vadd.f32 1.0, %v4668_v59  ;;  %4683 = verf.f32 %v2430_v39  ;;  %v2431_v63 = vmul.f32 0.70710677, %v2158_v42  ;;  %v2933_v44 = vpack.c.bf16 %v6744_v35, %v6704_v45 }
 0x450   : > { %v6817_v23 = vmul.f32 0.5, %v2156_v9  ;;  %v2935_v48 = vpack.c.bf16 %v6761_v25, %v6723_v2  ;;  %v1967_v7 = vadd.f32 %v7539_v22, %v6327_v30  ;;  %v2160_v4 = vadd.f32 %v7540_v51, %v6329_v18  ;;  %v7542_v9 = vld [vmem:[#allocation30_spill] sm:$0xff] }
 0x451   : > { %v4674_v34 = vpop.eup %4673  ;;  %v6826_v54 = vmul.f32 %v2676_v5, %v6748_v41  ;;  %4685 = verf.f32 %v2429_v49  ;;  %3300 = vmatprep.mubr.bf16.mxu0 %v2933_v44  ;;  %v2932_v45 = vpack.c.bf16 %v6732_v3, %v6680_v19  ;;  %v2934_v35 = vpack.c.bf16 %v6735_v24, %v6693_v17  ;;  %v7541_v41 = vld [vmem:[#allocation34_spill] sm:$0xff] }
 0x452   : > { %v4676_v12 = vpop.eup %4675  ;;  %v2677_v2 = vadd.f32 1.0, %v4670_v15  ;;  %v2679_v25 = vadd.f32 1.0, %v4672_v47  ;;  %v6832_v36 = vmul.f32 0.5, %v1965_v21  ;;  %3461 = vmatprep.mubr.bf16.mxu1 %v2935_v48  ;;  %v2432_v14 = vmul.f32 0.70710677, %v1967_v7 }
 0x453   : > { %4687 = verf.f32 %v2431_v63  ;;  %v2434_v37 = vmul.f32 0.70710677, %v2160_v4  ;;  %3301 = vmatmul.mubr.bf16.gmra.mrb[80].mxu0 %v2932_v45  ;;  %3462 = vmatmul.mubr.bf16.gmra.mrb[80].mxu1 %v2934_v35  ;;  %v1969_v6 = vadd.f32 %v7541_v41, %v6331_v20  ;;  %v2162_v19 = vadd.f32 %v7542_v9, %v6333_v10 }
 0x454   : > { %v6839_v3 = vmul.f32 %v2678_v29, %v6754_v43  ;;  %v2680_v17 = vadd.f32 1.0, %v4674_v34  ;;  %v1973_v24 = vadd.f32 %v6649_v50, %v6327_v30  ;;  %v2166_v21 = vadd.f32 %v6651_v56, %v6329_v18 }
 0x455   : > { %v4678_v55 = vpop.eup %4677  ;;  %v2682_v59 = vadd.f32 1.0, %v4676_v12  ;;  %v6845_v39 = vmul.f32 0.5, %v2158_v42  ;;  %4689 = verf.f32 %v2432_v14  ;;  %v2433_v5 = vmul.f32 0.70710677, %v1969_v6 }
 0x456   : > { %v6848_v49 = vmul.f32 %v2677_v2, %v6765_v38  ;;  %v6851_v15 = vmul.f32 %v2679_v25, %v6777_v13  ;;  %4691 = verf.f32 %v2434_v37  ;;  %v2435_v43 = vmul.f32 0.70710677, %v2162_v19 }
 0x457   : > { %v4680_v47 = vpop.eup %4679  ;;  %v6853_v29 = vmul.f32 0.5, %v1967_v7  ;;  %v6855_v50 = vmul.f32 0.5, %v2160_v4  ;;  %4693 = verf.f32 %v2433_v5  ;;  %v2436_v56 = vmul.f32 0.70710677, %v1973_v24 }
 0x458   : > { %v4682_v63 = vpop.eup %4681  ;;  %v6858_v42 = vmul.f32 %v2680_v17, %v6784_v1  ;;  %v2681_v44 = vadd.f32 1.0, %v4678_v55  ;;  %4695 = verf.f32 %v2435_v43  ;;  %v2438_v38 = vmul.f32 0.70710677, %v2166_v21 }
 0x459   : > { %v4684_v48 = vpop.eup %4683  ;;  %v6861_v13 = vmul.f32 %v2682_v59, %v6791_v40  ;;  %v6863_v22 = vmul.f32 0.5, %v1969_v6  ;;  %4697 = verf.f32 %v2436_v56  ;;  %v1975_v7 = vadd.f32 %v6660_v26, %v6331_v20 }
 0x45a   : > { %v2683_v51 = vadd.f32 1.0, %v4680_v47  ;;  %v6867_v4 = vmul.f32 0.5, %v2162_v19  ;;  %v2168_v1 = vadd.f32 %v6662_v27, %v6333_v10  ;;  %v2937_v34 = vpack.c.bf16 %v6806_v31, %v6782_v61 }
 0x45b   : > { %v4686_v45 = vpop.eup %4685  ;;  %v2684_v35 = vadd.f32 1.0, %v4682_v63  ;;  %v6873_v12 = vmul.f32 0.5, %v1973_v24  ;;  %v2437_v40 = vmul.f32 0.70710677, %v1975_v7  ;;  %v2939_v2 = vpack.c.bf16 %v6809_v52, %v6787_v28 }
 0x45c   : > { %v6878_v25 = vmul.f32 %v2681_v44, %v6803_v16  ;;  %v2686_v26 = vadd.f32 1.0, %v4684_v48  ;;  %4699 = verf.f32 %v2438_v38  ;;  %v2439_v14 = vmul.f32 0.70710677, %v2168_v1  ;;  %3308 = vmatprep.mubr.bf16.mxu0 %v2937_v34 }
 0x45d   : > { %v4688_v37 = vpop.eup %4687  ;;  %4701 = verf.f32 %v2437_v40  ;;  %3469 = vmatprep.mubr.bf16.mxu1 %v2939_v2  ;;  %v1977_v27 = vadd.f32 %v6669_v57, %v6327_v30  ;;  %v2170_v61 = vadd.f32 %v6675_v53, %v6329_v18  ;;  %v2936_v31 = vpack.c.bf16 %v6798_v58, %v6768_v46  ;;  %v7545_v2 = vld [vmem:[#allocation33_spill] sm:$0xff] }
 0x45e   : > { %v2685_v28 = vadd.f32 1.0, %v4686_v45  ;;  %4703 = verf.f32 %v2439_v14  ;;  %v2938_v16 = vpack.c.bf16 %v6801_v0, %v6775_v62  ;;  %v1979_v52 = vadd.f32 %v6677_v11, %v6331_v20  ;;  %v7544_v45 = vld [vmem:[#allocation32_spill] sm:$0xff] }
 0x45f   : > { %v4690_v41 = vpop.eup %4689  ;;  %v2811_v6 = vmul.f32 %v2683_v51, %v6811_v33  ;;  %v6892_v9 = vmul.f32 %v2684_v35, %v6813_v60  ;;  %v6894_v57 = vmul.f32 0.5, %v2166_v21  ;;  %v2440_v53 = vmul.f32 0.70710677, %v1977_v27  ;;  %3309 = vmatmul.mubr.bf16.gmra.mrb[84].mxu0 %v2936_v31  ;;  %v7543_v33 = vld [vmem:[#allocation31_spill] sm:$0xff] }
 0x460   : > { %v4692_v19 = vpop.eup %4691  ;;  %v6897_v46 = vmul.f32 %v2686_v26, %v6817_v23  ;;  %v2687_v58 = vadd.f32 1.0, %v4688_v37  ;;  %v2442_v17 = vmul.f32 0.70710677, %v2170_v61  ;;  %3470 = vmatmul.mubr.bf16.gmra.mrb[84].mxu1 %v2938_v16  ;;  %v2441_v62 = vmul.f32 0.70710677, %v1979_v52 }
 0x461   : > { %v4694_v0 = vpop.eup %4693  ;;  %v6899_v11 = vmul.f32 0.5, %v1975_v7  ;;  %4705 = verf.f32 %v2440_v53  ;;  %v2172_v60 = vadd.f32 %v7543_v33, %v6333_v10  ;;  %v6905_v24 = vadd.f32 %v6699_v32, %v6327_v30 }
 0x462   : > { %v4696_v21 = vpop.eup %4695  ;;  %v6908_v55 = vmul.f32 %v2685_v28, %v6832_v36  ;;  %v2688_v23 = vadd.f32 1.0, %v4690_v41  ;;  %4707 = verf.f32 %v2442_v17  ;;  %v6912_v59 = vadd.f32 %v6701_v8, %v6329_v18 }
 0x463   : > { %v4698_v5 = vpop.eup %4697  ;;  %v2690_v43 = vadd.f32 1.0, %v4692_v19  ;;  %v6914_v47 = vmul.f32 0.5, %v2168_v1  ;;  %4709 = verf.f32 %v2441_v62  ;;  %v2443_v56 = vmul.f32 0.70710677, %v2172_v60 }
 0x464   : > { %v6917_v63 = vmul.f32 %v2687_v58, %v6845_v39  ;;  %v2689_v32 = vadd.f32 1.0, %v4694_v0  ;;  %v2691_v44 = vadd.f32 1.0, %v4696_v21  ;;  %v2312_v38 = vmul.f32 0.5, %v1977_v27 }
 0x465   : > { %v2314_v36 = vmul.f32 0.5, %v2170_v61  ;;  %v2313_v48 = vmul.f32 0.5, %v1979_v52  ;;  %4711 = verf.f32 %v2443_v56  ;;  %v2444_v7 = vmul.f32 0.70710677, %v6905_v24  ;;  %v7546_v52 = vld [vmem:[#allocation35_spill] sm:$0xff] }
 0x466   : > { %v4700_v51 = vpop.eup %4699  ;;  %v6921_v8 = vmul.f32 %v2688_v23, %v6853_v29  ;;  %v2692_v34 = vadd.f32 1.0, %v4698_v5  ;;  %v2446_v1 = vmul.f32 0.70710677, %v6912_v59  ;;  %v6926_v35 = vadd.f32 %v7544_v45, %v6331_v20 }
 0x467   : > { %v4702_v39 = vpop.eup %4701  ;;  %v6929_v40 = vmul.f32 %v2690_v43, %v6855_v50  ;;  %v6933_v26 = vadd.f32 %v7545_v2, %v6333_v10  ;;  %v2941_v14 = vpack.c.bf16 %v6878_v25, %v6848_v49  ;;  %v2943_v29 = vpack.c.bf16 %v2811_v6, %v6851_v15  ;;  %v7547_v15 = vld [vmem:[#allocation36_spill] sm:$0xff] }
 0x468   : > { %v4704_v37 = vpop.eup %4703  ;;  %v2817_v27 = vmul.f32 %v2689_v32, %v6863_v22  ;;  %v2819_v61 = vmul.f32 %v2691_v44, %v6867_v4  ;;  %v2315_v31 = vmul.f32 0.5, %v2172_v60  ;;  %v2445_v28 = vmul.f32 0.70710677, %v6926_v35  ;;  %v7548_v60 = vld [vmem:[#allocation37_spill] sm:$0xff] }
 0x469   : > { %v2694_v16 = vadd.f32 1.0, %v4700_v51  ;;  %4713 = verf.f32 %v2444_v7  ;;  %v2447_v50 = vmul.f32 0.70710677, %v6933_v26  ;;  %3316 = vmatprep.mubr.bf16.mxu0 %v2941_v14  ;;  %3477 = vmatprep.mubr.bf16.mxu1 %v2943_v29  ;;  %v1987_v41 = vadd.f32 %v7546_v52, %v6327_v30 }
 0x46a   : > { %v6945_v49 = vmul.f32 %v2692_v34, %v6873_v12  ;;  %4715 = verf.f32 %v2446_v1  ;;  %v2180_v22 = vadd.f32 %v7547_v15, %v6329_v18  ;;  %v2940_v4 = vpack.c.bf16 %v6858_v42, %v6826_v54  ;;  %v7549_v54 = vld [vmem:[#allocation38_spill] sm:$0xff] }
 0x46b   : > { %v4706_v25 = vpop.eup %4705  ;;  %v2693_v6 = vadd.f32 1.0, %v4702_v39  ;;  %v2695_v53 = vadd.f32 1.0, %v4704_v37  ;;  %4717 = verf.f32 %v2445_v28  ;;  %v2448_v19 = vmul.f32 0.70710677, %v1987_v41 }
 0x46c   : > { %v4708_v58 = vpop.eup %4707  ;;  %v2696_v17 = vadd.f32 1.0, %v4706_v25  ;;  %4719 = verf.f32 %v2447_v50  ;;  %v2450_v62 = vmul.f32 0.70710677, %v2180_v22  ;;  %3317 = vmatmul.mubr.bf16.gmra.mrb[88].mxu0 %v2940_v4  ;;  %v2942_v12 = vpack.c.bf16 %v6861_v13, %v6839_v3 }
 0x46d   : > { %v4710_v0 = vpop.eup %4709  ;;  %v2698_v33 = vadd.f32 1.0, %v4708_v58  ;;  %4721 = verf.f32 %v2448_v19  ;;  %v1989_v21 = vadd.f32 %v7548_v60, %v6331_v20  ;;  %v2182_v42 = vadd.f32 %v7549_v54, %v6333_v10 }
 0x46e   : > { %v2824_v23 = vmul.f32 %v2696_v17, %v2312_v38  ;;  %v2697_v5 = vadd.f32 1.0, %v4710_v0  ;;  %4723 = verf.f32 %v2450_v62  ;;  %3478 = vmatmul.mubr.bf16.gmra.mrb[88].mxu1 %v2942_v12  ;;  %v2945_v43 = vpack.c.bf16 %v2817_v27, %v6908_v55 }
 0x46f   : > { %v4712_v56 = vpop.eup %4711  ;;  %v2822_v32 = vmul.f32 %v2694_v16, %v6894_v57  ;;  %v2821_v3 = vmul.f32 %v2693_v6, %v6899_v11  ;;  %v2826_v13 = vmul.f32 %v2698_v33, %v2314_v36  ;;  %v2449_v44 = vmul.f32 0.70710677, %v1989_v21 }
 0x470   : > { %v2825_v7 = vmul.f32 %v2697_v5, %v2313_v48  ;;  %v2699_v51 = vadd.f32 1.0, %v4712_v56  ;;  %v2451_v34 = vmul.f32 0.70710677, %v2182_v42  ;;  %3324 = vmatprep.mubr.bf16.mxu0 %v2945_v43  ;;  %v2947_v1 = vpack.c.bf16 %v2819_v61, %v6917_v63 }
 0x471   : > { %v2823_v38 = vmul.f32 %v2695_v53, %v6914_v47  ;;  %4725 = verf.f32 %v2449_v44  ;;  %v2944_v45 = vpack.c.bf16 %v6921_v8, %v6892_v9  ;;  %v2946_v55 = vpack.c.bf16 %v6929_v40, %v6897_v46 }
 0x472   : > { %v2827_v57 = vmul.f32 %v2699_v51, %v2315_v31  ;;  %4727 = verf.f32 %v2451_v34  ;;  %3485 = vmatprep.mubr.bf16.mxu1 %v2947_v1  ;;  %v2949_v11 = vpack.c.bf16 %v2825_v7, %v2821_v3  ;;  %v2948_v36 = vpack.c.bf16 %v2824_v23, %v6945_v49 }
 0x473   : > { %v4714_v48 = vpop.eup %4713  ;;  %v2950_v39 = vpack.c.bf16 %v2826_v13, %v2822_v32  ;;  %v2316_v40 = vmul.f32 0.5, %v6905_v24  ;;  %v2320_v37 = vmul.f32 0.5, %v1987_v41  ;;  %v2318_v61 = vmul.f32 0.5, %v6912_v59 }
 0x474   : > { %v4716_v2 = vpop.eup %4715  ;;  %3325 = vmatmul.mubr.bf16.gmra.mrb[92].mxu0 %v2944_v45  ;;  %v2951_v63 = vpack.c.bf16 %v2827_v57, %v2823_v38  ;;  %v2700_v29 = vadd.f32 1.0, %v4714_v48  ;;  %v2322_v31 = vmul.f32 0.5, %v2180_v22  ;;  %v2317_v53 = vmul.f32 0.5, %v6926_v35 }
 0x475   : > { %v4718_v14 = vpop.eup %4717  ;;  %3332 = vmatprep.mubr.bf16.mxu0 %v2949_v11  ;;  %v2702_v8 = vadd.f32 1.0, %v4716_v2  ;;  %v2321_v19 = vmul.f32 0.5, %v1989_v21  ;;  %v2319_v41 = vmul.f32 0.5, %v6933_v26  ;;  %v2323_v17 = vmul.f32 0.5, %v2182_v42 }
 0x476   : > { %v4720_v47 = vpop.eup %4719  ;;  %3486 = vmatmul.mubr.bf16.gmra.mrb[92].mxu1 %v2946_v55  ;;  %v2828_v16 = vmul.f32 %v2700_v29, %v2316_v40  ;;  %v2701_v50 = vadd.f32 1.0, %v4718_v14 }
 0x477   : > { %v4722_v9 = vpop.eup %4721  ;;  %3493 = vmatprep.mubr.bf16.mxu1 %v2951_v63  ;;  %v2830_v15 = vmul.f32 %v2702_v8, %v2318_v61  ;;  %v2703_v4 = vadd.f32 1.0, %v4720_v47 }
 0x478   : > { %v4724_v46 = vpop.eup %4723  ;;  %v2704_v27 = vadd.f32 1.0, %v4722_v9  ;;  %v2829_v62 = vmul.f32 %v2701_v50, %v2317_v53 }
 0x479   : > { %v2706_v28 = vadd.f32 1.0, %v4724_v46  ;;  %v2831_v0 = vmul.f32 %v2703_v4, %v2319_v41 }
 0x47a   : > { %v2832_v52 = vmul.f32 %v2704_v27, %v2320_v37 }
 0x47b   : > { %v4726_v49 = vpop.eup %4725  ;;  %v2834_v25 = vmul.f32 %v2706_v28, %v2322_v31 }
 0x47c   : > { %v4728_v6 = vpop.eup %4727  ;;  %v2705_v58 = vadd.f32 1.0, %v4726_v49  ;;  %3333 = vmatmul.mubr.bf16.gmra.mrb[96].mxu0 %v2948_v36  ;;  %v2952_v24 = vpack.c.bf16 %v2832_v52, %v2828_v16 }
 0x47d   : > { %v2707_v59 = vadd.f32 1.0, %v4728_v6  ;;  %v2954_v22 = vpack.c.bf16 %v2834_v25, %v2830_v15 }
 0x47e   : > { %v2833_v12 = vmul.f32 %v2705_v58, %v2321_v19  ;;  %3494 = vmatmul.mubr.bf16.gmra.mrb[96].mxu1 %v2950_v39 }
 0x47f   : > { %v2835_v33 = vmul.f32 %v2707_v59, %v2323_v17 }
 0x480   : > { %v2953_v60 = vpack.c.bf16 %v2833_v12, %v2829_v62 }
 0x481   : > { %v2955_v54 = vpack.c.bf16 %v2835_v33, %v2831_v0 }
 0x482   : > { %3340 = vmatprep.mubr.bf16.mxu0 %v2953_v60 }
 0x483   : > { %3501 = vmatprep.mubr.bf16.mxu1 %v2955_v54 }
 0x484   : > { %3341 = vmatmul.mubr.bf16.gmra.mrb[100].mxu0 %v2952_v24 }
 0x486   : > { %3502 = vmatmul.mubr.bf16.gmra.mrb[100].mxu1 %v2954_v22 }
 0x48e   : > { %v1992_v35 = vpop.f32.mrb[40].mxu0  ;;  %v2185_v21 = vpop.f32.mrb[40].mxu1 }
 0x48f   : > { %v1993_v23 = vadd.f32 %v1992_v35, %v6327_v30  ;;  %v2186_v26 = vadd.f32 %v2185_v21, %v6329_v18  ;;  %v1994_v42 = vpop.f32.mrb[41].mxu0  ;;  %v2187_v5 = vpop.f32.mrb[41].mxu1 }
 0x490   : > { %v1995_v43 = vadd.f32 %v1994_v42, %v6331_v20  ;;  %v2188_v56 = vadd.f32 %v2187_v5, %v6333_v10  ;;  %v1996_v32 = vpop.f32.mrb[42].mxu0  ;;  %v2189_v3 = vpop.f32.mrb[42].mxu1 }
 0x491   : > { %v2452_v13 = vmul.f32 0.70710677, %v1993_v23  ;;  %v2454_v44 = vmul.f32 0.70710677, %v2186_v26  ;;  %v1997_v34 = vadd.f32 %v1996_v32, %v6327_v30  ;;  %v2190_v1 = vadd.f32 %v2189_v3, %v6329_v18  ;;  %v1998_v38 = vpop.f32.mrb[43].mxu0  ;;  %v2191_v45 = vpop.f32.mrb[43].mxu1 }
 0x492   : > { %v2453_v7 = vmul.f32 0.70710677, %v1995_v43  ;;  %v2455_v51 = vmul.f32 0.70710677, %v2188_v56  ;;  %v1999_v55 = vadd.f32 %v1998_v38, %v6331_v20  ;;  %v2192_v57 = vadd.f32 %v2191_v45, %v6333_v10 }
 0x493   : > { %4729 = verf.f32 %v2452_v13  ;;  %v2456_v11 = vmul.f32 0.70710677, %v1997_v34  ;;  %v2458_v36 = vmul.f32 0.70710677, %v2190_v1  ;;  %v2324_v16 = vmul.f32 0.5, %v1993_v23 }
 0x494   : > { %4731 = verf.f32 %v2454_v44  ;;  %v2457_v48 = vmul.f32 0.70710677, %v1999_v55  ;;  %v2459_v2 = vmul.f32 0.70710677, %v2192_v57  ;;  %v2326_v6 = vmul.f32 0.5, %v2186_v26 }
 0x495   : > { %4733 = verf.f32 %v2453_v7  ;;  %v2325_v53 = vmul.f32 0.5, %v1995_v43  ;;  %v2327_v19 = vmul.f32 0.5, %v2188_v56  ;;  %v2328_v24 = vmul.f32 0.5, %v1997_v34 }
 0x496   : > { %4735 = verf.f32 %v2455_v51  ;;  %v2002_v39 = vpop.f32.mrb[44].mxu0  ;;  %v2195_v14 = vpop.f32.mrb[44].mxu1  ;;  %v6987_v12 = vmul.f32 0.5, %v2190_v1  ;;  %v6989_v0 = vmul.f32 0.5, %v1999_v55  ;;  %v6991_v33 = vmul.f32 0.5, %v2192_v57 }
 0x497   : > { %4737 = verf.f32 %v2456_v11  ;;  %v2003_v63 = vadd.f32 %v2002_v39, %v6327_v30  ;;  %v2004_v47 = vpop.f32.mrb[45].mxu0  ;;  %v2196_v29 = vadd.f32 %v2195_v14, %v6329_v18  ;;  %v2197_v8 = vpop.f32.mrb[45].mxu1 }
 0x498   : > { %4739 = verf.f32 %v2458_v36  ;;  %v2005_v9 = vadd.f32 %v2004_v47, %v6331_v20  ;;  %v2006_v46 = vpop.f32.mrb[46].mxu0  ;;  %v2198_v37 = vadd.f32 %v2197_v8, %v6333_v10  ;;  %v2199_v27 = vpop.f32.mrb[46].mxu1 }
 0x499   : > { %4741 = verf.f32 %v2457_v48  ;;  %v2460_v40 = vmul.f32 0.70710677, %v2003_v63  ;;  %v2008_v61 = vpop.f32.mrb[47].mxu0  ;;  %v2462_v31 = vmul.f32 0.70710677, %v2196_v29  ;;  %v2201_v28 = vpop.f32.mrb[47].mxu1  ;;  %v2007_v49 = vadd.f32 %v2006_v46, %v6327_v30 }
 0x49a   : > { %4743 = verf.f32 %v2459_v2  ;;  %v2461_v50 = vmul.f32 0.70710677, %v2005_v9  ;;  %v2463_v52 = vmul.f32 0.70710677, %v2198_v37  ;;  %v2200_v15 = vadd.f32 %v2199_v27, %v6329_v18 }
 0x49b   : > { %4745 = verf.f32 %v2460_v40  ;;  %v2009_v4 = vadd.f32 %v2008_v61, %v6331_v20  ;;  %v2464_v41 = vmul.f32 0.70710677, %v2007_v49  ;;  %v2202_v17 = vadd.f32 %v2201_v28, %v6333_v10 }
 0x49c   : > { %4747 = verf.f32 %v2462_v31  ;;  %v2466_v60 = vmul.f32 0.70710677, %v2200_v15  ;;  %v6993_v21 = vmul.f32 0.5, %v2003_v63  ;;  %v6995_v23 = vmul.f32 0.5, %v2196_v29 }
 0x49d   : > { %v4730_v25 = vpop.eup %4729  ;;  %4749 = verf.f32 %v2461_v50  ;;  %v2465_v26 = vmul.f32 0.70710677, %v2009_v4  ;;  %v6997_v3 = vmul.f32 0.5, %v2005_v9  ;;  %v2467_v1 = vmul.f32 0.70710677, %v2202_v17 }
 0x49e   : > { %v4732_v58 = vpop.eup %4731  ;;  %4751 = verf.f32 %v2463_v52  ;;  %v2012_v59 = vpop.f32.mrb[48].mxu0  ;;  %v2708_v56 = vadd.f32 1.0, %v4730_v25  ;;  %v2335_v48 = vmul.f32 0.5, %v2198_v37  ;;  %v7003_v39 = vmul.f32 0.5, %v2007_v49 }
 0x49f   : > { %v2205_v22 = vpop.f32.mrb[48].mxu1  ;;  %v4734_v62 = vpop.eup %4733  ;;  %v2710_v32 = vadd.f32 1.0, %v4732_v58  ;;  %4753 = verf.f32 %v2464_v41  ;;  %v2013_v57 = vadd.f32 %v2012_v59, %v6327_v30  ;;  %v7008_v47 = vmul.f32 0.5, %v2200_v15 }
 0x4a0   : > { %v2014_v54 = vpop.f32.mrb[49].mxu0  ;;  %v4736_v35 = vpop.eup %4735  ;;  %v2709_v51 = vadd.f32 1.0, %v4734_v62  ;;  %4755 = verf.f32 %v2466_v60  ;;  %v2206_v11 = vadd.f32 %v2205_v22, %v6329_v18  ;;  %v7006_v14 = vmul.f32 %v2708_v56, %v2324_v16 }
 0x4a1   : > { %v2207_v42 = vpop.f32.mrb[49].mxu1  ;;  %v2016_v5 = vpop.f32.mrb[50].mxu0  ;;  %v2711_v34 = vadd.f32 1.0, %v4736_v35  ;;  %4757 = verf.f32 %v2465_v26  ;;  %v2015_v2 = vadd.f32 %v2014_v54, %v6331_v20  ;;  %v7010_v29 = vmul.f32 0.5, %v2009_v4 }
 0x4a2   : > { %v4738_v43 = vpop.eup %4737  ;;  %v2209_v13 = vpop.f32.mrb[50].mxu1  ;;  %4759 = verf.f32 %v2467_v1  ;;  %v2468_v9 = vmul.f32 0.70710677, %v2013_v57  ;;  %v7012_v46 = vmul.f32 %v2710_v32, %v2326_v6  ;;  %v7014_v27 = vmul.f32 0.5, %v2202_v17 }
 0x4a3   : > { %v2018_v44 = vpop.f32.mrb[51].mxu0  ;;  %v4740_v7 = vpop.eup %4739  ;;  %v2712_v55 = vadd.f32 1.0, %v4738_v43  ;;  %v2470_v37 = vmul.f32 0.70710677, %v2206_v11  ;;  %v7016_v50 = vmul.f32 %v2709_v51, %v2325_v53  ;;  %v7018_v52 = vmul.f32 %v2711_v34, %v2327_v19 }
 0x4a4   : > { %v6999_v38 = vpop.f32.mrb[51].mxu1  ;;  %v4742_v45 = vpop.eup %4741  ;;  %v2714_v40 = vadd.f32 1.0, %v4740_v7  ;;  %4761 = verf.f32 %v2468_v9  ;;  %v2469_v41 = vmul.f32 0.70710677, %v2015_v2  ;;  %v2208_v19 = vadd.f32 %v2207_v42, %v6333_v10 }
 0x4a5   : > { %v4744_v36 = vpop.eup %4743  ;;  %v7020_v16 = vmul.f32 %v2712_v55, %v2328_v24  ;;  %v2713_v49 = vadd.f32 1.0, %v4742_v45  ;;  %4763 = verf.f32 %v2470_v37  ;;  %v2017_v24 = vadd.f32 %v2016_v5, %v6327_v30 }
 0x4a6   : > { %v4746_v63 = vpop.eup %4745  ;;  %v2022_v61 = vpop.f32.mrb[52].mxu0  ;;  %v2715_v6 = vadd.f32 1.0, %v4744_v36  ;;  %v7037_v60 = vmul.f32 %v2714_v40, %v6987_v12  ;;  %v2210_v26 = vadd.f32 %v2209_v13, %v6329_v18  ;;  %v7040_v56 = vmul.f32 0.5, %v2013_v57 }
 0x4a7   : > { %v4748_v8 = vpop.eup %4747  ;;  %v2215_v31 = vpop.f32.mrb[52].mxu1  ;;  %v2716_v58 = vadd.f32 1.0, %v4746_v63  ;;  %4765 = verf.f32 %v2469_v41  ;;  %v2471_v32 = vmul.f32 0.70710677, %v2208_v19  ;;  %v2019_v42 = vadd.f32 %v2018_v44, %v6331_v20 }
 0x4a8   : > { %v4750_v28 = vpop.eup %4749  ;;  %v7022_v15 = vpop.f32.mrb[53].mxu0  ;;  %v2718_v53 = vadd.f32 1.0, %v4748_v8  ;;  %v2841_v5 = vmul.f32 %v2713_v49, %v6989_v0  ;;  %v2843_v51 = vmul.f32 %v2715_v6, %v6991_v33  ;;  %v7045_v34 = vmul.f32 0.5, %v2206_v11 }
 0x4a9   : > { %v7024_v4 = vpop.f32.mrb[53].mxu1  ;;  %v4752_v25 = vpop.eup %4751  ;;  %v2717_v54 = vadd.f32 1.0, %v4750_v28  ;;  %v2472_v12 = vmul.f32 0.70710677, %v2017_v24  ;;  %v7048_v45 = vmul.f32 %v2716_v58, %v6993_v21  ;;  %v7053_v55 = vmul.f32 0.5, %v2015_v2 }
 0x4aa   : > { %v7026_v17 = vpop.f32.mrb[54].mxu0  ;;  %v7028_v59 = vpop.f32.mrb[54].mxu1  ;;  %v2719_v35 = vadd.f32 1.0, %v4752_v25  ;;  %v7051_v13 = vmul.f32 %v2718_v53, %v6995_v23  ;;  %v2474_v57 = vmul.f32 0.70710677, %v2210_v26  ;;  %4767 = verf.f32 %v2471_v32 }
 0x4ab   : > { %v7032_v22 = vpop.f32.mrb[55].mxu0  ;;  %v7034_v62 = vpop.f32.mrb[55].mxu1  ;;  %v7056_v44 = vmul.f32 %v2717_v54, %v6997_v3  ;;  %4769 = verf.f32 %v2472_v12  ;;  %v2473_v9 = vmul.f32 0.70710677, %v2019_v42  ;;  %v2212_v23 = vadd.f32 %v6999_v38, %v6333_v10 }
 0x4ac   : > { %v4754_v43 = vpop.eup %4753  ;;  %v7058_v0 = vmul.f32 %v2719_v35, %v2335_v48  ;;  %v2023_v48 = vadd.f32 %v2022_v61, %v6327_v30  ;;  %v2216_v40 = vadd.f32 %v2215_v31, %v6329_v18  ;;  %v2957_v37 = vpack.c.bf16 %v2841_v5, %v7016_v50 }
 0x4ad   : > { %v4756_v7 = vpop.eup %4755  ;;  %v2720_v33 = vadd.f32 1.0, %v4754_v43  ;;  %4771 = verf.f32 %v2474_v57  ;;  %v2475_v6 = vmul.f32 0.70710677, %v2212_v23  ;;  %v2959_v38 = vpack.c.bf16 %v2843_v51, %v7018_v52 }
 0x4ae   : > { %v4758_v1 = vpop.eup %4757  ;;  %v7060_v11 = vpop.f32.mrb[56].mxu0  ;;  %v2722_v21 = vadd.f32 1.0, %v4756_v7  ;;  %v7082_v54 = vmul.f32 0.5, %v2208_v19  ;;  %v7084_v61 = vmul.f32 0.5, %v2017_v24  ;;  %v7086_v31 = vmul.f32 0.5, %v2210_v26  ;;  %3348 = vmatprep.mubr.bf16.mxu0 %v2957_v37 }
 0x4af   : > { %v4760_v36 = vpop.eup %4759  ;;  %v7062_v63 = vpop.f32.mrb[56].mxu1  ;;  %v2721_v3 = vadd.f32 1.0, %v4758_v1  ;;  %v2476_v50 = vmul.f32 0.70710677, %v2023_v48  ;;  %v7089_v43 = vmul.f32 %v2720_v33, %v7003_v39  ;;  %4773 = verf.f32 %v2473_v9  ;;  %3509 = vmatprep.mubr.bf16.mxu1 %v2959_v38 }
 0x4b0   : > { %v7066_v2 = vpop.f32.mrb[57].mxu0  ;;  %v7068_v8 = vpop.f32.mrb[57].mxu1  ;;  %v2723_v25 = vadd.f32 1.0, %v4760_v36  ;;  %v7092_v32 = vmul.f32 %v2722_v21, %v7008_v47  ;;  %v2025_v52 = vadd.f32 %v7022_v15, %v6331_v20  ;;  %4775 = verf.f32 %v2475_v6 }
 0x4b1   : > { %v7073_v28 = vpop.f32.mrb[58].mxu0  ;;  %v7075_v49 = vpop.f32.mrb[58].mxu1  ;;  %v2478_v19 = vmul.f32 0.70710677, %v2216_v40  ;;  %v2218_v24 = vadd.f32 %v7024_v4, %v6333_v10  ;;  %v2956_v26 = vpack.c.bf16 %v7020_v16, %v7006_v14  ;;  %v7101_v39 = vmul.f32 %v2721_v3, %v7010_v29 }
 0x4b2   : > { %v7078_v58 = vpop.f32.mrb[59].mxu0  ;;  %v7080_v41 = vpop.f32.mrb[59].mxu1  ;;  %v7104_v47 = vmul.f32 %v2723_v25, %v7014_v27  ;;  %v7106_v51 = vmul.f32 0.5, %v2019_v42  ;;  %4777 = verf.f32 %v2476_v50  ;;  %v2477_v15 = vmul.f32 0.70710677, %v2025_v52 }
 0x4b3   : > { %v4762_v53 = vpop.eup %4761  ;;  %3349 = vmatmul.mubr.bf16.gmra.mrb[104].mxu0 %v2956_v26  ;;  %v2958_v4 = vpack.c.bf16 %v7037_v60, %v7012_v46  ;;  %v7112_v14 = vmul.f32 0.5, %v2212_v23  ;;  %v2479_v16 = vmul.f32 0.70710677, %v2218_v24  ;;  %v2027_v29 = vadd.f32 %v7026_v17, %v6327_v30 }
 0x4b4   : > { %v4764_v35 = vpop.eup %4763  ;;  %v2724_v5 = vadd.f32 1.0, %v4762_v53  ;;  %v2220_v27 = vadd.f32 %v7028_v59, %v6329_v18  ;;  %v7122_v21 = vmul.f32 0.5, %v2023_v48  ;;  %4779 = verf.f32 %v2478_v19 }
 0x4b5   : > { %v4766_v7 = vpop.eup %4765  ;;  %v2726_v12 = vadd.f32 1.0, %v4764_v35  ;;  %3510 = vmatmul.mubr.bf16.gmra.mrb[104].mxu1 %v2958_v4  ;;  %v2029_v46 = vadd.f32 %v7032_v22, %v6331_v20  ;;  %4781 = verf.f32 %v2477_v15  ;;  %v2480_v59 = vmul.f32 0.70710677, %v2027_v29 }
 0x4b6   : > { %v7110_v1 = vpop.f32.mrb[60].mxu0  ;;  %v7118_v42 = vpop.f32.mrb[60].mxu1  ;;  %v2725_v33 = vadd.f32 1.0, %v4766_v7  ;;  %v2222_v23 = vadd.f32 %v7034_v62, %v6333_v10  ;;  %v2033_v3 = vadd.f32 %v7060_v11, %v6327_v30  ;;  %v7139_v25 = vmul.f32 %v2724_v5, %v7040_v56 }
 0x4b7   : > { %v7120_v57 = vpop.f32.mrb[61].mxu0  ;;  %v4768_v36 = vpop.eup %4767  ;;  %v7142_v22 = vmul.f32 %v2726_v12, %v7045_v34  ;;  %v7144_v6 = vmul.f32 0.5, %v2216_v40  ;;  %v2482_v38 = vmul.f32 0.70710677, %v2220_v27  ;;  %v7148_v35 = vmul.f32 0.5, %v2025_v52 }
 0x4b8   : > { %v7126_v60 = vpop.f32.mrb[61].mxu1  ;;  %v7128_v9 = vpop.f32.mrb[62].mxu0  ;;  %v2727_v62 = vadd.f32 1.0, %v4768_v36  ;;  %v7150_v11 = vmul.f32 0.5, %v2218_v24  ;;  %4783 = verf.f32 %v2479_v16  ;;  %v7153_v19 = vmul.f32 %v2725_v33, %v7053_v55 }
 0x4b9   : > { %v4770_v17 = vpop.eup %4769  ;;  %v7134_v48 = vpop.f32.mrb[62].mxu1  ;;  %4785 = verf.f32 %v2480_v59  ;;  %v2481_v26 = vmul.f32 0.70710677, %v2029_v46  ;;  %v7155_v7 = vmul.f32 0.5, %v2027_v29  ;;  %v2483_v40 = vmul.f32 0.70710677, %v2222_v23 }
 0x4ba   : > { %v7136_v37 = vpop.f32.mrb[63].mxu0  ;;  %v7146_v53 = vpop.f32.mrb[63].mxu1  ;;  %v2728_v56 = vadd.f32 1.0, %v4770_v17  ;;  %4787 = verf.f32 %v2482_v38  ;;  %v2484_v5 = vmul.f32 0.70710677, %v2033_v3  ;;  %v2226_v52 = vadd.f32 %v7062_v63, %v6329_v18 }
 0x4bb   : > { %v4772_v50 = vpop.eup %4771  ;;  %4789 = verf.f32 %v2481_v26  ;;  %v2961_v24 = vpack.c.bf16 %v7101_v39, %v7056_v44  ;;  %v7162_v55 = vmul.f32 %v2727_v62, %v7082_v54  ;;  %v2963_v4 = vpack.c.bf16 %v7104_v47, %v7058_v0 }
 0x4bc   : > { %v4774_v34 = vpop.eup %4773  ;;  %v2730_v15 = vadd.f32 1.0, %v4772_v50  ;;  %4791 = verf.f32 %v2483_v40  ;;  %v2035_v16 = vadd.f32 %v7066_v2, %v6331_v20  ;;  %v7169_v36 = vmul.f32 %v2728_v56, %v7084_v61 }
 0x4bd   : > { %v4776_v12 = vpop.eup %4775  ;;  %v2729_v33 = vadd.f32 1.0, %v4774_v34  ;;  %v7171_v17 = vmul.f32 0.5, %v2220_v27  ;;  %4793 = verf.f32 %v2484_v5  ;;  %3356 = vmatprep.mubr.bf16.mxu0 %v2961_v24  ;;  %v7173_v63 = vmul.f32 0.5, %v2029_v46  ;;  %3517 = vmatprep.mubr.bf16.mxu1 %v2963_v4 }
 0x4be   : > { %v4778_v29 = vpop.eup %4777  ;;  %v2731_v44 = vadd.f32 1.0, %v4776_v12  ;;  %v2486_v54 = vmul.f32 0.70710677, %v2226_v52  ;;  %v2485_v39 = vmul.f32 0.70710677, %v2035_v16  ;;  %v7176_v0 = vmul.f32 %v2730_v15, %v7086_v31 }
 0x4bf   : > { %v4780_v59 = vpop.eup %4779  ;;  %v2228_v2 = vadd.f32 %v7068_v8, %v6333_v10  ;;  %v2960_v61 = vpack.c.bf16 %v7089_v43, %v7048_v45  ;;  %v2962_v47 = vpack.c.bf16 %v7092_v32, %v7051_v13  ;;  %v2732_v38 = vadd.f32 1.0, %v4778_v29 }
 0x4c0   : > { %v4782_v27 = vpop.eup %4781  ;;  %v7184_v46 = vmul.f32 0.5, %v2222_v23  ;;  %v2037_v50 = vadd.f32 %v7073_v28, %v6327_v30  ;;  %v2230_v31 = vadd.f32 %v7075_v49, %v6329_v18  ;;  %v2857_v62 = vmul.f32 %v2729_v33, %v7106_v51 }
 0x4c1   : > { %v7191_v56 = vmul.f32 0.5, %v2033_v3  ;;  %4795 = verf.f32 %v2486_v54  ;;  %v2487_v8 = vmul.f32 0.70710677, %v2228_v2  ;;  %3357 = vmatmul.mubr.bf16.gmra.mrb[108].mxu0 %v2960_v61  ;;  %3518 = vmatmul.mubr.bf16.gmra.mrb[108].mxu1 %v2962_v47  ;;  %v2859_v13 = vmul.f32 %v2731_v44, %v7112_v14 }
 0x4c2   : > { %v4784_v45 = vpop.eup %4783  ;;  %v2734_v43 = vadd.f32 1.0, %v4780_v59  ;;  %4797 = verf.f32 %v2485_v39  ;;  %v2488_v32 = vmul.f32 0.70710677, %v2037_v50  ;;  %v2733_v26 = vadd.f32 1.0, %v4782_v27 }
 0x4c3   : > { %v4786_v23 = vpop.eup %4785  ;;  %v7194_v28 = vmul.f32 0.5, %v2226_v52  ;;  %4799 = verf.f32 %v2487_v8  ;;  %v2490_v49 = vmul.f32 0.70710677, %v2230_v31  ;;  %v7197_v51 = vmul.f32 %v2732_v38, %v7122_v21 }
 0x4c4   : > { %v4788_v34 = vpop.eup %4787  ;;  %4801 = verf.f32 %v2488_v32  ;;  %v2039_v3 = vadd.f32 %v7078_v58, %v6331_v20  ;;  %v2232_v14 = vadd.f32 %v7080_v41, %v6333_v10  ;;  %v2735_v5 = vadd.f32 1.0, %v4784_v45 }
 0x4c5   : > { %v4790_v40 = vpop.eup %4789  ;;  %v7203_v12 = vmul.f32 0.5, %v2035_v16  ;;  %4803 = verf.f32 %v2490_v49  ;;  %v7207_v15 = vadd.f32 %v7110_v1, %v6327_v30  ;;  %v7210_v21 = vmul.f32 %v2734_v43, %v7144_v6 }
 0x4c6   : > { %v4792_v52 = vpop.eup %4791  ;;  %v7212_v24 = vmul.f32 0.5, %v2228_v2  ;;  %v2489_v4 = vmul.f32 0.70710677, %v2039_v3  ;;  %v7216_v58 = vadd.f32 %v7118_v42, %v6329_v18  ;;  %v7219_v16 = vmul.f32 %v2733_v26, %v7148_v35 }
 0x4c7   : > { %v4794_v41 = vpop.eup %4793  ;;  %v2736_v29 = vadd.f32 1.0, %v4786_v23  ;;  %v2738_v33 = vadd.f32 1.0, %v4788_v34  ;;  %v2491_v44 = vmul.f32 0.70710677, %v2232_v14  ;;  %v2737_v1 = vadd.f32 1.0, %v4790_v40 }
 0x4c8   : > { %v2360_v54 = vmul.f32 0.5, %v2037_v50  ;;  %v2362_v39 = vmul.f32 0.5, %v2230_v31  ;;  %4805 = verf.f32 %v2489_v4  ;;  %v7222_v6 = vmul.f32 %v2735_v5, %v7150_v11 }
 0x4c9   : > { %v2739_v59 = vadd.f32 1.0, %v4792_v52  ;;  %4807 = verf.f32 %v2491_v44  ;;  %v2492_v2 = vmul.f32 0.70710677, %v7207_v15  ;;  %v2740_v42 = vadd.f32 1.0, %v4794_v41 }
 0x4ca   : > { %v2494_v61 = vmul.f32 0.70710677, %v7216_v58  ;;  %v7228_v35 = vadd.f32 %v7120_v57, %v6331_v20  ;;  %v7232_v47 = vadd.f32 %v7126_v60, %v6333_v10  ;;  %v7235_v38 = vmul.f32 %v2736_v29, %v7155_v7 }
 0x4cb   : > { %v4796_v27 = vpop.eup %4795  ;;  %v7238_v11 = vmul.f32 %v2738_v33, %v7171_v17  ;;  %v2965_v50 = vpack.c.bf16 %v2857_v62, %v7153_v19  ;;  %v2967_v31 = vpack.c.bf16 %v2859_v13, %v7162_v55  ;;  %v2865_v45 = vmul.f32 %v2737_v1, %v7173_v63 }
 0x4cc   : > { %v4798_v8 = vpop.eup %4797  ;;  %v2361_v57 = vmul.f32 0.5, %v2039_v3  ;;  %v2363_v43 = vmul.f32 0.5, %v2232_v14  ;;  %v2493_v32 = vmul.f32 0.70710677, %v7228_v35  ;;  %4809 = verf.f32 %v2492_v2 }
 0x4cd   : > { %v4800_v60 = vpop.eup %4799  ;;  %v2495_v23 = vmul.f32 0.70710677, %v7232_v47  ;;  %3364 = vmatprep.mubr.bf16.mxu0 %v2965_v50  ;;  %3525 = vmatprep.mubr.bf16.mxu1 %v2967_v31  ;;  %v2047_v7 = vadd.f32 %v7128_v9, %v6327_v30  ;;  %v7249_v19 = vadd.f32 %v7134_v48, %v6329_v18  ;;  %v2867_v17 = vmul.f32 %v2739_v59, %v7184_v46 }
 0x4ce   : > { %v4802_v55 = vpop.eup %4801  ;;  %v7253_v63 = vmul.f32 %v2740_v42, %v7191_v56  ;;  %4811 = verf.f32 %v2494_v61  ;;  %v2964_v62 = vpack.c.bf16 %v7169_v36, %v7139_v25  ;;  %v2742_v26 = vadd.f32 1.0, %v4796_v27 }
 0x4cf   : > { %v4804_v13 = vpop.eup %4803  ;;  %v2744_v49 = vadd.f32 1.0, %v4802_v55  ;;  %4813 = verf.f32 %v2493_v32  ;;  %v2496_v34 = vmul.f32 0.70710677, %v2047_v7  ;;  %v2741_v30 = vadd.f32 1.0, %v4798_v8 }
 0x4d0   : > { %v2746_v9 = vadd.f32 1.0, %v4804_v13  ;;  %4815 = verf.f32 %v2495_v23  ;;  %v2498_v18 = vmul.f32 0.70710677, %v7249_v19  ;;  %3365 = vmatmul.mubr.bf16.gmra.mrb[112].mxu0 %v2964_v62  ;;  %v2743_v48 = vadd.f32 1.0, %v4800_v60 }
 0x4d1   : > { %4817 = verf.f32 %v2496_v34  ;;  %v2966_v46 = vpack.c.bf16 %v7176_v0, %v7142_v22  ;;  %v2049_v56 = vadd.f32 %v7136_v37, %v6331_v20  ;;  %v2872_v36 = vmul.f32 %v2744_v49, %v2360_v54 }
 0x4d2   : > { %v4806_v25 = vpop.eup %4805  ;;  %4819 = verf.f32 %v2498_v18  ;;  %v2242_v3 = vadd.f32 %v7146_v53, %v6333_v10  ;;  %v2969_v14 = vpack.c.bf16 %v2865_v45, %v7219_v16  ;;  %v2874_v5 = vmul.f32 %v2746_v9, %v2362_v39 }
 0x4d3   : > { %v4808_v40 = vpop.eup %4807  ;;  %v2745_v52 = vadd.f32 1.0, %v4806_v25  ;;  %3526 = vmatmul.mubr.bf16.gmra.mrb[112].mxu1 %v2966_v46  ;;  %v2497_v4 = vmul.f32 0.70710677, %v2049_v56  ;;  %v2971_v41 = vpack.c.bf16 %v2867_v17, %v7222_v6  ;;  %v2870_v22 = vmul.f32 %v2742_v26, %v7194_v28 }
 0x4d4   : > { %v2747_v0 = vadd.f32 1.0, %v4808_v40  ;;  %v2499_v29 = vmul.f32 0.70710677, %v2242_v3  ;;  %3372 = vmatprep.mubr.bf16.mxu0 %v2969_v14  ;;  %v2968_v20 = vpack.c.bf16 %v7235_v38, %v7197_v51  ;;  %v2869_v37 = vmul.f32 %v2741_v30, %v7203_v12  ;;  %v7282_v14 = vld [vmem:[%s7458_s9] ss:$0 sm:$0xff] }
 0x4d5   : > { %v2873_v10 = vmul.f32 %v2745_v52, %v2361_v57  ;;  %4821 = verf.f32 %v2497_v4  ;;  %3533 = vmatprep.mubr.bf16.mxu1 %v2971_v41  ;;  %v2970_v53 = vpack.c.bf16 %v7238_v11, %v7210_v21  ;;  %v2871_v16 = vmul.f32 %v2743_v48, %v7212_v24 }
 0x4d6   : > { %v2875_v33 = vmul.f32 %v2747_v0, %v2363_v43  ;;  %4823 = verf.f32 %v2499_v29  ;;  %v2972_v28 = vpack.c.bf16 %v2872_v36, %v7253_v63  ;;  %v4810_v44 = vpop.eup %4809  ;;  %v2974_v54 = vpack.c.bf16 %v2874_v5, %v2870_v22 }
 0x4d7   : > { %v2973_v1 = vpack.c.bf16 %v2873_v10, %v2869_v37  ;;  %v2748_v59 = vadd.f32 1.0, %v4810_v44  ;;  %v2364_v24 = vmul.f32 0.5, %v7207_v15  ;;  %v2368_v61 = vmul.f32 0.5, %v2047_v7 }
 0x4d8   : > { %v4812_v39 = vpop.eup %4811  ;;  %3373 = vmatmul.mubr.bf16.gmra.mrb[116].mxu0 %v2968_v20  ;;  %v2975_v51 = vpack.c.bf16 %v2875_v33, %v2871_v16  ;;  %v2366_v38 = vmul.f32 0.5, %v7216_v58  ;;  %v2370_v11 = vmul.f32 0.5, %v7249_v19  ;;  %v2365_v55 = vmul.f32 0.5, %v7228_v35 }
 0x4d9   : > { %v4814_v6 = vpop.eup %4813  ;;  %3380 = vmatprep.mubr.bf16.mxu0 %v2973_v1  ;;  %v2750_v42 = vadd.f32 1.0, %v4812_v39  ;;  %v2876_v31 = vmul.f32 %v2748_v59, %v2364_v24  ;;  %v2369_v17 = vmul.f32 0.5, %v2049_v56  ;;  %v2367_v63 = vmul.f32 0.5, %v7232_v47 }
 0x4da   : > { %v4816_v12 = vpop.eup %4815  ;;  %v2749_v8 = vadd.f32 1.0, %v4814_v6  ;;  %v2371_v58 = vmul.f32 0.5, %v2242_v3 }
 0x4db   : > { %v4818_v2 = vpop.eup %4817  ;;  %3534 = vmatmul.mubr.bf16.gmra.mrb[116].mxu1 %v2970_v53  ;;  %v2878_v43 = vmul.f32 %v2750_v42, %v2366_v38  ;;  %v2751_v32 = vadd.f32 1.0, %v4816_v12 }
 0x4dc   : > { %v4820_v21 = vpop.eup %4819  ;;  %v2752_v27 = vadd.f32 1.0, %v4818_v2  ;;  %3541 = vmatprep.mubr.bf16.mxu1 %v2975_v51  ;;  %v2877_v13 = vmul.f32 %v2749_v8, %v2365_v55 }
 0x4dd   : > { %v2754_v50 = vadd.f32 1.0, %v4820_v21  ;;  %v2879_v49 = vmul.f32 %v2751_v32, %v2367_v63 }
 0x4de   : > { %v2880_v45 = vmul.f32 %v2752_v27, %v2368_v61 }
 0x4df   : > { %v4822_v57 = vpop.eup %4821  ;;  %v2882_v60 = vmul.f32 %v2754_v50, %v2370_v11 }
 0x4e0   : > { %v4824_v23 = vpop.eup %4823  ;;  %v2753_v15 = vadd.f32 1.0, %v4822_v57  ;;  %3381 = vmatmul.mubr.bf16.gmra.mrb[120].mxu0 %v2972_v28  ;;  %v2976_v7 = vpack.c.bf16 %v2880_v45, %v2876_v31 }
 0x4e1   : > { %v2755_v62 = vadd.f32 1.0, %v4824_v23  ;;  %v2978_v19 = vpack.c.bf16 %v2882_v60, %v2878_v43 }
 0x4e2   : > { %v2881_v26 = vmul.f32 %v2753_v15, %v2369_v17 }
 0x4e3   : > { %v2883_v34 = vmul.f32 %v2755_v62, %v2371_v58  ;;  %3542 = vmatmul.mubr.bf16.gmra.mrb[120].mxu1 %v2974_v54 }
 0x4e4   : > { %v2977_v30 = vpack.c.bf16 %v2881_v26, %v2877_v13 }
 0x4e5   : > { %v2979_v9 = vpack.c.bf16 %v2883_v34, %v2879_v49 }
 0x4e6   : > { %3388 = vmatprep.mubr.bf16.mxu0 %v2977_v30 }
 0x4e7   : > { %3549 = vmatprep.mubr.bf16.mxu1 %v2979_v9 }
 0x4e8   : > { %3389 = vmatmul.mubr.bf16.gmra.mrb[124].mxu0 %v2976_v7 }
 0x4eb   : > { %3550 = vmatmul.mubr.bf16.gmra.mrb[124].mxu1 %v2978_v19 }
 0x4ed   : > { %v4051_v35 = vpop.f32.mrb[64].mxu0 }
 0x4ee   : > { %v4163_v18 = vpop.f32.mrb[64].mxu1  ;;  %v4052_v48 = vpop.f32.mrb[65].mxu0 }
 0x4ef   : > { %v4053_v46 = vadd.f32 %v4052_v48, %v4051_v35  ;;  %v4164_v47 = vpop.f32.mrb[65].mxu1  ;;  %v4054_v56 = vpop.f32.mrb[66].mxu0 }
 0x4f0   : > { %v4165_v25 = vadd.f32 %v4164_v47, %v4163_v18  ;;  %v4166_v36 = vpop.f32.mrb[66].mxu1  ;;  %v4055_v3 = vpop.f32.mrb[67].mxu0 }
 0x4f1   : > { %v4056_v40 = vadd.f32 %v4055_v3, %v4054_v56  ;;  %v4167_v5 = vpop.f32.mrb[67].mxu1 }
 0x4f2   : > { %v3432_v52 = vadd.f32 %v4165_v25, %v4053_v46  ;;  %v4168_v4 = vadd.f32 %v4167_v5, %v4166_v36 }
 0x4f4   : > { %v3664_v41 = vadd.f32 %v7282_v14, %v3432_v52  ;;  %v3435_v22 = vadd.f32 %v4168_v4, %v4056_v40 }
 0x4f6   : > { %3696 = vst [vmem:[%s7286_s20] sm:$0xff] %v3664_v41  ;;  %v3665_v0 = vadd.f32 %v7282_v14, %v3435_v22 }
 0x4f8   : > { %3697 = vst [vmem:[%s7286_s20 + $0x8] sm:$0xff] %v3665_v0 }
 0x4fb   : > { %v4057_v29 = vpop.f32.mrb[68].mxu0 }
 0x4fc   : > { %v4058_v20 = vpop.f32.mrb[69].mxu0 }
 0x4fd   : > { %v4059_v37 = vadd.f32 %v4058_v20, %v4057_v29  ;;  %v4060_v10 = vpop.f32.mrb[70].mxu0 }
 0x4fe   : > { %v4169_v53 = vpop.f32.mrb[68].mxu1  ;;  %v4061_v16 = vpop.f32.mrb[71].mxu0 }
 0x4ff   : > { %v4170_v33 = vpop.f32.mrb[69].mxu1  ;;  %v4062_v28 = vadd.f32 %v4061_v16, %v4060_v10 }
 0x500   : > { %v4171_v44 = vadd.f32 %v4170_v33, %v4169_v53  ;;  %v4172_v1 = vpop.f32.mrb[70].mxu1 }
 0x501   : > { %v4173_v54 = vpop.f32.mrb[71].mxu1 }
 0x502   : > { %v3440_v39 = vadd.f32 %v4171_v44, %v4059_v37  ;;  %v4174_v51 = vadd.f32 %v4173_v54, %v4172_v1 }
 0x504   : > { %v3666_v6 = vadd.f32 %v7282_v14, %v3440_v39  ;;  %v3443_v12 = vadd.f32 %v4174_v51, %v4062_v28 }
 0x506   : > { %3698 = vst [vmem:[%s7286_s20 + $0x10] sm:$0xff] %v3666_v6  ;;  %v3667_v59 = vadd.f32 %v7282_v14, %v3443_v12 }
 0x508   : > { %3699 = vst [vmem:[%s7286_s20 + $0x18] sm:$0xff] %v3667_v59  ;;  %v4063_v2 = vpop.f32.mrb[72].mxu0  ;;  %v4175_v42 = vpop.f32.mrb[72].mxu1 }
 0x509   : > { %v4064_v21 = vpop.f32.mrb[73].mxu0  ;;  %v4176_v61 = vpop.f32.mrb[73].mxu1 }
 0x50a   : > { %v4065_v24 = vadd.f32 %v4064_v21, %v4063_v2  ;;  %v4066_v27 = vpop.f32.mrb[74].mxu0  ;;  %v4177_v38 = vadd.f32 %v4176_v61, %v4175_v42  ;;  %v4178_v11 = vpop.f32.mrb[74].mxu1 }
 0x50b   : > { %v4067_v50 = vpop.f32.mrb[75].mxu0  ;;  %v4179_v8 = vpop.f32.mrb[75].mxu1 }
 0x50c   : > { %v4068_v31 = vadd.f32 %v4067_v50, %v4066_v27  ;;  %v3448_v45 = vadd.f32 %v4177_v38, %v4065_v24  ;;  %v4180_v57 = vadd.f32 %v4179_v8, %v4178_v11 }
 0x50e   : > { %v3668_v43 = vadd.f32 %v7282_v14, %v3448_v45  ;;  %v3451_v32 = vadd.f32 %v4180_v57, %v4068_v31 }
 0x510   : > { %3700 = vst [vmem:[%s7286_s20 + $0x20] sm:$0xff] %v3668_v43  ;;  %v3669_v60 = vadd.f32 %v7282_v14, %v3451_v32 }
 0x512   : > { %3701 = vst [vmem:[%s7286_s20 + $0x28] sm:$0xff] %v3669_v60 }
 0x518   : > { %v4069_v23 = vpop.f32.mrb[76].mxu0 }
 0x519   : > { %v4181_v55 = vpop.f32.mrb[76].mxu1  ;;  %v4070_v17 = vpop.f32.mrb[77].mxu0 }
 0x51a   : > { %v4071_v15 = vadd.f32 %v4070_v17, %v4069_v23  ;;  %v4182_v7 = vpop.f32.mrb[77].mxu1  ;;  %v4072_v63 = vpop.f32.mrb[78].mxu0 }
 0x51b   : > { %v4183_v58 = vadd.f32 %v4182_v7, %v4181_v55  ;;  %v4184_v62 = vpop.f32.mrb[78].mxu1  ;;  %v4073_v19 = vpop.f32.mrb[79].mxu0 }
 0x51c   : > { %v4074_v13 = vadd.f32 %v4073_v19, %v4072_v63  ;;  %v4185_v26 = vpop.f32.mrb[79].mxu1 }
 0x51d   : > { %v3456_v49 = vadd.f32 %v4183_v58, %v4071_v15  ;;  %v4186_v34 = vadd.f32 %v4185_v26, %v4184_v62 }
 0x51f   : > { %v3670_v30 = vadd.f32 %v7282_v14, %v3456_v49  ;;  %v3459_v9 = vadd.f32 %v4186_v34, %v4074_v13 }
 0x521   : > { %3702 = vst [vmem:[%s7286_s20 + $0x30] sm:$0xff] %v3670_v30  ;;  %v3671_v35 = vadd.f32 %v7282_v14, %v3459_v9 }
 0x523   : > { %3703 = vst [vmem:[%s7286_s20 + $0x38] sm:$0xff] %v3671_v35 }
 0x526   : > { %v4075_v18 = vpop.f32.mrb[80].mxu0  ;;  %v4187_v48 = vpop.f32.mrb[80].mxu1 }
 0x527   : > { %v4076_v46 = vpop.f32.mrb[81].mxu0  ;;  %v4188_v47 = vpop.f32.mrb[81].mxu1 }
 0x528   : > { %v4077_v56 = vadd.f32 %v4076_v46, %v4075_v18  ;;  %v4189_v25 = vadd.f32 %v4188_v47, %v4187_v48  ;;  %v4078_v36 = vpop.f32.mrb[82].mxu0  ;;  %v4190_v3 = vpop.f32.mrb[82].mxu1 }
 0x529   : > { %v4079_v40 = vpop.f32.mrb[83].mxu0  ;;  %v4191_v5 = vpop.f32.mrb[83].mxu1 }
 0x52a   : > { %v3464_v52 = vadd.f32 %v4189_v25, %v4077_v56  ;;  %v4080_v4 = vadd.f32 %v4079_v40, %v4078_v36  ;;  %v4192_v41 = vadd.f32 %v4191_v5, %v4190_v3 }
 0x52c   : > { %v3672_v22 = vadd.f32 %v7282_v14, %v3464_v52  ;;  %v3467_v0 = vadd.f32 %v4192_v41, %v4080_v4 }
 0x52e   : > { %3704 = vst [vmem:[%s7286_s20 + $0x40] sm:$0xff] %v3672_v22  ;;  %v3673_v29 = vadd.f32 %v7282_v14, %v3467_v0 }
 0x530   : > { %3705 = vst [vmem:[%s7286_s20 + $0x48] sm:$0xff] %v3673_v29 }
 0x532   : > { %v4081_v20 = vpop.f32.mrb[84].mxu0 }
 0x533   : > { %v4193_v37 = vpop.f32.mrb[84].mxu1  ;;  %v4082_v10 = vpop.f32.mrb[85].mxu0 }
 0x534   : > { %v4083_v53 = vadd.f32 %v4082_v10, %v4081_v20  ;;  %v4194_v16 = vpop.f32.mrb[85].mxu1  ;;  %v4084_v33 = vpop.f32.mrb[86].mxu0 }
 0x535   : > { %v4195_v28 = vadd.f32 %v4194_v16, %v4193_v37  ;;  %v4196_v44 = vpop.f32.mrb[86].mxu1  ;;  %v4085_v1 = vpop.f32.mrb[87].mxu0 }
 0x536   : > { %v4086_v54 = vadd.f32 %v4085_v1, %v4084_v33  ;;  %v4197_v39 = vpop.f32.mrb[87].mxu1 }
 0x537   : > { %v3472_v51 = vadd.f32 %v4195_v28, %v4083_v53  ;;  %v4198_v6 = vadd.f32 %v4197_v39, %v4196_v44 }
 0x539   : > { %v3674_v12 = vadd.f32 %v7282_v14, %v3472_v51  ;;  %v3475_v59 = vadd.f32 %v4198_v6, %v4086_v54 }
 0x53b   : > { %3706 = vst [vmem:[%s7286_s20 + $0x50] sm:$0xff] %v3674_v12  ;;  %v3675_v2 = vadd.f32 %v7282_v14, %v3475_v59 }
 0x53d   : > { %3707 = vst [vmem:[%s7286_s20 + $0x58] sm:$0xff] %v3675_v2 }
 0x53f   : > { %v4087_v42 = vpop.f32.mrb[88].mxu0 }
 0x540   : > { %v4088_v21 = vpop.f32.mrb[89].mxu0 }
 0x541   : > { %v4199_v24 = vpop.f32.mrb[88].mxu1  ;;  %v4089_v61 = vadd.f32 %v4088_v21, %v4087_v42  ;;  %v4090_v27 = vpop.f32.mrb[90].mxu0 }
 0x542   : > { %v4200_v38 = vpop.f32.mrb[89].mxu1  ;;  %v4091_v11 = vpop.f32.mrb[91].mxu0 }
 0x543   : > { %v4201_v50 = vadd.f32 %v4200_v38, %v4199_v24  ;;  %v4202_v31 = vpop.f32.mrb[90].mxu1  ;;  %v4092_v8 = vadd.f32 %v4091_v11, %v4090_v27 }
 0x544   : > { %v4203_v45 = vpop.f32.mrb[91].mxu1 }
 0x545   : > { %v3480_v57 = vadd.f32 %v4201_v50, %v4089_v61  ;;  %v4204_v43 = vadd.f32 %v4203_v45, %v4202_v31 }
 0x547   : > { %v3676_v32 = vadd.f32 %v7282_v14, %v3480_v57  ;;  %v3483_v60 = vadd.f32 %v4204_v43, %v4092_v8  ;;  %v4093_v23 = vpop.f32.mrb[92].mxu0 }
 0x548   : > { %v4094_v55 = vpop.f32.mrb[93].mxu0 }
 0x549   : > { %3708 = vst [vmem:[%s7286_s20 + $0x60] sm:$0xff] %v3676_v32  ;;  %v3677_v17 = vadd.f32 %v7282_v14, %v3483_v60  ;;  %v4205_v15 = vpop.f32.mrb[92].mxu1  ;;  %v4095_v7 = vadd.f32 %v4094_v55, %v4093_v23  ;;  %v4096_v63 = vpop.f32.mrb[94].mxu0 }
 0x54a   : > { %v4206_v58 = vpop.f32.mrb[93].mxu1  ;;  %v4097_v62 = vpop.f32.mrb[95].mxu0 }
 0x54b   : > { %3709 = vst [vmem:[%s7286_s20 + $0x68] sm:$0xff] %v3677_v17  ;;  %v4207_v19 = vadd.f32 %v4206_v58, %v4205_v15  ;;  %v4208_v13 = vpop.f32.mrb[94].mxu1  ;;  %v4098_v26 = vadd.f32 %v4097_v62, %v4096_v63 }
 0x54c   : > { %v4209_v49 = vpop.f32.mrb[95].mxu1 }
 0x54d   : > { %v3488_v34 = vadd.f32 %v4207_v19, %v4095_v7  ;;  %v4210_v30 = vadd.f32 %v4209_v49, %v4208_v13 }
 0x54e   : > { %4954 = shalt.err (!%p4951_p7)
}
 0x54f   : > { %s4955_s29 = scalar_lea.hbm %s7321_s25, 4096  ;;  %s4959_s6 = scalar_lea.hbm %s7551_s23, 8192 }
 0x550   : > { %p4956_p11 = scmp.ne.s32.totalorder %s7321_s25, %s4955_s29  ;;  %p4960_p12 = scmp.lt.u32.totalorder %s7321_s25, %s7551_s23 }
 0x551   : > { %p4961_p13 = scmp.lt.u32.totalorder %s4959_s6, %s4955_s29  ;;  %p4963_p1 = scmp.lt.u32.totalorder %s4955_s29, %s7321_s25 }
 0x552   : > { %p4957_p2 = pnand %p4956_p11, %p7552_p6 }
 0x553   : > { %p4962_p0 = por %p4961_p13, %p4960_p12 }
 0x554   : > { %p4958_p8 = pneg %p4957_p2 }
 0x555   : > { %p4964_p10 = por %p4963_p1, %p4962_p0 }
 0x557   : > { %p4965_p3 = pnand %p4964_p10, %p4958_p8 }
 0x559   : > { %4968 = shalt.err (!%p4965_p3)
}
 0x55a   : > { %s5081_s26 = smov 128   ;;  %s5082_s14 = smov 8   ;;  %v3678_v9 = vadd.f32 %v7282_v14, %v3488_v34  ;;  %v3491_v35 = vadd.f32 %v4210_v30, %v4098_v26  ;;  %v4099_v18 = vpop.f32.mrb[96].mxu0  ;;  %v4211_v47 = vpop.f32.mrb[96].mxu1 }
 0x55b   : > { %4272 = dma.vmem_to_hbm [thread:$0]  (%p7552_p6), %s7324_s24, 4096, %s7321_s25, %s3734_s15, %s5081_s26, %s5081_s26, %s5082_s14   ;;  %v4100_v48 = vpop.f32.mrb[97].mxu0  ;;  %v4212_v36 = vpop.f32.mrb[97].mxu1 }
 0x55c   : > { %3710 = vst [vmem:[%s7286_s20 + $0x70] sm:$0xff] %v3678_v9  ;;  %v3679_v46 = vadd.f32 %v7282_v14, %v3491_v35  ;;  %v4101_v56 = vadd.f32 %v4100_v48, %v4099_v18  ;;  %v4102_v25 = vpop.f32.mrb[98].mxu0  ;;  %v4213_v40 = vadd.f32 %v4212_v36, %v4211_v47  ;;  %v4214_v5 = vpop.f32.mrb[98].mxu1  ;;  %s3747_s25 = sshll.u32 %s7286_s20, 4  ;;  %s7553_s11 = sld [smem:[#allocation42_spill]]  ;;  %s7396_s25 = int_to_ptr.vmem [resolvable:$true] %s3747_s25 }
 0x55d   : > { %v4103_v3 = vpop.f32.mrb[99].mxu0  ;;  %v4215_v4 = vpop.f32.mrb[99].mxu1  ;;  %s3729_s8 = scalar_lea.sflag [#allocation6], %s5376_s28  ;;  %s4969_s29 = scalar_lea.vmem %s7396_s25, 4096 }
 0x55e   : > { %3711 = vst [vmem:[%s7286_s20 + $0x78] sm:$0xff] %v3679_v46  ;;  %v4104_v52 = vadd.f32 %v4103_v3, %v4102_v25  ;;  %v3496_v41 = vadd.f32 %v4213_v40, %v4101_v56  ;;  %v4216_v22 = vadd.f32 %v4215_v4, %v4214_v5  ;;  %v4105_v20 = vpop.f32.mrb[100].mxu0  ;;  %v4217_v53 = vpop.f32.mrb[100].mxu1  ;;  %p4970_p4 = scmp.ne.s32.totalorder %s7396_s25, %s4969_s29  ;;  %s5083_s13 = smov [#allocation12]  }
 0x55f   : > { %v4106_v37 = vpop.f32.mrb[101].mxu0  ;;  %v4218_v28 = vpop.f32.mrb[101].mxu1  ;;  %s4973_s12 = sshll.u32 %s5083_s13, 4  ;;  %s4974_s12 = int_to_ptr.vmem [resolvable:$false] %s4973_s12 }
 0x560   : > { %v3680_v0 = vadd.f32 %v7282_v14, %v3496_v41  ;;  %v3499_v29 = vadd.f32 %v4216_v22, %v4104_v52  ;;  %v4107_v16 = vadd.f32 %v4106_v37, %v4105_v20  ;;  %v4108_v33 = vpop.f32.mrb[102].mxu0  ;;  %v4219_v1 = vadd.f32 %v4218_v28, %v4217_v53  ;;  %v4220_v54 = vpop.f32.mrb[102].mxu1  ;;  %p4971_p9 = pnand %p4970_p4, %p7552_p6  ;;  %s4975_s10 = scalar_lea.vmem %s4974_s12, 8192 }
 0x561   : > { %v4109_v44 = vpop.f32.mrb[103].mxu0  ;;  %v4221_v51 = vpop.f32.mrb[103].mxu1  ;;  %p4976_p7 = scmp.lt.s32.totalorder %s7396_s25, %s4974_s12  ;;  %p4977_p11 = scmp.lt.s32.totalorder %s4975_s10, %s4969_s29 }
 0x562   : > { %3712 = vst [vmem:[%s7286_s20 + $0x80] sm:$0xff] %v3680_v0  ;;  %v3681_v10 = vadd.f32 %v7282_v14, %v3499_v29  ;;  %v4110_v39 = vadd.f32 %v4109_v44, %v4108_v33  ;;  %v3504_v6 = vadd.f32 %v4219_v1, %v4107_v16  ;;  %v4222_v12 = vadd.f32 %v4221_v51, %v4220_v54  ;;  %s7394_s16 = scalar_lea.hbm %s7553_s11, %s4033_s0  ;;  %p4972_p5 = pneg %p4971_p9 }
 0x563   : > { %p4978_p2 = por %p4977_p11, %p4976_p7 }
 0x564   : > { %3713 = vst [vmem:[%s7286_s20 + $0x88] sm:$0xff] %v3681_v10  ;;  %v3682_v59 = vadd.f32 %v7282_v14, %v3504_v6  ;;  %v3507_v2 = vadd.f32 %v4222_v12, %v4110_v39 }
 0x565   : > { %p4979_p8 = pnand %p4978_p2, %p4972_p5 }
 0x566   : > { %3714 = vst [vmem:[%s7286_s20 + $0x90] sm:$0xff] %v3682_v59  ;;  %v3683_v42 = vadd.f32 %v7282_v14, %v3507_v2 }
 0x568   : > { %3715 = vst [vmem:[%s7286_s20 + $0x98] sm:$0xff] %v3683_v42 }
 0x586   : > { %v4111_v21 = vpop.f32.mrb[104].mxu0 }
 0x587   : > { %v4112_v24 = vpop.f32.mrb[105].mxu0 }
 0x588   : > { %v4223_v61 = vpop.f32.mrb[104].mxu1  ;;  %v4113_v27 = vadd.f32 %v4112_v24, %v4111_v21  ;;  %v4114_v38 = vpop.f32.mrb[106].mxu0 }
 0x589   : > { %v4224_v11 = vpop.f32.mrb[105].mxu1  ;;  %v4115_v50 = vpop.f32.mrb[107].mxu0 }
 0x58a   : > { %v4225_v31 = vadd.f32 %v4224_v11, %v4223_v61  ;;  %v4226_v8 = vpop.f32.mrb[106].mxu1  ;;  %v4116_v45 = vadd.f32 %v4115_v50, %v4114_v38 }
 0x58b   : > { %v4227_v57 = vpop.f32.mrb[107].mxu1 }
 0x58c   : > { %v3512_v43 = vadd.f32 %v4225_v31, %v4113_v27  ;;  %v4228_v32 = vadd.f32 %v4227_v57, %v4226_v8 }
 0x58e   : > { %v3684_v60 = vadd.f32 %v7282_v14, %v3512_v43  ;;  %v3515_v23 = vadd.f32 %v4228_v32, %v4116_v45 }
 0x590   : > { %3716 = vst [vmem:[%s7286_s20 + $0xa0] sm:$0xff] %v3684_v60  ;;  %v3685_v55 = vadd.f32 %v7282_v14, %v3515_v23 }
 0x592   : > { %3717 = vst [vmem:[%s7286_s20 + $0xa8] sm:$0xff] %v3685_v55 }
 0x594   : > { %v4117_v17 = vpop.f32.mrb[108].mxu0  ;;  %v4229_v15 = vpop.f32.mrb[108].mxu1 }
 0x595   : > { %v4118_v7 = vpop.f32.mrb[109].mxu0  ;;  %v4230_v63 = vpop.f32.mrb[109].mxu1 }
 0x596   : > { %v4119_v58 = vadd.f32 %v4118_v7, %v4117_v17  ;;  %v4231_v62 = vadd.f32 %v4230_v63, %v4229_v15  ;;  %v4120_v19 = vpop.f32.mrb[110].mxu0  ;;  %v4232_v13 = vpop.f32.mrb[110].mxu1 }
 0x597   : > { %v4121_v26 = vpop.f32.mrb[111].mxu0  ;;  %v4233_v49 = vpop.f32.mrb[111].mxu1 }
 0x598   : > { %v3520_v34 = vadd.f32 %v4231_v62, %v4119_v58  ;;  %v4122_v30 = vadd.f32 %v4121_v26, %v4120_v19  ;;  %v4234_v9 = vadd.f32 %v4233_v49, %v4232_v13 }
 0x59a   : > { %v3686_v35 = vadd.f32 %v7282_v14, %v3520_v34  ;;  %v3523_v18 = vadd.f32 %v4234_v9, %v4122_v30 }
 0x59c   : > { %3718 = vst [vmem:[%s7286_s20 + $0xb0] sm:$0xff] %v3686_v35  ;;  %v3687_v48 = vadd.f32 %v7282_v14, %v3523_v18 }
 0x59e   : > { %3719 = vst [vmem:[%s7286_s20 + $0xb8] sm:$0xff] %v3687_v48 }
 0x5a3   : > { %v4123_v46 = vpop.f32.mrb[112].mxu0 }
 0x5a4   : > { %v4124_v47 = vpop.f32.mrb[113].mxu0 }
 0x5a5   : > { %v4125_v56 = vadd.f32 %v4124_v47, %v4123_v46  ;;  %v4126_v25 = vpop.f32.mrb[114].mxu0 }
 0x5a6   : > { %v4235_v36 = vpop.f32.mrb[112].mxu1  ;;  %v4127_v3 = vpop.f32.mrb[115].mxu0 }
 0x5a7   : > { %v4236_v40 = vpop.f32.mrb[113].mxu1  ;;  %v4128_v5 = vadd.f32 %v4127_v3, %v4126_v25 }
 0x5a8   : > { %v4237_v52 = vadd.f32 %v4236_v40, %v4235_v36  ;;  %v4238_v4 = vpop.f32.mrb[114].mxu1 }
 0x5a9   : > { %v4239_v41 = vpop.f32.mrb[115].mxu1 }
 0x5aa   : > { %v3528_v22 = vadd.f32 %v4237_v52, %v4125_v56  ;;  %v4240_v0 = vadd.f32 %v4239_v41, %v4238_v4 }
 0x5ab   : > { %v4129_v29 = vpop.f32.mrb[116].mxu0 }
 0x5ac   : > { %v3688_v20 = vadd.f32 %v7282_v14, %v3528_v22  ;;  %v3531_v37 = vadd.f32 %v4240_v0, %v4128_v5  ;;  %v4130_v10 = vpop.f32.mrb[117].mxu0 }
 0x5ad   : > { %v4131_v53 = vadd.f32 %v4130_v10, %v4129_v29  ;;  %v4132_v16 = vpop.f32.mrb[118].mxu0 }
 0x5ae   : > { %3720 = vst [vmem:[%s7286_s20 + $0xc0] sm:$0xff] %v3688_v20  ;;  %v3689_v33 = vadd.f32 %v7282_v14, %v3531_v37  ;;  %v4241_v28 = vpop.f32.mrb[116].mxu1  ;;  %v4133_v44 = vpop.f32.mrb[119].mxu0 }
 0x5af   : > { %v4242_v1 = vpop.f32.mrb[117].mxu1  ;;  %v4134_v54 = vadd.f32 %v4133_v44, %v4132_v16 }
 0x5b0   : > { %3721 = vst [vmem:[%s7286_s20 + $0xc8] sm:$0xff] %v3689_v33  ;;  %v4243_v39 = vadd.f32 %v4242_v1, %v4241_v28  ;;  %v4244_v51 = vpop.f32.mrb[118].mxu1 }
 0x5b1   : > { %v4245_v6 = vpop.f32.mrb[119].mxu1 }
 0x5b2   : > { %v3536_v12 = vadd.f32 %v4243_v39, %v4131_v53  ;;  %v4246_v59 = vadd.f32 %v4245_v6, %v4244_v51 }
 0x5b3   : > { %v4135_v2 = vpop.f32.mrb[120].mxu0 }
 0x5b4   : > { %v3690_v42 = vadd.f32 %v7282_v14, %v3536_v12  ;;  %v3539_v21 = vadd.f32 %v4246_v59, %v4134_v54  ;;  %v4136_v24 = vpop.f32.mrb[121].mxu0 }
 0x5b5   : > { %v4137_v61 = vadd.f32 %v4136_v24, %v4135_v2  ;;  %v4138_v27 = vpop.f32.mrb[122].mxu0 }
 0x5b6   : > { %3722 = vst [vmem:[%s7286_s20 + $0xd0] sm:$0xff] %v3690_v42  ;;  %v3691_v38 = vadd.f32 %v7282_v14, %v3539_v21  ;;  %v4247_v11 = vpop.f32.mrb[120].mxu1  ;;  %v4139_v50 = vpop.f32.mrb[123].mxu0 }
 0x5b7   : > { %v4248_v31 = vpop.f32.mrb[121].mxu1  ;;  %v4140_v8 = vadd.f32 %v4139_v50, %v4138_v27 }
 0x5b8   : > { %3723 = vst [vmem:[%s7286_s20 + $0xd8] sm:$0xff] %v3691_v38  ;;  %v4249_v45 = vadd.f32 %v4248_v31, %v4247_v11  ;;  %v4250_v57 = vpop.f32.mrb[122].mxu1 }
 0x5b9   : > { %v4251_v43 = vpop.f32.mrb[123].mxu1 }
 0x5ba   : > { %v3544_v32 = vadd.f32 %v4249_v45, %v4137_v61  ;;  %v4252_v60 = vadd.f32 %v4251_v43, %v4250_v57 }
 0x5bb   : > { %v4141_v23 = vpop.f32.mrb[124].mxu0 }
 0x5bc   : > { %v3692_v55 = vadd.f32 %v7282_v14, %v3544_v32  ;;  %v3547_v17 = vadd.f32 %v4252_v60, %v4140_v8  ;;  %v4142_v15 = vpop.f32.mrb[125].mxu0 }
 0x5bd   : > { %v4143_v7 = vadd.f32 %v4142_v15, %v4141_v23  ;;  %v4144_v63 = vpop.f32.mrb[126].mxu0 }
 0x5be   : > { %3724 = vst [vmem:[%s7286_s20 + $0xe0] sm:$0xff] %v3692_v55  ;;  %v3693_v58 = vadd.f32 %v7282_v14, %v3547_v17  ;;  %v4253_v62 = vpop.f32.mrb[124].mxu1  ;;  %v4145_v19 = vpop.f32.mrb[127].mxu0 }
 0x5bf   : > { %v4254_v13 = vpop.f32.mrb[125].mxu1  ;;  %v4146_v26 = vadd.f32 %v4145_v19, %v4144_v63 }
 0x5c0   : > { %3725 = vst [vmem:[%s7286_s20 + $0xe8] sm:$0xff] %v3693_v58  ;;  %v4255_v49 = vadd.f32 %v4254_v13, %v4253_v62  ;;  %v4256_v34 = vpop.f32.mrb[126].mxu1 }
 0x5c1   : > { %v4257_v30 = vpop.f32.mrb[127].mxu1 }
 0x5c2   : > { %v3552_v9 = vadd.f32 %v4255_v49, %v4143_v7  ;;  %v4258_v35 = vadd.f32 %v4257_v30, %v4256_v34 }
 0x5c4   : > { %v3694_v18 = vadd.f32 %v7282_v14, %v3552_v9  ;;  %v3555_v48 = vadd.f32 %v4258_v35, %v4146_v26 }
 0x5c6   : > { %3726 = vst [vmem:[%s7286_s20 + $0xf0] sm:$0xff] %v3694_v18  ;;  %v3695_v46 = vadd.f32 %v7282_v14, %v3555_v48 }
 0x5c8   : > { %3727 = vst [vmem:[%s7286_s20 + $0xf8] sm:$0xff] %v3695_v46 }
 0x5c9   : > { %4982 = shalt.err (!%p4979_p8)
}
 0x5ca   : > { %s4983_s20 = scalar_lea.hbm %s7394_s16, 4096  ;;  %s4987_s17 = scalar_lea.hbm %s7553_s11, 8192 }
 0x5cb   : > { %p4984_p12 = scmp.ne.s32.totalorder %s7394_s16, %s4983_s20  ;;  %p4988_p1 = scmp.lt.u32.totalorder %s7394_s16, %s7553_s11 }
 0x5cc   : > { %p4989_p10 = scmp.lt.u32.totalorder %s4987_s17, %s4983_s20  ;;  %p4991_p4 = scmp.lt.u32.totalorder %s4983_s20, %s7394_s16 }
 0x5cd   : > { %p4985_p13 = pnand %p4984_p12, %p7552_p6 }
 0x5ce   : > { %p4990_p3 = por %p4989_p10, %p4988_p1 }
 0x5cf   : > { %p4986_p0 = pneg %p4985_p13 }
 0x5d0   : > { %p4992_p9 = por %p4991_p4, %p4990_p3 }
 0x5d2   : > { %p4993_p5 = pnand %p4992_p9, %p4986_p0 }
 0x5d4   : > { %4996 = shalt.err (!%p4993_p5)
}
 0x5d5   : > { %4271 = dma.vmem_to_hbm [thread:$0]  (%p7552_p6), %s7396_s25, 4096, %s7394_s16, %s3729_s8, %s5081_s26, %s5081_s26, %s5082_s14  }
 0x5d6 PF: > { %s7554_s15 = sld [smem:[#allocation21_spill]]  ;;  %s7555_s29 = sld [smem:[#allocation23_spill]] }
 0x5d7   : > { %p7557_p11 = scmp.ge.s32.totalorder %s5067_s22, 2 }
 0x5dc   : > { %s3778_s13 = sand.u32 1, %s7554_s15   ;;  %p7556_p7 = scmp.ne.s32.totalorder %s7555_s29, 0 }
 0x5dd   : > { %s3779_s12 = scalar_lea.sflag [#allocation6], %s3778_s13 }
 0x5de   : > { %p4290_p2 = pnand %p7557_p11, %p7556_p7 }
 0x5e0   : > { %5038 = dma.done.wait (!%p4290_p2), %s3779_s12, 4096  }
 0x5e1   : > { %5040 = vsyncadd (!%p4290_p2), %s3779_s12, 4294963200  ;;  %s3788_s30 = scalar_lea.sflag [#allocation14], %s3778_s13 }
 0x5e2   : > { %5042 = dma.done.wait (!%p4290_p2), %s3788_s30, 4096  }
 0x5e3   : > { %5044 = vsyncadd (!%p4290_p2), %s3788_s30, 4294963200  ;;  %s35_s22 = sadd.s32 1, %s5067_s22   ;;  %s7558_s28 = sld [smem:[#allocation25_spill]] }
 0x5e4   : > { %p32_p8 = scmp.ge.s32.totalorder %s35_s22, 4   ;;  %s7559_s26 = sld [smem:[#allocation24_spill]] }
 0x5e5   : > { %s7560_s17 = smov %s5051_s18  ;;  %s7561_s18 = smov %s5055_s19 }
 0x5e6   : > { %s7563_s20 = smov %s5063_s21  ;;  %34 = sbr.rel (!%p32_p8) target bundleno = 17 (0x11), region = 156 }
 0x5e9   : > { %s7562_s19 = smov %s7558_s28 }
 0x5ea   : > { %s7564_s21 = smov %s7559_s26 }
 0x5ed   :  { %3793 = vsyncpa [#allocation5], 1 }
 0x5ee   :  { %3795 = vsyncpa [#allocation5 + $0x1], 1 }
 0x5ef   :  { %3796 = vsyncpa [#allocation8], 1 }
 0x5f0   :  { %3798 = vsyncpa [#allocation8 + $0x1], 1 }
 0x5f1   :  { %3799 = vsyncpa [#allocation11], 1 }
 0x5f2   :  { %3800 = vsyncpa [#allocation6], 1 }
 0x5f3   :  { %3802 = vsyncpa [#allocation6 + $0x1], 1 }
 0x5f4   :  { %3803 = vsyncpa [#allocation14], 1 }
 0x5f5   :  { %3805 = vsyncpa [#allocation14 + $0x1], 1 }

</bundles_post_ra>
